<compile_context>
chip_gen: v7x
topology: tpu7x:2x2x1
jax: 0.10.0
libtpu: 0.0.40
codegen_flags: <defaults>
</compile_context>

<pallas_src>
import functools

import jax
import jax.numpy as jnp
from jax import lax
from jax.experimental import pallas as pl
from jax.experimental.pallas import tpu as pltpu


# ----------------------------------------------------------------------------
# Fused AFFB kernel: one grid cell = (batch element n, H-chunk c)
# ----------------------------------------------------------------------------
def _affb_kernel(w_ref, x_ref, ww_ref, wp_ref, o_ref, slab_g, slab_z, *,
                 Cin, T, H, W, KT, KH, KW, pt, ph, pw, Sh):
    c = pl.program_id(1)

    Tp = T + 2 * pt
    Wp = W + 2 * pw
    Hs = Sh + 2 * ph                  # chunk rows + halo
    To = Tp - KT + 1
    Ho = Hs - KH + 1                  # output rows per chunk
    Lm = Ho * Wp                      # matmul lane axis (incl. Wp-Wo junk cols)
    Cin_p = slab_g.shape[0]           # Cin padded to a multiple of 8
    Kp = KT * KH * KW * Cin_p
    Kpad = ww_ref.shape[1]

    # --- in-kernel zero padding: fill two (padded-H,padded-W)-flattened slabs.
    # slab_g: chunk rows + real neighbour halo (zeros at the image border) -> conv_w
    # slab_z: chunk rows only (chunk-local zero padding)                   -> conv_p
    slab_g[...] = jnp.zeros_like(slab_g)
    slab_z[...] = jnp.zeros_like(slab_z)
    for h in range(Hs):
        h_src = c * Sh - ph + h       # global (unpadded) source row
        lo = h * Wp + pw

        @pl.when((h_src >= 0) & (h_src < H))
        def _(h=h, h_src=h_src, lo=lo):
            row = x_ref[0, :, :, h_src, :]                 # (Cin, T, W)
            slab_g[:Cin, pt:pt + T, lo:lo + W] = row
            if ph <= h < ph + Sh:                          # static predicate
                slab_z[:Cin, pt:pt + T, lo:lo + W] = row

    wv = w_ref[0]                     # scalar parameter (SMEM)
    slope = jnp.float32(0.01)         # F.leaky_relu default slope
    zrows = (jnp.zeros((Kpad - Kp, Lm), slab_g.dtype) if Kpad > Kp else None)

    # --- per output-time-step: im2col (static lane-shifted windows of the
    # flattened slab -> no reshapes) and one big MXU matmul per conv.
    for t in range(To):
        def im2col(slab, t=t):
            pieces = []
            for kt in range(KT):
                for kh in range(KH):
                    for kw in range(KW):
                        off = kh * Wp + kw
                        pieces.append(slab[:, t + kt, off:off + Lm])  # (Cin_p, Lm)
            if zrows is not None:
                pieces.append(zrows)
            return jnp.concatenate(pieces, axis=0)                    # (Kpad, Lm)

        gob = jnp.dot(ww_ref[...], im2col(slab_g),
                      preferred_element_type=jnp.float32)             # (Cout, Lm)
        z = jnp.dot(wp_ref[...], im2col(slab_z),
                    preferred_element_type=jnp.float32)               # (Cout, Lm)

        # fused elementwise tail
        a = wv * gob
        feat = (jnp.where(a >= 0, a, slope * a)
                + jnp.where(z >= 0, z, slope * z))
        o_ref[0, 0, t] = feat.astype(o_ref.dtype)


def _pack_weight(wgt, cin_p, kpad):
    """(Cout,Cin,KT,KH,KW) -> (Cout,Kpad) with rows ordered (kt,kh,kw,ci)."""
    cout, cin, kt, kh, kw = wgt.shape
    w5 = jnp.transpose(wgt, (0, 2, 3, 4, 1))                    # (Cout,KT,KH,KW,Cin)
    w5 = jnp.pad(w5, ((0, 0), (0, 0), (0, 0), (0, 0), (0, cin_p - cin)))
    m = w5.reshape(cout, kt * kh * kw * cin_p)
    return jnp.pad(m, ((0, 0), (0, kpad - m.shape[1])))


# ----------------------------------------------------------------------------
# AFFB forward (public API keeps PyTorch's NCDHW convention)
# ----------------------------------------------------------------------------
def affb_forward(x, params, *, halving, padding):
    """x: (N, Cin, T, H, W) NCDHW, matching the PyTorch module (stride=1)."""
    N, Cin, T, H, W = map(int, x.shape)
    conv_w, conv_p = params["conv_w"], params["conv_p"]
    Cout, Cin_w, KT, KH, KW = map(int, conv_w.shape)
    assert Cin_w == Cin
    pt, ph, pw = padding

    n_chunks = 1 if halving == 0 else 2 ** halving
    assert H % n_chunks == 0, "H must be divisible by 2**halving"
    Sh = H // n_chunks
    if n_chunks > 1:
        # The module's chunked z only lines up with gob for a 'same' H-conv.
        assert KH == 2 * ph + 1

    Tp, Wp, Hs = T + 2 * pt, W + 2 * pw, Sh + 2 * ph
    To = Tp - KT + 1
    Ho = Hs - KH + 1
    Wo = Wp - KW + 1
    Lm = Ho * Wp
    S2 = (Hs + 1) * Wp                # +1 zero row: every im2col window in-bounds
    Cin_p = ((Cin + 7) // 8) * 8      # 8-sublane aligned contraction pieces
    Kp = KT * KH * KW * Cin_p
    Kpad = max(128, Kp)               # >=128 contraction dim (v5e MXU K tile)

    kernel = functools.partial(
        _affb_kernel, Cin=Cin, T=T, H=H, W=W, KT=KT, KH=KH, KW=KW,
        pt=pt, ph=ph, pw=pw, Sh=Sh)

    out = pl.pallas_call(
        kernel,
        out_shape=jax.ShapeDtypeStruct((N, n_chunks, To, Cout, Lm), x.dtype),
        grid=(N, n_chunks),
        in_specs=[
            pl.BlockSpec(memory_space=pltpu.MemorySpace.SMEM),            # w (1,)
            pl.BlockSpec((1, Cin, T, H, W), lambda n, c: (n, 0, 0, 0, 0)),  # x once / n
            pl.BlockSpec((Cout, Kpad), lambda n, c: (0, 0)),              # conv_w packed
            pl.BlockSpec((Cout, Kpad), lambda n, c: (0, 0)),              # conv_p packed
        ],
        out_specs=pl.BlockSpec((1, 1, To, Cout, Lm),
                               lambda n, c: (n, c, 0, 0, 0)),
        scratch_shapes=[
            pltpu.VMEM((Cin_p, Tp, S2), x.dtype),   # slab for conv_w (global halo)
            pltpu.VMEM((Cin_p, Tp, S2), x.dtype),   # slab for conv_p (chunk-local pad)
        ],
        compiler_params=pltpu.CompilerParams(
            dimension_semantics=("parallel", "parallel")),
    )(params["w"], x, _pack_weight(conv_w, Cin_p, Kpad),
      _pack_weight(conv_p, Cin_p, Kpad))

    # drop the junk W columns and restore NCDHW (layout plumbing in XLA)
    out = out.reshape(N, n_chunks, To, Cout, Ho, Wp)[..., :Wo]
    out = jnp.transpose(out, (0, 3, 2, 1, 4, 5))
    return out.reshape(N, Cout, To, n_chunks * Ho, Wo)


# ----------------------------------------------------------------------------
# Pure-JAX reference for validation
# ----------------------------------------------------------------------------
def _conv3d_ref(x, weight, padding):
    return lax.conv_general_dilated(
        x, weight, window_strides=(1, 1, 1),
        padding=[(p, p) for p in padding],
        dimension_numbers=("NCDHW", "OIDHW", "NCDHW"))


def _leaky(v, slope=0.01):
    return jnp.where(v >= 0, v, slope * v)


def affb_ref(x, params, *, halving, padding):
    gob = _conv3d_ref(x, params["conv_w"], padding)
    if halving == 0:
        z = _conv3d_ref(x, params["conv_p"], padding)
    else:
        h = x.shape[3]
        split = int(h // 2 ** halving)
        chunks = [x[:, :, :, i:i + split, :] for i in range(0, h, split)]
        z = jnp.concatenate(
            [_conv3d_ref(ck, params["conv_p"], padding) for ck in chunks], axis=3)
    return _leaky(params["w"][0] * gob) + _leaky(z)


# ----------------------------------------------------------------------------
if __name__ == "__main__":
    # Small AFFB config: in=4, out=8, kernel=3, stride=1, padding=1
    in_channels, out_channels = 4, 8
    ksize, padding = (3, 3, 3), (1, 1, 1)
    N, T, H, W = 2, 3, 8, 8

    key = jax.random.PRNGKey(0)
    kx, kw1, kw2 = jax.random.split(key, 3)
    x = jax.random.normal(kx, (N, in_channels, T, H, W), jnp.float32)
    params = {
        "conv_w": 0.1 * jax.random.normal(
            kw1, (out_channels, in_channels) + ksize, jnp.float32),
        "conv_p": 0.1 * jax.random.normal(
            kw2, (out_channels, in_channels) + ksize, jnp.float32),
        "w": jnp.ones((1,), jnp.float32) * 11.0,   # nn.Parameter(torch.ones(1)*11)
    }

    for halving in (1, 0):   # chunked and non-chunked paths
        fwd = jax.jit(functools.partial(affb_forward,
                                        halving=halving, padding=padding))
        out = jax.block_until_ready(fwd(x, params))
        ref = affb_ref(x, params, halving=halving, padding=padding)
        assert out.shape == (N, out_channels, T, H, W), out.shape
        err = float(jnp.max(jnp.abs(out - ref)))
        assert err < 1e-4, err

    print("KERNEL_OK")
</pallas_src>

<mosaic_0001>
module attributes {stable_mosaic.version = 11 : i64} {
  func.func @_affb_kernel(%arg0: i32, %arg1: i32, %arg2: memref<1xf32, #tpu.memory_space<smem>>, %arg3: memref<1x4x3x8x8xf32, #tpu.memory_space<vmem>>, %arg4: memref<8x216xf32, #tpu.memory_space<vmem>>, %arg5: memref<8x216xf32, #tpu.memory_space<vmem>>, %arg6: memref<1x1x3x8x40xf32, #tpu.memory_space<vmem>>, %arg7: memref<8x5x70xf32, #tpu.memory_space<vmem>>, %arg8: memref<8x5x70xf32, #tpu.memory_space<vmem>>) attributes {dimension_semantics = [#tpu.dimension_semantics<parallel>, #tpu.dimension_semantics<parallel>], iteration_bounds = array<i64: 2, 2>, scalar_prefetch = 0 : i64, scratch_operands = 2 : i64, tpu.core_type = #tpu.core_type<tc>, window_params = [{transform_indices = @transform_0, window_bounds = array<i64: 1>}, {transform_indices = @transform_1, window_bounds = array<i64: 1, 4, 3, 8, 8>}, {pipeline_mode = #tpu.pipeline_mode<synchronous>, transform_indices = @transform_2, window_bounds = array<i64: 8, 216>}, {pipeline_mode = #tpu.pipeline_mode<synchronous>, transform_indices = @transform_3, window_bounds = array<i64: 8, 216>}, {transform_indices = @transform_4, window_bounds = array<i64: 1, 1, 3, 8, 40>}]} {
    %cst = arith.constant 0.000000e+00 : f32
    %0 = vector.broadcast %cst : f32 to vector<8x5x70xf32>
    %c0 = arith.constant 0 : index
    %c0_0 = arith.constant 0 : index
    %c0_1 = arith.constant 0 : index
    %1 = vector.load %arg7[%c0, %c0_0, %c0_1] : memref<8x5x70xf32, #tpu.memory_space<vmem>>, vector<8x5x70xf32>
    tpu.vector_store %arg7[%c0, %c0_0, %c0_1], %0 {strides = array<i32>} : memref<8x5x70xf32, #tpu.memory_space<vmem>>, vector<8x5x70xf32>,
    %cst_2 = arith.constant 0.000000e+00 : f32
    %2 = vector.broadcast %cst_2 : f32 to vector<8x5x70xf32>
    %c0_3 = arith.constant 0 : index
    %c0_4 = arith.constant 0 : index
    %c0_5 = arith.constant 0 : index
    %3 = vector.load %arg8[%c0_3, %c0_4, %c0_5] : memref<8x5x70xf32, #tpu.memory_space<vmem>>, vector<8x5x70xf32>
    tpu.vector_store %arg8[%c0_3, %c0_4, %c0_5], %2 {strides = array<i32>} : memref<8x5x70xf32, #tpu.memory_space<vmem>>, vector<8x5x70xf32>,
    %c4_i32 = arith.constant 4 : i32
    %4 = arith.muli %arg1, %c4_i32 : i32
    %c1_i32 = arith.constant 1 : i32
    %5 = arith.subi %4, %c1_i32 : i32
    %c0_i32 = arith.constant 0 : i32
    %6 = arith.addi %5, %c0_i32 : i32
    %c0_i32_6 = arith.constant 0 : i32
    %7 = arith.cmpi sge, %6, %c0_i32_6 : i32
    %c8_i32 = arith.constant 8 : i32
    %8 = arith.cmpi slt, %6, %c8_i32 : i32
    %9 = arith.andi %7, %8 : i1
    %10 = arith.extui %9 : i1 to i32
    %c0_i32_7 = arith.constant 0 : i32
    %11 = arith.cmpi ne, %10, %c0_i32_7 : i32
    scf.if %11 {
      %c0_557 = arith.constant 0 : index
      %c0_558 = arith.constant 0 : index
      %c0_559 = arith.constant 0 : index
      %455 = arith.index_cast %6 : i32 to index
      %c0_560 = arith.constant 0 : index
      %456 = vector.load %arg3[%c0_557, %c0_558, %c0_559, %455, %c0_560] : memref<1x4x3x8x8xf32, #tpu.memory_space<vmem>>, vector<1x4x3x1x8xf32>
      %457 = vector.shape_cast %456 : vector<1x4x3x1x8xf32> to vector<4x3x8xf32>
      %c0_561 = arith.constant 0 : index
      %c1_562 = arith.constant 1 : index
      %c1_563 = arith.constant 1 : index
      %458 = vector.load %arg7[%c0_561, %c1_562, %c1_563] : memref<8x5x70xf32, #tpu.memory_space<vmem>>, vector<4x3x8xf32>
      tpu.vector_store %arg7[%c0_561, %c1_562, %c1_563], %457 {strides = array<i32>} : memref<8x5x70xf32, #tpu.memory_space<vmem>>, vector<4x3x8xf32>,
    } else {
    }
    %c4_i32_8 = arith.constant 4 : i32
    %12 = arith.muli %arg1, %c4_i32_8 : i32
    %c1_i32_9 = arith.constant 1 : i32
    %13 = arith.subi %12, %c1_i32_9 : i32
    %c1_i32_10 = arith.constant 1 : i32
    %14 = arith.addi %13, %c1_i32_10 : i32
    %c0_i32_11 = arith.constant 0 : i32
    %15 = arith.cmpi sge, %14, %c0_i32_11 : i32
    %c8_i32_12 = arith.constant 8 : i32
    %16 = arith.cmpi slt, %14, %c8_i32_12 : i32
    %17 = arith.andi %15, %16 : i1
    %18 = arith.extui %17 : i1 to i32
    %c0_i32_13 = arith.constant 0 : i32
    %19 = arith.cmpi ne, %18, %c0_i32_13 : i32
    scf.if %19 {
      %c0_557 = arith.constant 0 : index
      %c0_558 = arith.constant 0 : index
      %c0_559 = arith.constant 0 : index
      %455 = arith.index_cast %14 : i32 to index
      %c0_560 = arith.constant 0 : index
      %456 = vector.load %arg3[%c0_557, %c0_558, %c0_559, %455, %c0_560] : memref<1x4x3x8x8xf32, #tpu.memory_space<vmem>>, vector<1x4x3x1x8xf32>
      %457 = vector.shape_cast %456 : vector<1x4x3x1x8xf32> to vector<4x3x8xf32>
      %c0_561 = arith.constant 0 : index
      %c1_562 = arith.constant 1 : index
      %c11_563 = arith.constant 11 : index
      %458 = vector.load %arg7[%c0_561, %c1_562, %c11_563] : memref<8x5x70xf32, #tpu.memory_space<vmem>>, vector<4x3x8xf32>
      tpu.vector_store %arg7[%c0_561, %c1_562, %c11_563], %457 {strides = array<i32>} : memref<8x5x70xf32, #tpu.memory_space<vmem>>, vector<4x3x8xf32>,
      %c0_564 = arith.constant 0 : index
      %c1_565 = arith.constant 1 : index
      %c11_566 = arith.constant 11 : index
      %459 = vector.load %arg8[%c0_564, %c1_565, %c11_566] : memref<8x5x70xf32, #tpu.memory_space<vmem>>, vector<4x3x8xf32>
      tpu.vector_store %arg8[%c0_564, %c1_565, %c11_566], %457 {strides = array<i32>} : memref<8x5x70xf32, #tpu.memory_space<vmem>>, vector<4x3x8xf32>,
    } else {
    }
    %c4_i32_14 = arith.constant 4 : i32
    %20 = arith.muli %arg1, %c4_i32_14 : i32
    %c1_i32_15 = arith.constant 1 : i32
    %21 = arith.subi %20, %c1_i32_15 : i32
    %c2_i32 = arith.constant 2 : i32
    %22 = arith.addi %21, %c2_i32 : i32
    %c0_i32_16 = arith.constant 0 : i32
    %23 = arith.cmpi sge, %22, %c0_i32_16 : i32
    %c8_i32_17 = arith.constant 8 : i32
    %24 = arith.cmpi slt, %22, %c8_i32_17 : i32
    %25 = arith.andi %23, %24 : i1
    %26 = arith.extui %25 : i1 to i32
    %c0_i32_18 = arith.constant 0 : i32
    %27 = arith.cmpi ne, %26, %c0_i32_18 : i32
    scf.if %27 {
      %c0_557 = arith.constant 0 : index
      %c0_558 = arith.constant 0 : index
      %c0_559 = arith.constant 0 : index
      %455 = arith.index_cast %22 : i32 to index
      %c0_560 = arith.constant 0 : index
      %456 = vector.load %arg3[%c0_557, %c0_558, %c0_559, %455, %c0_560] : memref<1x4x3x8x8xf32, #tpu.memory_space<vmem>>, vector<1x4x3x1x8xf32>
      %457 = vector.shape_cast %456 : vector<1x4x3x1x8xf32> to vector<4x3x8xf32>
      %c0_561 = arith.constant 0 : index
      %c1_562 = arith.constant 1 : index
      %c21_563 = arith.constant 21 : index
      %458 = vector.load %arg7[%c0_561, %c1_562, %c21_563] : memref<8x5x70xf32, #tpu.memory_space<vmem>>, vector<4x3x8xf32>
      tpu.vector_store %arg7[%c0_561, %c1_562, %c21_563], %457 {strides = array<i32>} : memref<8x5x70xf32, #tpu.memory_space<vmem>>, vector<4x3x8xf32>,
      %c0_564 = arith.constant 0 : index
      %c1_565 = arith.constant 1 : index
      %c21_566 = arith.constant 21 : index
      %459 = vector.load %arg8[%c0_564, %c1_565, %c21_566] : memref<8x5x70xf32, #tpu.memory_space<vmem>>, vector<4x3x8xf32>
      tpu.vector_store %arg8[%c0_564, %c1_565, %c21_566], %457 {strides = array<i32>} : memref<8x5x70xf32, #tpu.memory_space<vmem>>, vector<4x3x8xf32>,
    } else {
    }
    %c4_i32_19 = arith.constant 4 : i32
    %28 = arith.muli %arg1, %c4_i32_19 : i32
    %c1_i32_20 = arith.constant 1 : i32
    %29 = arith.subi %28, %c1_i32_20 : i32
    %c3_i32 = arith.constant 3 : i32
    %30 = arith.addi %29, %c3_i32 : i32
    %c0_i32_21 = arith.constant 0 : i32
    %31 = arith.cmpi sge, %30, %c0_i32_21 : i32
    %c8_i32_22 = arith.constant 8 : i32
    %32 = arith.cmpi slt, %30, %c8_i32_22 : i32
    %33 = arith.andi %31, %32 : i1
    %34 = arith.extui %33 : i1 to i32
    %c0_i32_23 = arith.constant 0 : i32
    %35 = arith.cmpi ne, %34, %c0_i32_23 : i32
    scf.if %35 {
      %c0_557 = arith.constant 0 : index
      %c0_558 = arith.constant 0 : index
      %c0_559 = arith.constant 0 : index
      %455 = arith.index_cast %30 : i32 to index
      %c0_560 = arith.constant 0 : index
      %456 = vector.load %arg3[%c0_557, %c0_558, %c0_559, %455, %c0_560] : memref<1x4x3x8x8xf32, #tpu.memory_space<vmem>>, vector<1x4x3x1x8xf32>
      %457 = vector.shape_cast %456 : vector<1x4x3x1x8xf32> to vector<4x3x8xf32>
      %c0_561 = arith.constant 0 : index
      %c1_562 = arith.constant 1 : index
      %c31 = arith.constant 31 : index
      %458 = vector.load %arg7[%c0_561, %c1_562, %c31] : memref<8x5x70xf32, #tpu.memory_space<vmem>>, vector<4x3x8xf32>
      tpu.vector_store %arg7[%c0_561, %c1_562, %c31], %457 {strides = array<i32>} : memref<8x5x70xf32, #tpu.memory_space<vmem>>, vector<4x3x8xf32>,
      %c0_563 = arith.constant 0 : index
      %c1_564 = arith.constant 1 : index
      %c31_565 = arith.constant 31 : index
      %459 = vector.load %arg8[%c0_563, %c1_564, %c31_565] : memref<8x5x70xf32, #tpu.memory_space<vmem>>, vector<4x3x8xf32>
      tpu.vector_store %arg8[%c0_563, %c1_564, %c31_565], %457 {strides = array<i32>} : memref<8x5x70xf32, #tpu.memory_space<vmem>>, vector<4x3x8xf32>,
    } else {
    }
    %c4_i32_24 = arith.constant 4 : i32
    %36 = arith.muli %arg1, %c4_i32_24 : i32
    %c1_i32_25 = arith.constant 1 : i32
    %37 = arith.subi %36, %c1_i32_25 : i32
    %c4_i32_26 = arith.constant 4 : i32
    %38 = arith.addi %37, %c4_i32_26 : i32
    %c0_i32_27 = arith.constant 0 : i32
    %39 = arith.cmpi sge, %38, %c0_i32_27 : i32
    %c8_i32_28 = arith.constant 8 : i32
    %40 = arith.cmpi slt, %38, %c8_i32_28 : i32
    %41 = arith.andi %39, %40 : i1
    %42 = arith.extui %41 : i1 to i32
    %c0_i32_29 = arith.constant 0 : i32
    %43 = arith.cmpi ne, %42, %c0_i32_29 : i32
    scf.if %43 {
      %c0_557 = arith.constant 0 : index
      %c0_558 = arith.constant 0 : index
      %c0_559 = arith.constant 0 : index
      %455 = arith.index_cast %38 : i32 to index
      %c0_560 = arith.constant 0 : index
      %456 = vector.load %arg3[%c0_557, %c0_558, %c0_559, %455, %c0_560] : memref<1x4x3x8x8xf32, #tpu.memory_space<vmem>>, vector<1x4x3x1x8xf32>
      %457 = vector.shape_cast %456 : vector<1x4x3x1x8xf32> to vector<4x3x8xf32>
      %c0_561 = arith.constant 0 : index
      %c1_562 = arith.constant 1 : index
      %c41 = arith.constant 41 : index
      %458 = vector.load %arg7[%c0_561, %c1_562, %c41] : memref<8x5x70xf32, #tpu.memory_space<vmem>>, vector<4x3x8xf32>
      tpu.vector_store %arg7[%c0_561, %c1_562, %c41], %457 {strides = array<i32>} : memref<8x5x70xf32, #tpu.memory_space<vmem>>, vector<4x3x8xf32>,
      %c0_563 = arith.constant 0 : index
      %c1_564 = arith.constant 1 : index
      %c41_565 = arith.constant 41 : index
      %459 = vector.load %arg8[%c0_563, %c1_564, %c41_565] : memref<8x5x70xf32, #tpu.memory_space<vmem>>, vector<4x3x8xf32>
      tpu.vector_store %arg8[%c0_563, %c1_564, %c41_565], %457 {strides = array<i32>} : memref<8x5x70xf32, #tpu.memory_space<vmem>>, vector<4x3x8xf32>,
    } else {
    }
    %c4_i32_30 = arith.constant 4 : i32
    %44 = arith.muli %arg1, %c4_i32_30 : i32
    %c1_i32_31 = arith.constant 1 : i32
    %45 = arith.subi %44, %c1_i32_31 : i32
    %c5_i32 = arith.constant 5 : i32
    %46 = arith.addi %45, %c5_i32 : i32
    %c0_i32_32 = arith.constant 0 : i32
    %47 = arith.cmpi sge, %46, %c0_i32_32 : i32
    %c8_i32_33 = arith.constant 8 : i32
    %48 = arith.cmpi slt, %46, %c8_i32_33 : i32
    %49 = arith.andi %47, %48 : i1
    %50 = arith.extui %49 : i1 to i32
    %c0_i32_34 = arith.constant 0 : i32
    %51 = arith.cmpi ne, %50, %c0_i32_34 : i32
    scf.if %51 {
      %c0_557 = arith.constant 0 : index
      %c0_558 = arith.constant 0 : index
      %c0_559 = arith.constant 0 : index
      %455 = arith.index_cast %46 : i32 to index
      %c0_560 = arith.constant 0 : index
      %456 = vector.load %arg3[%c0_557, %c0_558, %c0_559, %455, %c0_560] : memref<1x4x3x8x8xf32, #tpu.memory_space<vmem>>, vector<1x4x3x1x8xf32>
      %457 = vector.shape_cast %456 : vector<1x4x3x1x8xf32> to vector<4x3x8xf32>
      %c0_561 = arith.constant 0 : index
      %c1_562 = arith.constant 1 : index
      %c51 = arith.constant 51 : index
      %458 = vector.load %arg7[%c0_561, %c1_562, %c51] : memref<8x5x70xf32, #tpu.memory_space<vmem>>, vector<4x3x8xf32>
      tpu.vector_store %arg7[%c0_561, %c1_562, %c51], %457 {strides = array<i32>} : memref<8x5x70xf32, #tpu.memory_space<vmem>>, vector<4x3x8xf32>,
    } else {
    }
    %c0_35 = arith.constant 0 : index
    %52 = memref.load %arg2[%c0_35] : memref<1xf32, #tpu.memory_space<smem>>
    %c0_36 = arith.constant 0 : index
    %c0_37 = arith.constant 0 : index
    %53 = vector.load %arg4[%c0_36, %c0_37] : memref<8x216xf32, #tpu.memory_space<vmem>>, vector<8x216xf32>
    %c0_38 = arith.constant 0 : index
    %c0_39 = arith.constant 0 : index
    %c0_40 = arith.constant 0 : index
    %54 = vector.load %arg7[%c0_38, %c0_39, %c0_40] : memref<8x5x70xf32, #tpu.memory_space<vmem>>, vector<8x1x40xf32>
    %55 = vector.shape_cast %54 : vector<8x1x40xf32> to vector<8x40xf32>
    %c0_41 = arith.constant 0 : index
    %c0_42 = arith.constant 0 : index
    %c1 = arith.constant 1 : index
    %56 = vector.load %arg7[%c0_41, %c0_42, %c1] : memref<8x5x70xf32, #tpu.memory_space<vmem>>, vector<8x1x40xf32>
    %57 = vector.shape_cast %56 : vector<8x1x40xf32> to vector<8x40xf32>
    %c0_43 = arith.constant 0 : index
    %c0_44 = arith.constant 0 : index
    %c2 = arith.constant 2 : index
    %58 = vector.load %arg7[%c0_43, %c0_44, %c2] : memref<8x5x70xf32, #tpu.memory_space<vmem>>, vector<8x1x40xf32>
    %59 = vector.shape_cast %58 : vector<8x1x40xf32> to vector<8x40xf32>
    %c0_45 = arith.constant 0 : index
    %c0_46 = arith.constant 0 : index
    %c10 = arith.constant 10 : index
    %60 = vector.load %arg7[%c0_45, %c0_46, %c10] : memref<8x5x70xf32, #tpu.memory_space<vmem>>, vector<8x1x40xf32>
    %61 = vector.shape_cast %60 : vector<8x1x40xf32> to vector<8x40xf32>
    %c0_47 = arith.constant 0 : index
    %c0_48 = arith.constant 0 : index
    %c11 = arith.constant 11 : index
    %62 = vector.load %arg7[%c0_47, %c0_48, %c11] : memref<8x5x70xf32, #tpu.memory_space<vmem>>, vector<8x1x40xf32>
    %63 = vector.shape_cast %62 : vector<8x1x40xf32> to vector<8x40xf32>
    %c0_49 = arith.constant 0 : index
    %c0_50 = arith.constant 0 : index
    %c12 = arith.constant 12 : index
    %64 = vector.load %arg7[%c0_49, %c0_50, %c12] : memref<8x5x70xf32, #tpu.memory_space<vmem>>, vector<8x1x40xf32>
    %65 = vector.shape_cast %64 : vector<8x1x40xf32> to vector<8x40xf32>
    %c0_51 = arith.constant 0 : index
    %c0_52 = arith.constant 0 : index
    %c20 = arith.constant 20 : index
    %66 = vector.load %arg7[%c0_51, %c0_52, %c20] : memref<8x5x70xf32, #tpu.memory_space<vmem>>, vector<8x1x40xf32>
    %67 = vector.shape_cast %66 : vector<8x1x40xf32> to vector<8x40xf32>
    %c0_53 = arith.constant 0 : index
    %c0_54 = arith.constant 0 : index
    %c21 = arith.constant 21 : index
    %68 = vector.load %arg7[%c0_53, %c0_54, %c21] : memref<8x5x70xf32, #tpu.memory_space<vmem>>, vector<8x1x40xf32>
    %69 = vector.shape_cast %68 : vector<8x1x40xf32> to vector<8x40xf32>
    %c0_55 = arith.constant 0 : index
    %c0_56 = arith.constant 0 : index
    %c22 = arith.constant 22 : index
    %70 = vector.load %arg7[%c0_55, %c0_56, %c22] : memref<8x5x70xf32, #tpu.memory_space<vmem>>, vector<8x1x40xf32>
    %71 = vector.shape_cast %70 : vector<8x1x40xf32> to vector<8x40xf32>
    %c0_57 = arith.constant 0 : index
    %c1_58 = arith.constant 1 : index
    %c0_59 = arith.constant 0 : index
    %72 = vector.load %arg7[%c0_57, %c1_58, %c0_59] : memref<8x5x70xf32, #tpu.memory_space<vmem>>, vector<8x1x40xf32>
    %73 = vector.shape_cast %72 : vector<8x1x40xf32> to vector<8x40xf32>
    %c0_60 = arith.constant 0 : index
    %c1_61 = arith.constant 1 : index
    %c1_62 = arith.constant 1 : index
    %74 = vector.load %arg7[%c0_60, %c1_61, %c1_62] : memref<8x5x70xf32, #tpu.memory_space<vmem>>, vector<8x1x40xf32>
    %75 = vector.shape_cast %74 : vector<8x1x40xf32> to vector<8x40xf32>
    %c0_63 = arith.constant 0 : index
    %c1_64 = arith.constant 1 : index
    %c2_65 = arith.constant 2 : index
    %76 = vector.load %arg7[%c0_63, %c1_64, %c2_65] : memref<8x5x70xf32, #tpu.memory_space<vmem>>, vector<8x1x40xf32>
    %77 = vector.shape_cast %76 : vector<8x1x40xf32> to vector<8x40xf32>
    %c0_66 = arith.constant 0 : index
    %c1_67 = arith.constant 1 : index
    %c10_68 = arith.constant 10 : index
    %78 = vector.load %arg7[%c0_66, %c1_67, %c10_68] : memref<8x5x70xf32, #tpu.memory_space<vmem>>, vector<8x1x40xf32>
    %79 = vector.shape_cast %78 : vector<8x1x40xf32> to vector<8x40xf32>
    %c0_69 = arith.constant 0 : index
    %c1_70 = arith.constant 1 : index
    %c11_71 = arith.constant 11 : index
    %80 = vector.load %arg7[%c0_69, %c1_70, %c11_71] : memref<8x5x70xf32, #tpu.memory_space<vmem>>, vector<8x1x40xf32>
    %81 = vector.shape_cast %80 : vector<8x1x40xf32> to vector<8x40xf32>
    %c0_72 = arith.constant 0 : index
    %c1_73 = arith.constant 1 : index
    %c12_74 = arith.constant 12 : index
    %82 = vector.load %arg7[%c0_72, %c1_73, %c12_74] : memref<8x5x70xf32, #tpu.memory_space<vmem>>, vector<8x1x40xf32>
    %83 = vector.shape_cast %82 : vector<8x1x40xf32> to vector<8x40xf32>
    %c0_75 = arith.constant 0 : index
    %c1_76 = arith.constant 1 : index
    %c20_77 = arith.constant 20 : index
    %84 = vector.load %arg7[%c0_75, %c1_76, %c20_77] : memref<8x5x70xf32, #tpu.memory_space<vmem>>, vector<8x1x40xf32>
    %85 = vector.shape_cast %84 : vector<8x1x40xf32> to vector<8x40xf32>
    %c0_78 = arith.constant 0 : index
    %c1_79 = arith.constant 1 : index
    %c21_80 = arith.constant 21 : index
    %86 = vector.load %arg7[%c0_78, %c1_79, %c21_80] : memref<8x5x70xf32, #tpu.memory_space<vmem>>, vector<8x1x40xf32>
    %87 = vector.shape_cast %86 : vector<8x1x40xf32> to vector<8x40xf32>
    %c0_81 = arith.constant 0 : index
    %c1_82 = arith.constant 1 : index
    %c22_83 = arith.constant 22 : index
    %88 = vector.load %arg7[%c0_81, %c1_82, %c22_83] : memref<8x5x70xf32, #tpu.memory_space<vmem>>, vector<8x1x40xf32>
    %89 = vector.shape_cast %88 : vector<8x1x40xf32> to vector<8x40xf32>
    %c0_84 = arith.constant 0 : index
    %c2_85 = arith.constant 2 : index
    %c0_86 = arith.constant 0 : index
    %90 = vector.load %arg7[%c0_84, %c2_85, %c0_86] : memref<8x5x70xf32, #tpu.memory_space<vmem>>, vector<8x1x40xf32>
    %91 = vector.shape_cast %90 : vector<8x1x40xf32> to vector<8x40xf32>
    %c0_87 = arith.constant 0 : index
    %c2_88 = arith.constant 2 : index
    %c1_89 = arith.constant 1 : index
    %92 = vector.load %arg7[%c0_87, %c2_88, %c1_89] : memref<8x5x70xf32, #tpu.memory_space<vmem>>, vector<8x1x40xf32>
    %93 = vector.shape_cast %92 : vector<8x1x40xf32> to vector<8x40xf32>
    %c0_90 = arith.constant 0 : index
    %c2_91 = arith.constant 2 : index
    %c2_92 = arith.constant 2 : index
    %94 = vector.load %arg7[%c0_90, %c2_91, %c2_92] : memref<8x5x70xf32, #tpu.memory_space<vmem>>, vector<8x1x40xf32>
    %95 = vector.shape_cast %94 : vector<8x1x40xf32> to vector<8x40xf32>
    %c0_93 = arith.constant 0 : index
    %c2_94 = arith.constant 2 : index
    %c10_95 = arith.constant 10 : index
    %96 = vector.load %arg7[%c0_93, %c2_94, %c10_95] : memref<8x5x70xf32, #tpu.memory_space<vmem>>, vector<8x1x40xf32>
    %97 = vector.shape_cast %96 : vector<8x1x40xf32> to vector<8x40xf32>
    %c0_96 = arith.constant 0 : index
    %c2_97 = arith.constant 2 : index
    %c11_98 = arith.constant 11 : index
    %98 = vector.load %arg7[%c0_96, %c2_97, %c11_98] : memref<8x5x70xf32, #tpu.memory_space<vmem>>, vector<8x1x40xf32>
    %99 = vector.shape_cast %98 : vector<8x1x40xf32> to vector<8x40xf32>
    %c0_99 = arith.constant 0 : index
    %c2_100 = arith.constant 2 : index
    %c12_101 = arith.constant 12 : index
    %100 = vector.load %arg7[%c0_99, %c2_100, %c12_101] : memref<8x5x70xf32, #tpu.memory_space<vmem>>, vector<8x1x40xf32>
    %101 = vector.shape_cast %100 : vector<8x1x40xf32> to vector<8x40xf32>
    %c0_102 = arith.constant 0 : index
    %c2_103 = arith.constant 2 : index
    %c20_104 = arith.constant 20 : index
    %102 = vector.load %arg7[%c0_102, %c2_103, %c20_104] : memref<8x5x70xf32, #tpu.memory_space<vmem>>, vector<8x1x40xf32>
    %103 = vector.shape_cast %102 : vector<8x1x40xf32> to vector<8x40xf32>
    %c0_105 = arith.constant 0 : index
    %c2_106 = arith.constant 2 : index
    %c21_107 = arith.constant 21 : index
    %104 = vector.load %arg7[%c0_105, %c2_106, %c21_107] : memref<8x5x70xf32, #tpu.memory_space<vmem>>, vector<8x1x40xf32>
    %105 = vector.shape_cast %104 : vector<8x1x40xf32> to vector<8x40xf32>
    %c0_108 = arith.constant 0 : index
    %c2_109 = arith.constant 2 : index
    %c22_110 = arith.constant 22 : index
    %106 = vector.load %arg7[%c0_108, %c2_109, %c22_110] : memref<8x5x70xf32, #tpu.memory_space<vmem>>, vector<8x1x40xf32>
    %107 = vector.shape_cast %106 : vector<8x1x40xf32> to vector<8x40xf32>
    %108 = tpu.concatenate %55, %57, %59, %61, %63, %65, %67, %69, %71, %73, %75, %77, %79, %81, %83, %85 in 0 : vector<8x40xf32>, vector<8x40xf32>, vector<8x40xf32>, vector<8x40xf32>, vector<8x40xf32>, vector<8x40xf32>, vector<8x40xf32>, vector<8x40xf32>, vector<8x40xf32>, vector<8x40xf32>, vector<8x40xf32>, vector<8x40xf32>, vector<8x40xf32>, vector<8x40xf32>, vector<8x40xf32>, vector<8x40xf32> -> vector<128x40xf32>
    %109 = tpu.concatenate %87, %89, %91, %93, %95, %97, %99, %101, %103, %105, %107 in 0 : vector<8x40xf32>, vector<8x40xf32>, vector<8x40xf32>, vector<8x40xf32>, vector<8x40xf32>, vector<8x40xf32>, vector<8x40xf32>, vector<8x40xf32>, vector<8x40xf32>, vector<8x40xf32>, vector<8x40xf32> -> vector<88x40xf32>
    %110 = tpu.concatenate %108, %109 in 0 : vector<128x40xf32>, vector<88x40xf32> -> vector<216x40xf32>
    %cst_111 = arith.constant dense<0.000000e+00> : vector<8x40xf32>
    %111 = tpu.matmul %53, %110, %cst_111 {dimension_numbers = #tpu.dot_dimension_numbers<[1], [0], [0], [1], [0, 0, 1, 1], [], []>} : vector<8x216xf32>, vector<216x40xf32>, vector<8x40xf32> -> vector<8x40xf32>
    %c0_112 = arith.constant 0 : index
    %c0_113 = arith.constant 0 : index
    %112 = vector.load %arg5[%c0_112, %c0_113] : memref<8x216xf32, #tpu.memory_space<vmem>>, vector<8x216xf32>
    %c0_114 = arith.constant 0 : index
    %c0_115 = arith.constant 0 : index
    %c0_116 = arith.constant 0 : index
    %113 = vector.load %arg8[%c0_114, %c0_115, %c0_116] : memref<8x5x70xf32, #tpu.memory_space<vmem>>, vector<8x1x40xf32>
    %114 = vector.shape_cast %113 : vector<8x1x40xf32> to vector<8x40xf32>
    %c0_117 = arith.constant 0 : index
    %c0_118 = arith.constant 0 : index
    %c1_119 = arith.constant 1 : index
    %115 = vector.load %arg8[%c0_117, %c0_118, %c1_119] : memref<8x5x70xf32, #tpu.memory_space<vmem>>, vector<8x1x40xf32>
    %116 = vector.shape_cast %115 : vector<8x1x40xf32> to vector<8x40xf32>
    %c0_120 = arith.constant 0 : index
    %c0_121 = arith.constant 0 : index
    %c2_122 = arith.constant 2 : index
    %117 = vector.load %arg8[%c0_120, %c0_121, %c2_122] : memref<8x5x70xf32, #tpu.memory_space<vmem>>, vector<8x1x40xf32>
    %118 = vector.shape_cast %117 : vector<8x1x40xf32> to vector<8x40xf32>
    %c0_123 = arith.constant 0 : index
    %c0_124 = arith.constant 0 : index
    %c10_125 = arith.constant 10 : index
    %119 = vector.load %arg8[%c0_123, %c0_124, %c10_125] : memref<8x5x70xf32, #tpu.memory_space<vmem>>, vector<8x1x40xf32>
    %120 = vector.shape_cast %119 : vector<8x1x40xf32> to vector<8x40xf32>
    %c0_126 = arith.constant 0 : index
    %c0_127 = arith.constant 0 : index
    %c11_128 = arith.constant 11 : index
    %121 = vector.load %arg8[%c0_126, %c0_127, %c11_128] : memref<8x5x70xf32, #tpu.memory_space<vmem>>, vector<8x1x40xf32>
    %122 = vector.shape_cast %121 : vector<8x1x40xf32> to vector<8x40xf32>
    %c0_129 = arith.constant 0 : index
    %c0_130 = arith.constant 0 : index
    %c12_131 = arith.constant 12 : index
    %123 = vector.load %arg8[%c0_129, %c0_130, %c12_131] : memref<8x5x70xf32, #tpu.memory_space<vmem>>, vector<8x1x40xf32>
    %124 = vector.shape_cast %123 : vector<8x1x40xf32> to vector<8x40xf32>
    %c0_132 = arith.constant 0 : index
    %c0_133 = arith.constant 0 : index
    %c20_134 = arith.constant 20 : index
    %125 = vector.load %arg8[%c0_132, %c0_133, %c20_134] : memref<8x5x70xf32, #tpu.memory_space<vmem>>, vector<8x1x40xf32>
    %126 = vector.shape_cast %125 : vector<8x1x40xf32> to vector<8x40xf32>
    %c0_135 = arith.constant 0 : index
    %c0_136 = arith.constant 0 : index
    %c21_137 = arith.constant 21 : index
    %127 = vector.load %arg8[%c0_135, %c0_136, %c21_137] : memref<8x5x70xf32, #tpu.memory_space<vmem>>, vector<8x1x40xf32>
    %128 = vector.shape_cast %127 : vector<8x1x40xf32> to vector<8x40xf32>
    %c0_138 = arith.constant 0 : index
    %c0_139 = arith.constant 0 : index
    %c22_140 = arith.constant 22 : index
    %129 = vector.load %arg8[%c0_138, %c0_139, %c22_140] : memref<8x5x70xf32, #tpu.memory_space<vmem>>, vector<8x1x40xf32>
    %130 = vector.shape_cast %129 : vector<8x1x40xf32> to vector<8x40xf32>
    %c0_141 = arith.constant 0 : index
    %c1_142 = arith.constant 1 : index
    %c0_143 = arith.constant 0 : index
    %131 = vector.load %arg8[%c0_141, %c1_142, %c0_143] : memref<8x5x70xf32, #tpu.memory_space<vmem>>, vector<8x1x40xf32>
    %132 = vector.shape_cast %131 : vector<8x1x40xf32> to vector<8x40xf32>
    %c0_144 = arith.constant 0 : index
    %c1_145 = arith.constant 1 : index
    %c1_146 = arith.constant 1 : index
    %133 = vector.load %arg8[%c0_144, %c1_145, %c1_146] : memref<8x5x70xf32, #tpu.memory_space<vmem>>, vector<8x1x40xf32>
    %134 = vector.shape_cast %133 : vector<8x1x40xf32> to vector<8x40xf32>
    %c0_147 = arith.constant 0 : index
    %c1_148 = arith.constant 1 : index
    %c2_149 = arith.constant 2 : index
    %135 = vector.load %arg8[%c0_147, %c1_148, %c2_149] : memref<8x5x70xf32, #tpu.memory_space<vmem>>, vector<8x1x40xf32>
    %136 = vector.shape_cast %135 : vector<8x1x40xf32> to vector<8x40xf32>
    %c0_150 = arith.constant 0 : index
    %c1_151 = arith.constant 1 : index
    %c10_152 = arith.constant 10 : index
    %137 = vector.load %arg8[%c0_150, %c1_151, %c10_152] : memref<8x5x70xf32, #tpu.memory_space<vmem>>, vector<8x1x40xf32>
    %138 = vector.shape_cast %137 : vector<8x1x40xf32> to vector<8x40xf32>
    %c0_153 = arith.constant 0 : index
    %c1_154 = arith.constant 1 : index
    %c11_155 = arith.constant 11 : index
    %139 = vector.load %arg8[%c0_153, %c1_154, %c11_155] : memref<8x5x70xf32, #tpu.memory_space<vmem>>, vector<8x1x40xf32>
    %140 = vector.shape_cast %139 : vector<8x1x40xf32> to vector<8x40xf32>
    %c0_156 = arith.constant 0 : index
    %c1_157 = arith.constant 1 : index
    %c12_158 = arith.constant 12 : index
    %141 = vector.load %arg8[%c0_156, %c1_157, %c12_158] : memref<8x5x70xf32, #tpu.memory_space<vmem>>, vector<8x1x40xf32>
    %142 = vector.shape_cast %141 : vector<8x1x40xf32> to vector<8x40xf32>
    %c0_159 = arith.constant 0 : index
    %c1_160 = arith.constant 1 : index
    %c20_161 = arith.constant 20 : index
    %143 = vector.load %arg8[%c0_159, %c1_160, %c20_161] : memref<8x5x70xf32, #tpu.memory_space<vmem>>, vector<8x1x40xf32>
    %144 = vector.shape_cast %143 : vector<8x1x40xf32> to vector<8x40xf32>
    %c0_162 = arith.constant 0 : index
    %c1_163 = arith.constant 1 : index
    %c21_164 = arith.constant 21 : index
    %145 = vector.load %arg8[%c0_162, %c1_163, %c21_164] : memref<8x5x70xf32, #tpu.memory_space<vmem>>, vector<8x1x40xf32>
    %146 = vector.shape_cast %145 : vector<8x1x40xf32> to vector<8x40xf32>
    %c0_165 = arith.constant 0 : index
    %c1_166 = arith.constant 1 : index
    %c22_167 = arith.constant 22 : index
    %147 = vector.load %arg8[%c0_165, %c1_166, %c22_167] : memref<8x5x70xf32, #tpu.memory_space<vmem>>, vector<8x1x40xf32>
    %148 = vector.shape_cast %147 : vector<8x1x40xf32> to vector<8x40xf32>
    %c0_168 = arith.constant 0 : index
    %c2_169 = arith.constant 2 : index
    %c0_170 = arith.constant 0 : index
    %149 = vector.load %arg8[%c0_168, %c2_169, %c0_170] : memref<8x5x70xf32, #tpu.memory_space<vmem>>, vector<8x1x40xf32>
    %150 = vector.shape_cast %149 : vector<8x1x40xf32> to vector<8x40xf32>
    %c0_171 = arith.constant 0 : index
    %c2_172 = arith.constant 2 : index
    %c1_173 = arith.constant 1 : index
    %151 = vector.load %arg8[%c0_171, %c2_172, %c1_173] : memref<8x5x70xf32, #tpu.memory_space<vmem>>, vector<8x1x40xf32>
    %152 = vector.shape_cast %151 : vector<8x1x40xf32> to vector<8x40xf32>
    %c0_174 = arith.constant 0 : index
    %c2_175 = arith.constant 2 : index
    %c2_176 = arith.constant 2 : index
    %153 = vector.load %arg8[%c0_174, %c2_175, %c2_176] : memref<8x5x70xf32, #tpu.memory_space<vmem>>, vector<8x1x40xf32>
    %154 = vector.shape_cast %153 : vector<8x1x40xf32> to vector<8x40xf32>
    %c0_177 = arith.constant 0 : index
    %c2_178 = arith.constant 2 : index
    %c10_179 = arith.constant 10 : index
    %155 = vector.load %arg8[%c0_177, %c2_178, %c10_179] : memref<8x5x70xf32, #tpu.memory_space<vmem>>, vector<8x1x40xf32>
    %156 = vector.shape_cast %155 : vector<8x1x40xf32> to vector<8x40xf32>
    %c0_180 = arith.constant 0 : index
    %c2_181 = arith.constant 2 : index
    %c11_182 = arith.constant 11 : index
    %157 = vector.load %arg8[%c0_180, %c2_181, %c11_182] : memref<8x5x70xf32, #tpu.memory_space<vmem>>, vector<8x1x40xf32>
    %158 = vector.shape_cast %157 : vector<8x1x40xf32> to vector<8x40xf32>
    %c0_183 = arith.constant 0 : index
    %c2_184 = arith.constant 2 : index
    %c12_185 = arith.constant 12 : index
    %159 = vector.load %arg8[%c0_183, %c2_184, %c12_185] : memref<8x5x70xf32, #tpu.memory_space<vmem>>, vector<8x1x40xf32>
    %160 = vector.shape_cast %159 : vector<8x1x40xf32> to vector<8x40xf32>
    %c0_186 = arith.constant 0 : index
    %c2_187 = arith.constant 2 : index
    %c20_188 = arith.constant 20 : index
    %161 = vector.load %arg8[%c0_186, %c2_187, %c20_188] : memref<8x5x70xf32, #tpu.memory_space<vmem>>, vector<8x1x40xf32>
    %162 = vector.shape_cast %161 : vector<8x1x40xf32> to vector<8x40xf32>
    %c0_189 = arith.constant 0 : index
    %c2_190 = arith.constant 2 : index
    %c21_191 = arith.constant 21 : index
    %163 = vector.load %arg8[%c0_189, %c2_190, %c21_191] : memref<8x5x70xf32, #tpu.memory_space<vmem>>, vector<8x1x40xf32>
    %164 = vector.shape_cast %163 : vector<8x1x40xf32> to vector<8x40xf32>
    %c0_192 = arith.constant 0 : index
    %c2_193 = arith.constant 2 : index
    %c22_194 = arith.constant 22 : index
    %165 = vector.load %arg8[%c0_192, %c2_193, %c22_194] : memref<8x5x70xf32, #tpu.memory_space<vmem>>, vector<8x1x40xf32>
    %166 = vector.shape_cast %165 : vector<8x1x40xf32> to vector<8x40xf32>
    %167 = tpu.concatenate %114, %116, %118, %120, %122, %124, %126, %128, %130, %132, %134, %136, %138, %140, %142, %144 in 0 : vector<8x40xf32>, vector<8x40xf32>, vector<8x40xf32>, vector<8x40xf32>, vector<8x40xf32>, vector<8x40xf32>, vector<8x40xf32>, vector<8x40xf32>, vector<8x40xf32>, vector<8x40xf32>, vector<8x40xf32>, vector<8x40xf32>, vector<8x40xf32>, vector<8x40xf32>, vector<8x40xf32>, vector<8x40xf32> -> vector<128x40xf32>
    %168 = tpu.concatenate %146, %148, %150, %152, %154, %156, %158, %160, %162, %164, %166 in 0 : vector<8x40xf32>, vector<8x40xf32>, vector<8x40xf32>, vector<8x40xf32>, vector<8x40xf32>, vector<8x40xf32>, vector<8x40xf32>, vector<8x40xf32>, vector<8x40xf32>, vector<8x40xf32>, vector<8x40xf32> -> vector<88x40xf32>
    %169 = tpu.concatenate %167, %168 in 0 : vector<128x40xf32>, vector<88x40xf32> -> vector<216x40xf32>
    %cst_195 = arith.constant dense<0.000000e+00> : vector<8x40xf32>
    %170 = tpu.matmul %112, %169, %cst_195 {dimension_numbers = #tpu.dot_dimension_numbers<[1], [0], [0], [1], [0, 0, 1, 1], [], []>} : vector<8x216xf32>, vector<216x40xf32>, vector<8x40xf32> -> vector<8x40xf32>
    %171 = vector.broadcast %52 : f32 to vector<8x40xf32>
    %172 = arith.mulf %171, %111 : vector<8x40xf32>
    %cst_196 = arith.constant 0.000000e+00 : f32
    %173 = vector.broadcast %cst_196 : f32 to vector<8x40xf32>
    %174 = arith.cmpf oge, %172, %173 : vector<8x40xf32>
    %cst_197 = arith.constant 0.00999999977 : f32
    %175 = vector.broadcast %cst_197 : f32 to vector<8x40xf32>
    %176 = arith.mulf %175, %172 : vector<8x40xf32>
    %177 = arith.select %174, %172, %176 : vector<8x40xi1>, vector<8x40xf32>
    %cst_198 = arith.constant 0.000000e+00 : f32
    %178 = vector.broadcast %cst_198 : f32 to vector<8x40xf32>
    %179 = arith.cmpf oge, %170, %178 : vector<8x40xf32>
    %cst_199 = arith.constant 0.00999999977 : f32
    %180 = vector.broadcast %cst_199 : f32 to vector<8x40xf32>
    %181 = arith.mulf %180, %170 : vector<8x40xf32>
    %182 = arith.select %179, %170, %181 : vector<8x40xi1>, vector<8x40xf32>
    %183 = arith.addf %177, %182 : vector<8x40xf32>
    %c0_200 = arith.constant 0 : index
    %c0_201 = arith.constant 0 : index
    %c0_202 = arith.constant 0 : index
    %c0_203 = arith.constant 0 : index
    %c0_204 = arith.constant 0 : index
    %184 = vector.load %arg6[%c0_200, %c0_201, %c0_202, %c0_203, %c0_204] : memref<1x1x3x8x40xf32, #tpu.memory_space<vmem>>, vector<1x1x1x8x40xf32>
    %185 = vector.shape_cast %184 : vector<1x1x1x8x40xf32> to vector<8x40xf32>
    %186 = vector.shape_cast %183 : vector<8x40xf32> to vector<1x1x1x8x40xf32>
    tpu.vector_store %arg6[%c0_200, %c0_201, %c0_202, %c0_203, %c0_204], %186 {strides = array<i32>} : memref<1x1x3x8x40xf32, #tpu.memory_space<vmem>>, vector<1x1x1x8x40xf32>,
    %c0_205 = arith.constant 0 : index
    %c0_206 = arith.constant 0 : index
    %187 = vector.load %arg4[%c0_205, %c0_206] : memref<8x216xf32, #tpu.memory_space<vmem>>, vector<8x216xf32>
    %c0_207 = arith.constant 0 : index
    %c1_208 = arith.constant 1 : index
    %c0_209 = arith.constant 0 : index
    %188 = vector.load %arg7[%c0_207, %c1_208, %c0_209] : memref<8x5x70xf32, #tpu.memory_space<vmem>>, vector<8x1x40xf32>
    %189 = vector.shape_cast %188 : vector<8x1x40xf32> to vector<8x40xf32>
    %c0_210 = arith.constant 0 : index
    %c1_211 = arith.constant 1 : index
    %c1_212 = arith.constant 1 : index
    %190 = vector.load %arg7[%c0_210, %c1_211, %c1_212] : memref<8x5x70xf32, #tpu.memory_space<vmem>>, vector<8x1x40xf32>
    %191 = vector.shape_cast %190 : vector<8x1x40xf32> to vector<8x40xf32>
    %c0_213 = arith.constant 0 : index
    %c1_214 = arith.constant 1 : index
    %c2_215 = arith.constant 2 : index
    %192 = vector.load %arg7[%c0_213, %c1_214, %c2_215] : memref<8x5x70xf32, #tpu.memory_space<vmem>>, vector<8x1x40xf32>
    %193 = vector.shape_cast %192 : vector<8x1x40xf32> to vector<8x40xf32>
    %c0_216 = arith.constant 0 : index
    %c1_217 = arith.constant 1 : index
    %c10_218 = arith.constant 10 : index
    %194 = vector.load %arg7[%c0_216, %c1_217, %c10_218] : memref<8x5x70xf32, #tpu.memory_space<vmem>>, vector<8x1x40xf32>
    %195 = vector.shape_cast %194 : vector<8x1x40xf32> to vector<8x40xf32>
    %c0_219 = arith.constant 0 : index
    %c1_220 = arith.constant 1 : index
    %c11_221 = arith.constant 11 : index
    %196 = vector.load %arg7[%c0_219, %c1_220, %c11_221] : memref<8x5x70xf32, #tpu.memory_space<vmem>>, vector<8x1x40xf32>
    %197 = vector.shape_cast %196 : vector<8x1x40xf32> to vector<8x40xf32>
    %c0_222 = arith.constant 0 : index
    %c1_223 = arith.constant 1 : index
    %c12_224 = arith.constant 12 : index
    %198 = vector.load %arg7[%c0_222, %c1_223, %c12_224] : memref<8x5x70xf32, #tpu.memory_space<vmem>>, vector<8x1x40xf32>
    %199 = vector.shape_cast %198 : vector<8x1x40xf32> to vector<8x40xf32>
    %c0_225 = arith.constant 0 : index
    %c1_226 = arith.constant 1 : index
    %c20_227 = arith.constant 20 : index
    %200 = vector.load %arg7[%c0_225, %c1_226, %c20_227] : memref<8x5x70xf32, #tpu.memory_space<vmem>>, vector<8x1x40xf32>
    %201 = vector.shape_cast %200 : vector<8x1x40xf32> to vector<8x40xf32>
    %c0_228 = arith.constant 0 : index
    %c1_229 = arith.constant 1 : index
    %c21_230 = arith.constant 21 : index
    %202 = vector.load %arg7[%c0_228, %c1_229, %c21_230] : memref<8x5x70xf32, #tpu.memory_space<vmem>>, vector<8x1x40xf32>
    %203 = vector.shape_cast %202 : vector<8x1x40xf32> to vector<8x40xf32>
    %c0_231 = arith.constant 0 : index
    %c1_232 = arith.constant 1 : index
    %c22_233 = arith.constant 22 : index
    %204 = vector.load %arg7[%c0_231, %c1_232, %c22_233] : memref<8x5x70xf32, #tpu.memory_space<vmem>>, vector<8x1x40xf32>
    %205 = vector.shape_cast %204 : vector<8x1x40xf32> to vector<8x40xf32>
    %c0_234 = arith.constant 0 : index
    %c2_235 = arith.constant 2 : index
    %c0_236 = arith.constant 0 : index
    %206 = vector.load %arg7[%c0_234, %c2_235, %c0_236] : memref<8x5x70xf32, #tpu.memory_space<vmem>>, vector<8x1x40xf32>
    %207 = vector.shape_cast %206 : vector<8x1x40xf32> to vector<8x40xf32>
    %c0_237 = arith.constant 0 : index
    %c2_238 = arith.constant 2 : index
    %c1_239 = arith.constant 1 : index
    %208 = vector.load %arg7[%c0_237, %c2_238, %c1_239] : memref<8x5x70xf32, #tpu.memory_space<vmem>>, vector<8x1x40xf32>
    %209 = vector.shape_cast %208 : vector<8x1x40xf32> to vector<8x40xf32>
    %c0_240 = arith.constant 0 : index
    %c2_241 = arith.constant 2 : index
    %c2_242 = arith.constant 2 : index
    %210 = vector.load %arg7[%c0_240, %c2_241, %c2_242] : memref<8x5x70xf32, #tpu.memory_space<vmem>>, vector<8x1x40xf32>
    %211 = vector.shape_cast %210 : vector<8x1x40xf32> to vector<8x40xf32>
    %c0_243 = arith.constant 0 : index
    %c2_244 = arith.constant 2 : index
    %c10_245 = arith.constant 10 : index
    %212 = vector.load %arg7[%c0_243, %c2_244, %c10_245] : memref<8x5x70xf32, #tpu.memory_space<vmem>>, vector<8x1x40xf32>
    %213 = vector.shape_cast %212 : vector<8x1x40xf32> to vector<8x40xf32>
    %c0_246 = arith.constant 0 : index
    %c2_247 = arith.constant 2 : index
    %c11_248 = arith.constant 11 : index
    %214 = vector.load %arg7[%c0_246, %c2_247, %c11_248] : memref<8x5x70xf32, #tpu.memory_space<vmem>>, vector<8x1x40xf32>
    %215 = vector.shape_cast %214 : vector<8x1x40xf32> to vector<8x40xf32>
    %c0_249 = arith.constant 0 : index
    %c2_250 = arith.constant 2 : index
    %c12_251 = arith.constant 12 : index
    %216 = vector.load %arg7[%c0_249, %c2_250, %c12_251] : memref<8x5x70xf32, #tpu.memory_space<vmem>>, vector<8x1x40xf32>
    %217 = vector.shape_cast %216 : vector<8x1x40xf32> to vector<8x40xf32>
    %c0_252 = arith.constant 0 : index
    %c2_253 = arith.constant 2 : index
    %c20_254 = arith.constant 20 : index
    %218 = vector.load %arg7[%c0_252, %c2_253, %c20_254] : memref<8x5x70xf32, #tpu.memory_space<vmem>>, vector<8x1x40xf32>
    %219 = vector.shape_cast %218 : vector<8x1x40xf32> to vector<8x40xf32>
    %c0_255 = arith.constant 0 : index
    %c2_256 = arith.constant 2 : index
    %c21_257 = arith.constant 21 : index
    %220 = vector.load %arg7[%c0_255, %c2_256, %c21_257] : memref<8x5x70xf32, #tpu.memory_space<vmem>>, vector<8x1x40xf32>
    %221 = vector.shape_cast %220 : vector<8x1x40xf32> to vector<8x40xf32>
    %c0_258 = arith.constant 0 : index
    %c2_259 = arith.constant 2 : index
    %c22_260 = arith.constant 22 : index
    %222 = vector.load %arg7[%c0_258, %c2_259, %c22_260] : memref<8x5x70xf32, #tpu.memory_space<vmem>>, vector<8x1x40xf32>
    %223 = vector.shape_cast %222 : vector<8x1x40xf32> to vector<8x40xf32>
    %c0_261 = arith.constant 0 : index
    %c3 = arith.constant 3 : index
    %c0_262 = arith.constant 0 : index
    %224 = vector.load %arg7[%c0_261, %c3, %c0_262] : memref<8x5x70xf32, #tpu.memory_space<vmem>>, vector<8x1x40xf32>
    %225 = vector.shape_cast %224 : vector<8x1x40xf32> to vector<8x40xf32>
    %c0_263 = arith.constant 0 : index
    %c3_264 = arith.constant 3 : index
    %c1_265 = arith.constant 1 : index
    %226 = vector.load %arg7[%c0_263, %c3_264, %c1_265] : memref<8x5x70xf32, #tpu.memory_space<vmem>>, vector<8x1x40xf32>
    %227 = vector.shape_cast %226 : vector<8x1x40xf32> to vector<8x40xf32>
    %c0_266 = arith.constant 0 : index
    %c3_267 = arith.constant 3 : index
    %c2_268 = arith.constant 2 : index
    %228 = vector.load %arg7[%c0_266, %c3_267, %c2_268] : memref<8x5x70xf32, #tpu.memory_space<vmem>>, vector<8x1x40xf32>
    %229 = vector.shape_cast %228 : vector<8x1x40xf32> to vector<8x40xf32>
    %c0_269 = arith.constant 0 : index
    %c3_270 = arith.constant 3 : index
    %c10_271 = arith.constant 10 : index
    %230 = vector.load %arg7[%c0_269, %c3_270, %c10_271] : memref<8x5x70xf32, #tpu.memory_space<vmem>>, vector<8x1x40xf32>
    %231 = vector.shape_cast %230 : vector<8x1x40xf32> to vector<8x40xf32>
    %c0_272 = arith.constant 0 : index
    %c3_273 = arith.constant 3 : index
    %c11_274 = arith.constant 11 : index
    %232 = vector.load %arg7[%c0_272, %c3_273, %c11_274] : memref<8x5x70xf32, #tpu.memory_space<vmem>>, vector<8x1x40xf32>
    %233 = vector.shape_cast %232 : vector<8x1x40xf32> to vector<8x40xf32>
    %c0_275 = arith.constant 0 : index
    %c3_276 = arith.constant 3 : index
    %c12_277 = arith.constant 12 : index
    %234 = vector.load %arg7[%c0_275, %c3_276, %c12_277] : memref<8x5x70xf32, #tpu.memory_space<vmem>>, vector<8x1x40xf32>
    %235 = vector.shape_cast %234 : vector<8x1x40xf32> to vector<8x40xf32>
    %c0_278 = arith.constant 0 : index
    %c3_279 = arith.constant 3 : index
    %c20_280 = arith.constant 20 : index
    %236 = vector.load %arg7[%c0_278, %c3_279, %c20_280] : memref<8x5x70xf32, #tpu.memory_space<vmem>>, vector<8x1x40xf32>
    %237 = vector.shape_cast %236 : vector<8x1x40xf32> to vector<8x40xf32>
    %c0_281 = arith.constant 0 : index
    %c3_282 = arith.constant 3 : index
    %c21_283 = arith.constant 21 : index
    %238 = vector.load %arg7[%c0_281, %c3_282, %c21_283] : memref<8x5x70xf32, #tpu.memory_space<vmem>>, vector<8x1x40xf32>
    %239 = vector.shape_cast %238 : vector<8x1x40xf32> to vector<8x40xf32>
    %c0_284 = arith.constant 0 : index
    %c3_285 = arith.constant 3 : index
    %c22_286 = arith.constant 22 : index
    %240 = vector.load %arg7[%c0_284, %c3_285, %c22_286] : memref<8x5x70xf32, #tpu.memory_space<vmem>>, vector<8x1x40xf32>
    %241 = vector.shape_cast %240 : vector<8x1x40xf32> to vector<8x40xf32>
    %242 = tpu.concatenate %189, %191, %193, %195, %197, %199, %201, %203, %205, %207, %209, %211, %213, %215, %217, %219 in 0 : vector<8x40xf32>, vector<8x40xf32>, vector<8x40xf32>, vector<8x40xf32>, vector<8x40xf32>, vector<8x40xf32>, vector<8x40xf32>, vector<8x40xf32>, vector<8x40xf32>, vector<8x40xf32>, vector<8x40xf32>, vector<8x40xf32>, vector<8x40xf32>, vector<8x40xf32>, vector<8x40xf32>, vector<8x40xf32> -> vector<128x40xf32>
    %243 = tpu.concatenate %221, %223, %225, %227, %229, %231, %233, %235, %237, %239, %241 in 0 : vector<8x40xf32>, vector<8x40xf32>, vector<8x40xf32>, vector<8x40xf32>, vector<8x40xf32>, vector<8x40xf32>, vector<8x40xf32>, vector<8x40xf32>, vector<8x40xf32>, vector<8x40xf32>, vector<8x40xf32> -> vector<88x40xf32>
    %244 = tpu.concatenate %242, %243 in 0 : vector<128x40xf32>, vector<88x40xf32> -> vector<216x40xf32>
    %cst_287 = arith.constant dense<0.000000e+00> : vector<8x40xf32>
    %245 = tpu.matmul %187, %244, %cst_287 {dimension_numbers = #tpu.dot_dimension_numbers<[1], [0], [0], [1], [0, 0, 1, 1], [], []>} : vector<8x216xf32>, vector<216x40xf32>, vector<8x40xf32> -> vector<8x40xf32>
    %c0_288 = arith.constant 0 : index
    %c0_289 = arith.constant 0 : index
    %246 = vector.load %arg5[%c0_288, %c0_289] : memref<8x216xf32, #tpu.memory_space<vmem>>, vector<8x216xf32>
    %c0_290 = arith.constant 0 : index
    %c1_291 = arith.constant 1 : index
    %c0_292 = arith.constant 0 : index
    %247 = vector.load %arg8[%c0_290, %c1_291, %c0_292] : memref<8x5x70xf32, #tpu.memory_space<vmem>>, vector<8x1x40xf32>
    %248 = vector.shape_cast %247 : vector<8x1x40xf32> to vector<8x40xf32>
    %c0_293 = arith.constant 0 : index
    %c1_294 = arith.constant 1 : index
    %c1_295 = arith.constant 1 : index
    %249 = vector.load %arg8[%c0_293, %c1_294, %c1_295] : memref<8x5x70xf32, #tpu.memory_space<vmem>>, vector<8x1x40xf32>
    %250 = vector.shape_cast %249 : vector<8x1x40xf32> to vector<8x40xf32>
    %c0_296 = arith.constant 0 : index
    %c1_297 = arith.constant 1 : index
    %c2_298 = arith.constant 2 : index
    %251 = vector.load %arg8[%c0_296, %c1_297, %c2_298] : memref<8x5x70xf32, #tpu.memory_space<vmem>>, vector<8x1x40xf32>
    %252 = vector.shape_cast %251 : vector<8x1x40xf32> to vector<8x40xf32>
    %c0_299 = arith.constant 0 : index
    %c1_300 = arith.constant 1 : index
    %c10_301 = arith.constant 10 : index
    %253 = vector.load %arg8[%c0_299, %c1_300, %c10_301] : memref<8x5x70xf32, #tpu.memory_space<vmem>>, vector<8x1x40xf32>
    %254 = vector.shape_cast %253 : vector<8x1x40xf32> to vector<8x40xf32>
    %c0_302 = arith.constant 0 : index
    %c1_303 = arith.constant 1 : index
    %c11_304 = arith.constant 11 : index
    %255 = vector.load %arg8[%c0_302, %c1_303, %c11_304] : memref<8x5x70xf32, #tpu.memory_space<vmem>>, vector<8x1x40xf32>
    %256 = vector.shape_cast %255 : vector<8x1x40xf32> to vector<8x40xf32>
    %c0_305 = arith.constant 0 : index
    %c1_306 = arith.constant 1 : index
    %c12_307 = arith.constant 12 : index
    %257 = vector.load %arg8[%c0_305, %c1_306, %c12_307] : memref<8x5x70xf32, #tpu.memory_space<vmem>>, vector<8x1x40xf32>
    %258 = vector.shape_cast %257 : vector<8x1x40xf32> to vector<8x40xf32>
    %c0_308 = arith.constant 0 : index
    %c1_309 = arith.constant 1 : index
    %c20_310 = arith.constant 20 : index
    %259 = vector.load %arg8[%c0_308, %c1_309, %c20_310] : memref<8x5x70xf32, #tpu.memory_space<vmem>>, vector<8x1x40xf32>
    %260 = vector.shape_cast %259 : vector<8x1x40xf32> to vector<8x40xf32>
    %c0_311 = arith.constant 0 : index
    %c1_312 = arith.constant 1 : index
    %c21_313 = arith.constant 21 : index
    %261 = vector.load %arg8[%c0_311, %c1_312, %c21_313] : memref<8x5x70xf32, #tpu.memory_space<vmem>>, vector<8x1x40xf32>
    %262 = vector.shape_cast %261 : vector<8x1x40xf32> to vector<8x40xf32>
    %c0_314 = arith.constant 0 : index
    %c1_315 = arith.constant 1 : index
    %c22_316 = arith.constant 22 : index
    %263 = vector.load %arg8[%c0_314, %c1_315, %c22_316] : memref<8x5x70xf32, #tpu.memory_space<vmem>>, vector<8x1x40xf32>
    %264 = vector.shape_cast %263 : vector<8x1x40xf32> to vector<8x40xf32>
    %c0_317 = arith.constant 0 : index
    %c2_318 = arith.constant 2 : index
    %c0_319 = arith.constant 0 : index
    %265 = vector.load %arg8[%c0_317, %c2_318, %c0_319] : memref<8x5x70xf32, #tpu.memory_space<vmem>>, vector<8x1x40xf32>
    %266 = vector.shape_cast %265 : vector<8x1x40xf32> to vector<8x40xf32>
    %c0_320 = arith.constant 0 : index
    %c2_321 = arith.constant 2 : index
    %c1_322 = arith.constant 1 : index
    %267 = vector.load %arg8[%c0_320, %c2_321, %c1_322] : memref<8x5x70xf32, #tpu.memory_space<vmem>>, vector<8x1x40xf32>
    %268 = vector.shape_cast %267 : vector<8x1x40xf32> to vector<8x40xf32>
    %c0_323 = arith.constant 0 : index
    %c2_324 = arith.constant 2 : index
    %c2_325 = arith.constant 2 : index
    %269 = vector.load %arg8[%c0_323, %c2_324, %c2_325] : memref<8x5x70xf32, #tpu.memory_space<vmem>>, vector<8x1x40xf32>
    %270 = vector.shape_cast %269 : vector<8x1x40xf32> to vector<8x40xf32>
    %c0_326 = arith.constant 0 : index
    %c2_327 = arith.constant 2 : index
    %c10_328 = arith.constant 10 : index
    %271 = vector.load %arg8[%c0_326, %c2_327, %c10_328] : memref<8x5x70xf32, #tpu.memory_space<vmem>>, vector<8x1x40xf32>
    %272 = vector.shape_cast %271 : vector<8x1x40xf32> to vector<8x40xf32>
    %c0_329 = arith.constant 0 : index
    %c2_330 = arith.constant 2 : index
    %c11_331 = arith.constant 11 : index
    %273 = vector.load %arg8[%c0_329, %c2_330, %c11_331] : memref<8x5x70xf32, #tpu.memory_space<vmem>>, vector<8x1x40xf32>
    %274 = vector.shape_cast %273 : vector<8x1x40xf32> to vector<8x40xf32>
    %c0_332 = arith.constant 0 : index
    %c2_333 = arith.constant 2 : index
    %c12_334 = arith.constant 12 : index
    %275 = vector.load %arg8[%c0_332, %c2_333, %c12_334] : memref<8x5x70xf32, #tpu.memory_space<vmem>>, vector<8x1x40xf32>
    %276 = vector.shape_cast %275 : vector<8x1x40xf32> to vector<8x40xf32>
    %c0_335 = arith.constant 0 : index
    %c2_336 = arith.constant 2 : index
    %c20_337 = arith.constant 20 : index
    %277 = vector.load %arg8[%c0_335, %c2_336, %c20_337] : memref<8x5x70xf32, #tpu.memory_space<vmem>>, vector<8x1x40xf32>
    %278 = vector.shape_cast %277 : vector<8x1x40xf32> to vector<8x40xf32>
    %c0_338 = arith.constant 0 : index
    %c2_339 = arith.constant 2 : index
    %c21_340 = arith.constant 21 : index
    %279 = vector.load %arg8[%c0_338, %c2_339, %c21_340] : memref<8x5x70xf32, #tpu.memory_space<vmem>>, vector<8x1x40xf32>
    %280 = vector.shape_cast %279 : vector<8x1x40xf32> to vector<8x40xf32>
    %c0_341 = arith.constant 0 : index
    %c2_342 = arith.constant 2 : index
    %c22_343 = arith.constant 22 : index
    %281 = vector.load %arg8[%c0_341, %c2_342, %c22_343] : memref<8x5x70xf32, #tpu.memory_space<vmem>>, vector<8x1x40xf32>
    %282 = vector.shape_cast %281 : vector<8x1x40xf32> to vector<8x40xf32>
    %c0_344 = arith.constant 0 : index
    %c3_345 = arith.constant 3 : index
    %c0_346 = arith.constant 0 : index
    %283 = vector.load %arg8[%c0_344, %c3_345, %c0_346] : memref<8x5x70xf32, #tpu.memory_space<vmem>>, vector<8x1x40xf32>
    %284 = vector.shape_cast %283 : vector<8x1x40xf32> to vector<8x40xf32>
    %c0_347 = arith.constant 0 : index
    %c3_348 = arith.constant 3 : index
    %c1_349 = arith.constant 1 : index
    %285 = vector.load %arg8[%c0_347, %c3_348, %c1_349] : memref<8x5x70xf32, #tpu.memory_space<vmem>>, vector<8x1x40xf32>
    %286 = vector.shape_cast %285 : vector<8x1x40xf32> to vector<8x40xf32>
    %c0_350 = arith.constant 0 : index
    %c3_351 = arith.constant 3 : index
    %c2_352 = arith.constant 2 : index
    %287 = vector.load %arg8[%c0_350, %c3_351, %c2_352] : memref<8x5x70xf32, #tpu.memory_space<vmem>>, vector<8x1x40xf32>
    %288 = vector.shape_cast %287 : vector<8x1x40xf32> to vector<8x40xf32>
    %c0_353 = arith.constant 0 : index
    %c3_354 = arith.constant 3 : index
    %c10_355 = arith.constant 10 : index
    %289 = vector.load %arg8[%c0_353, %c3_354, %c10_355] : memref<8x5x70xf32, #tpu.memory_space<vmem>>, vector<8x1x40xf32>
    %290 = vector.shape_cast %289 : vector<8x1x40xf32> to vector<8x40xf32>
    %c0_356 = arith.constant 0 : index
    %c3_357 = arith.constant 3 : index
    %c11_358 = arith.constant 11 : index
    %291 = vector.load %arg8[%c0_356, %c3_357, %c11_358] : memref<8x5x70xf32, #tpu.memory_space<vmem>>, vector<8x1x40xf32>
    %292 = vector.shape_cast %291 : vector<8x1x40xf32> to vector<8x40xf32>
    %c0_359 = arith.constant 0 : index
    %c3_360 = arith.constant 3 : index
    %c12_361 = arith.constant 12 : index
    %293 = vector.load %arg8[%c0_359, %c3_360, %c12_361] : memref<8x5x70xf32, #tpu.memory_space<vmem>>, vector<8x1x40xf32>
    %294 = vector.shape_cast %293 : vector<8x1x40xf32> to vector<8x40xf32>
    %c0_362 = arith.constant 0 : index
    %c3_363 = arith.constant 3 : index
    %c20_364 = arith.constant 20 : index
    %295 = vector.load %arg8[%c0_362, %c3_363, %c20_364] : memref<8x5x70xf32, #tpu.memory_space<vmem>>, vector<8x1x40xf32>
    %296 = vector.shape_cast %295 : vector<8x1x40xf32> to vector<8x40xf32>
    %c0_365 = arith.constant 0 : index
    %c3_366 = arith.constant 3 : index
    %c21_367 = arith.constant 21 : index
    %297 = vector.load %arg8[%c0_365, %c3_366, %c21_367] : memref<8x5x70xf32, #tpu.memory_space<vmem>>, vector<8x1x40xf32>
    %298 = vector.shape_cast %297 : vector<8x1x40xf32> to vector<8x40xf32>
    %c0_368 = arith.constant 0 : index
    %c3_369 = arith.constant 3 : index
    %c22_370 = arith.constant 22 : index
    %299 = vector.load %arg8[%c0_368, %c3_369, %c22_370] : memref<8x5x70xf32, #tpu.memory_space<vmem>>, vector<8x1x40xf32>
    %300 = vector.shape_cast %299 : vector<8x1x40xf32> to vector<8x40xf32>
    %301 = tpu.concatenate %248, %250, %252, %254, %256, %258, %260, %262, %264, %266, %268, %270, %272, %274, %276, %278 in 0 : vector<8x40xf32>, vector<8x40xf32>, vector<8x40xf32>, vector<8x40xf32>, vector<8x40xf32>, vector<8x40xf32>, vector<8x40xf32>, vector<8x40xf32>, vector<8x40xf32>, vector<8x40xf32>, vector<8x40xf32>, vector<8x40xf32>, vector<8x40xf32>, vector<8x40xf32>, vector<8x40xf32>, vector<8x40xf32> -> vector<128x40xf32>
    %302 = tpu.concatenate %280, %282, %284, %286, %288, %290, %292, %294, %296, %298, %300 in 0 : vector<8x40xf32>, vector<8x40xf32>, vector<8x40xf32>, vector<8x40xf32>, vector<8x40xf32>, vector<8x40xf32>, vector<8x40xf32>, vector<8x40xf32>, vector<8x40xf32>, vector<8x40xf32>, vector<8x40xf32> -> vector<88x40xf32>
    %303 = tpu.concatenate %301, %302 in 0 : vector<128x40xf32>, vector<88x40xf32> -> vector<216x40xf32>
    %cst_371 = arith.constant dense<0.000000e+00> : vector<8x40xf32>
    %304 = tpu.matmul %246, %303, %cst_371 {dimension_numbers = #tpu.dot_dimension_numbers<[1], [0], [0], [1], [0, 0, 1, 1], [], []>} : vector<8x216xf32>, vector<216x40xf32>, vector<8x40xf32> -> vector<8x40xf32>
    %305 = vector.broadcast %52 : f32 to vector<8x40xf32>
    %306 = arith.mulf %305, %245 : vector<8x40xf32>
    %cst_372 = arith.constant 0.000000e+00 : f32
    %307 = vector.broadcast %cst_372 : f32 to vector<8x40xf32>
    %308 = arith.cmpf oge, %306, %307 : vector<8x40xf32>
    %cst_373 = arith.constant 0.00999999977 : f32
    %309 = vector.broadcast %cst_373 : f32 to vector<8x40xf32>
    %310 = arith.mulf %309, %306 : vector<8x40xf32>
    %311 = arith.select %308, %306, %310 : vector<8x40xi1>, vector<8x40xf32>
    %cst_374 = arith.constant 0.000000e+00 : f32
    %312 = vector.broadcast %cst_374 : f32 to vector<8x40xf32>
    %313 = arith.cmpf oge, %304, %312 : vector<8x40xf32>
    %cst_375 = arith.constant 0.00999999977 : f32
    %314 = vector.broadcast %cst_375 : f32 to vector<8x40xf32>
    %315 = arith.mulf %314, %304 : vector<8x40xf32>
    %316 = arith.select %313, %304, %315 : vector<8x40xi1>, vector<8x40xf32>
    %317 = arith.addf %311, %316 : vector<8x40xf32>
    %c0_376 = arith.constant 0 : index
    %c0_377 = arith.constant 0 : index
    %c1_378 = arith.constant 1 : index
    %c0_379 = arith.constant 0 : index
    %c0_380 = arith.constant 0 : index
    %318 = vector.load %arg6[%c0_376, %c0_377, %c1_378, %c0_379, %c0_380] : memref<1x1x3x8x40xf32, #tpu.memory_space<vmem>>, vector<1x1x1x8x40xf32>
    %319 = vector.shape_cast %318 : vector<1x1x1x8x40xf32> to vector<8x40xf32>
    %320 = vector.shape_cast %317 : vector<8x40xf32> to vector<1x1x1x8x40xf32>
    tpu.vector_store %arg6[%c0_376, %c0_377, %c1_378, %c0_379, %c0_380], %320 {strides = array<i32>} : memref<1x1x3x8x40xf32, #tpu.memory_space<vmem>>, vector<1x1x1x8x40xf32>,
    %c0_381 = arith.constant 0 : index
    %c0_382 = arith.constant 0 : index
    %321 = vector.load %arg4[%c0_381, %c0_382] : memref<8x216xf32, #tpu.memory_space<vmem>>, vector<8x216xf32>
    %c0_383 = arith.constant 0 : index
    %c2_384 = arith.constant 2 : index
    %c0_385 = arith.constant 0 : index
    %322 = vector.load %arg7[%c0_383, %c2_384, %c0_385] : memref<8x5x70xf32, #tpu.memory_space<vmem>>, vector<8x1x40xf32>
    %323 = vector.shape_cast %322 : vector<8x1x40xf32> to vector<8x40xf32>
    %c0_386 = arith.constant 0 : index
    %c2_387 = arith.constant 2 : index
    %c1_388 = arith.constant 1 : index
    %324 = vector.load %arg7[%c0_386, %c2_387, %c1_388] : memref<8x5x70xf32, #tpu.memory_space<vmem>>, vector<8x1x40xf32>
    %325 = vector.shape_cast %324 : vector<8x1x40xf32> to vector<8x40xf32>
    %c0_389 = arith.constant 0 : index
    %c2_390 = arith.constant 2 : index
    %c2_391 = arith.constant 2 : index
    %326 = vector.load %arg7[%c0_389, %c2_390, %c2_391] : memref<8x5x70xf32, #tpu.memory_space<vmem>>, vector<8x1x40xf32>
    %327 = vector.shape_cast %326 : vector<8x1x40xf32> to vector<8x40xf32>
    %c0_392 = arith.constant 0 : index
    %c2_393 = arith.constant 2 : index
    %c10_394 = arith.constant 10 : index
    %328 = vector.load %arg7[%c0_392, %c2_393, %c10_394] : memref<8x5x70xf32, #tpu.memory_space<vmem>>, vector<8x1x40xf32>
    %329 = vector.shape_cast %328 : vector<8x1x40xf32> to vector<8x40xf32>
    %c0_395 = arith.constant 0 : index
    %c2_396 = arith.constant 2 : index
    %c11_397 = arith.constant 11 : index
    %330 = vector.load %arg7[%c0_395, %c2_396, %c11_397] : memref<8x5x70xf32, #tpu.memory_space<vmem>>, vector<8x1x40xf32>
    %331 = vector.shape_cast %330 : vector<8x1x40xf32> to vector<8x40xf32>
    %c0_398 = arith.constant 0 : index
    %c2_399 = arith.constant 2 : index
    %c12_400 = arith.constant 12 : index
    %332 = vector.load %arg7[%c0_398, %c2_399, %c12_400] : memref<8x5x70xf32, #tpu.memory_space<vmem>>, vector<8x1x40xf32>
    %333 = vector.shape_cast %332 : vector<8x1x40xf32> to vector<8x40xf32>
    %c0_401 = arith.constant 0 : index
    %c2_402 = arith.constant 2 : index
    %c20_403 = arith.constant 20 : index
    %334 = vector.load %arg7[%c0_401, %c2_402, %c20_403] : memref<8x5x70xf32, #tpu.memory_space<vmem>>, vector<8x1x40xf32>
    %335 = vector.shape_cast %334 : vector<8x1x40xf32> to vector<8x40xf32>
    %c0_404 = arith.constant 0 : index
    %c2_405 = arith.constant 2 : index
    %c21_406 = arith.constant 21 : index
    %336 = vector.load %arg7[%c0_404, %c2_405, %c21_406] : memref<8x5x70xf32, #tpu.memory_space<vmem>>, vector<8x1x40xf32>
    %337 = vector.shape_cast %336 : vector<8x1x40xf32> to vector<8x40xf32>
    %c0_407 = arith.constant 0 : index
    %c2_408 = arith.constant 2 : index
    %c22_409 = arith.constant 22 : index
    %338 = vector.load %arg7[%c0_407, %c2_408, %c22_409] : memref<8x5x70xf32, #tpu.memory_space<vmem>>, vector<8x1x40xf32>
    %339 = vector.shape_cast %338 : vector<8x1x40xf32> to vector<8x40xf32>
    %c0_410 = arith.constant 0 : index
    %c3_411 = arith.constant 3 : index
    %c0_412 = arith.constant 0 : index
    %340 = vector.load %arg7[%c0_410, %c3_411, %c0_412] : memref<8x5x70xf32, #tpu.memory_space<vmem>>, vector<8x1x40xf32>
    %341 = vector.shape_cast %340 : vector<8x1x40xf32> to vector<8x40xf32>
    %c0_413 = arith.constant 0 : index
    %c3_414 = arith.constant 3 : index
    %c1_415 = arith.constant 1 : index
    %342 = vector.load %arg7[%c0_413, %c3_414, %c1_415] : memref<8x5x70xf32, #tpu.memory_space<vmem>>, vector<8x1x40xf32>
    %343 = vector.shape_cast %342 : vector<8x1x40xf32> to vector<8x40xf32>
    %c0_416 = arith.constant 0 : index
    %c3_417 = arith.constant 3 : index
    %c2_418 = arith.constant 2 : index
    %344 = vector.load %arg7[%c0_416, %c3_417, %c2_418] : memref<8x5x70xf32, #tpu.memory_space<vmem>>, vector<8x1x40xf32>
    %345 = vector.shape_cast %344 : vector<8x1x40xf32> to vector<8x40xf32>
    %c0_419 = arith.constant 0 : index
    %c3_420 = arith.constant 3 : index
    %c10_421 = arith.constant 10 : index
    %346 = vector.load %arg7[%c0_419, %c3_420, %c10_421] : memref<8x5x70xf32, #tpu.memory_space<vmem>>, vector<8x1x40xf32>
    %347 = vector.shape_cast %346 : vector<8x1x40xf32> to vector<8x40xf32>
    %c0_422 = arith.constant 0 : index
    %c3_423 = arith.constant 3 : index
    %c11_424 = arith.constant 11 : index
    %348 = vector.load %arg7[%c0_422, %c3_423, %c11_424] : memref<8x5x70xf32, #tpu.memory_space<vmem>>, vector<8x1x40xf32>
    %349 = vector.shape_cast %348 : vector<8x1x40xf32> to vector<8x40xf32>
    %c0_425 = arith.constant 0 : index
    %c3_426 = arith.constant 3 : index
    %c12_427 = arith.constant 12 : index
    %350 = vector.load %arg7[%c0_425, %c3_426, %c12_427] : memref<8x5x70xf32, #tpu.memory_space<vmem>>, vector<8x1x40xf32>
    %351 = vector.shape_cast %350 : vector<8x1x40xf32> to vector<8x40xf32>
    %c0_428 = arith.constant 0 : index
    %c3_429 = arith.constant 3 : index
    %c20_430 = arith.constant 20 : index
    %352 = vector.load %arg7[%c0_428, %c3_429, %c20_430] : memref<8x5x70xf32, #tpu.memory_space<vmem>>, vector<8x1x40xf32>
    %353 = vector.shape_cast %352 : vector<8x1x40xf32> to vector<8x40xf32>
    %c0_431 = arith.constant 0 : index
    %c3_432 = arith.constant 3 : index
    %c21_433 = arith.constant 21 : index
    %354 = vector.load %arg7[%c0_431, %c3_432, %c21_433] : memref<8x5x70xf32, #tpu.memory_space<vmem>>, vector<8x1x40xf32>
    %355 = vector.shape_cast %354 : vector<8x1x40xf32> to vector<8x40xf32>
    %c0_434 = arith.constant 0 : index
    %c3_435 = arith.constant 3 : index
    %c22_436 = arith.constant 22 : index
    %356 = vector.load %arg7[%c0_434, %c3_435, %c22_436] : memref<8x5x70xf32, #tpu.memory_space<vmem>>, vector<8x1x40xf32>
    %357 = vector.shape_cast %356 : vector<8x1x40xf32> to vector<8x40xf32>
    %c0_437 = arith.constant 0 : index
    %c4 = arith.constant 4 : index
    %c0_438 = arith.constant 0 : index
    %358 = vector.load %arg7[%c0_437, %c4, %c0_438] : memref<8x5x70xf32, #tpu.memory_space<vmem>>, vector<8x1x40xf32>
    %359 = vector.shape_cast %358 : vector<8x1x40xf32> to vector<8x40xf32>
    %c0_439 = arith.constant 0 : index
    %c4_440 = arith.constant 4 : index
    %c1_441 = arith.constant 1 : index
    %360 = vector.load %arg7[%c0_439, %c4_440, %c1_441] : memref<8x5x70xf32, #tpu.memory_space<vmem>>, vector<8x1x40xf32>
    %361 = vector.shape_cast %360 : vector<8x1x40xf32> to vector<8x40xf32>
    %c0_442 = arith.constant 0 : index
    %c4_443 = arith.constant 4 : index
    %c2_444 = arith.constant 2 : index
    %362 = vector.load %arg7[%c0_442, %c4_443, %c2_444] : memref<8x5x70xf32, #tpu.memory_space<vmem>>, vector<8x1x40xf32>
    %363 = vector.shape_cast %362 : vector<8x1x40xf32> to vector<8x40xf32>
    %c0_445 = arith.constant 0 : index
    %c4_446 = arith.constant 4 : index
    %c10_447 = arith.constant 10 : index
    %364 = vector.load %arg7[%c0_445, %c4_446, %c10_447] : memref<8x5x70xf32, #tpu.memory_space<vmem>>, vector<8x1x40xf32>
    %365 = vector.shape_cast %364 : vector<8x1x40xf32> to vector<8x40xf32>
    %c0_448 = arith.constant 0 : index
    %c4_449 = arith.constant 4 : index
    %c11_450 = arith.constant 11 : index
    %366 = vector.load %arg7[%c0_448, %c4_449, %c11_450] : memref<8x5x70xf32, #tpu.memory_space<vmem>>, vector<8x1x40xf32>
    %367 = vector.shape_cast %366 : vector<8x1x40xf32> to vector<8x40xf32>
    %c0_451 = arith.constant 0 : index
    %c4_452 = arith.constant 4 : index
    %c12_453 = arith.constant 12 : index
    %368 = vector.load %arg7[%c0_451, %c4_452, %c12_453] : memref<8x5x70xf32, #tpu.memory_space<vmem>>, vector<8x1x40xf32>
    %369 = vector.shape_cast %368 : vector<8x1x40xf32> to vector<8x40xf32>
    %c0_454 = arith.constant 0 : index
    %c4_455 = arith.constant 4 : index
    %c20_456 = arith.constant 20 : index
    %370 = vector.load %arg7[%c0_454, %c4_455, %c20_456] : memref<8x5x70xf32, #tpu.memory_space<vmem>>, vector<8x1x40xf32>
    %371 = vector.shape_cast %370 : vector<8x1x40xf32> to vector<8x40xf32>
    %c0_457 = arith.constant 0 : index
    %c4_458 = arith.constant 4 : index
    %c21_459 = arith.constant 21 : index
    %372 = vector.load %arg7[%c0_457, %c4_458, %c21_459] : memref<8x5x70xf32, #tpu.memory_space<vmem>>, vector<8x1x40xf32>
    %373 = vector.shape_cast %372 : vector<8x1x40xf32> to vector<8x40xf32>
    %c0_460 = arith.constant 0 : index
    %c4_461 = arith.constant 4 : index
    %c22_462 = arith.constant 22 : index
    %374 = vector.load %arg7[%c0_460, %c4_461, %c22_462] : memref<8x5x70xf32, #tpu.memory_space<vmem>>, vector<8x1x40xf32>
    %375 = vector.shape_cast %374 : vector<8x1x40xf32> to vector<8x40xf32>
    %376 = tpu.concatenate %323, %325, %327, %329, %331, %333, %335, %337, %339, %341, %343, %345, %347, %349, %351, %353 in 0 : vector<8x40xf32>, vector<8x40xf32>, vector<8x40xf32>, vector<8x40xf32>, vector<8x40xf32>, vector<8x40xf32>, vector<8x40xf32>, vector<8x40xf32>, vector<8x40xf32>, vector<8x40xf32>, vector<8x40xf32>, vector<8x40xf32>, vector<8x40xf32>, vector<8x40xf32>, vector<8x40xf32>, vector<8x40xf32> -> vector<128x40xf32>
    %377 = tpu.concatenate %355, %357, %359, %361, %363, %365, %367, %369, %371, %373, %375 in 0 : vector<8x40xf32>, vector<8x40xf32>, vector<8x40xf32>, vector<8x40xf32>, vector<8x40xf32>, vector<8x40xf32>, vector<8x40xf32>, vector<8x40xf32>, vector<8x40xf32>, vector<8x40xf32>, vector<8x40xf32> -> vector<88x40xf32>
    %378 = tpu.concatenate %376, %377 in 0 : vector<128x40xf32>, vector<88x40xf32> -> vector<216x40xf32>
    %cst_463 = arith.constant dense<0.000000e+00> : vector<8x40xf32>
    %379 = tpu.matmul %321, %378, %cst_463 {dimension_numbers = #tpu.dot_dimension_numbers<[1], [0], [0], [1], [0, 0, 1, 1], [], []>} : vector<8x216xf32>, vector<216x40xf32>, vector<8x40xf32> -> vector<8x40xf32>
    %c0_464 = arith.constant 0 : index
    %c0_465 = arith.constant 0 : index
    %380 = vector.load %arg5[%c0_464, %c0_465] : memref<8x216xf32, #tpu.memory_space<vmem>>, vector<8x216xf32>
    %c0_466 = arith.constant 0 : index
    %c2_467 = arith.constant 2 : index
    %c0_468 = arith.constant 0 : index
    %381 = vector.load %arg8[%c0_466, %c2_467, %c0_468] : memref<8x5x70xf32, #tpu.memory_space<vmem>>, vector<8x1x40xf32>
    %382 = vector.shape_cast %381 : vector<8x1x40xf32> to vector<8x40xf32>
    %c0_469 = arith.constant 0 : index
    %c2_470 = arith.constant 2 : index
    %c1_471 = arith.constant 1 : index
    %383 = vector.load %arg8[%c0_469, %c2_470, %c1_471] : memref<8x5x70xf32, #tpu.memory_space<vmem>>, vector<8x1x40xf32>
    %384 = vector.shape_cast %383 : vector<8x1x40xf32> to vector<8x40xf32>
    %c0_472 = arith.constant 0 : index
    %c2_473 = arith.constant 2 : index
    %c2_474 = arith.constant 2 : index
    %385 = vector.load %arg8[%c0_472, %c2_473, %c2_474] : memref<8x5x70xf32, #tpu.memory_space<vmem>>, vector<8x1x40xf32>
    %386 = vector.shape_cast %385 : vector<8x1x40xf32> to vector<8x40xf32>
    %c0_475 = arith.constant 0 : index
    %c2_476 = arith.constant 2 : index
    %c10_477 = arith.constant 10 : index
    %387 = vector.load %arg8[%c0_475, %c2_476, %c10_477] : memref<8x5x70xf32, #tpu.memory_space<vmem>>, vector<8x1x40xf32>
    %388 = vector.shape_cast %387 : vector<8x1x40xf32> to vector<8x40xf32>
    %c0_478 = arith.constant 0 : index
    %c2_479 = arith.constant 2 : index
    %c11_480 = arith.constant 11 : index
    %389 = vector.load %arg8[%c0_478, %c2_479, %c11_480] : memref<8x5x70xf32, #tpu.memory_space<vmem>>, vector<8x1x40xf32>
    %390 = vector.shape_cast %389 : vector<8x1x40xf32> to vector<8x40xf32>
    %c0_481 = arith.constant 0 : index
    %c2_482 = arith.constant 2 : index
    %c12_483 = arith.constant 12 : index
    %391 = vector.load %arg8[%c0_481, %c2_482, %c12_483] : memref<8x5x70xf32, #tpu.memory_space<vmem>>, vector<8x1x40xf32>
    %392 = vector.shape_cast %391 : vector<8x1x40xf32> to vector<8x40xf32>
    %c0_484 = arith.constant 0 : index
    %c2_485 = arith.constant 2 : index
    %c20_486 = arith.constant 20 : index
    %393 = vector.load %arg8[%c0_484, %c2_485, %c20_486] : memref<8x5x70xf32, #tpu.memory_space<vmem>>, vector<8x1x40xf32>
    %394 = vector.shape_cast %393 : vector<8x1x40xf32> to vector<8x40xf32>
    %c0_487 = arith.constant 0 : index
    %c2_488 = arith.constant 2 : index
    %c21_489 = arith.constant 21 : index
    %395 = vector.load %arg8[%c0_487, %c2_488, %c21_489] : memref<8x5x70xf32, #tpu.memory_space<vmem>>, vector<8x1x40xf32>
    %396 = vector.shape_cast %395 : vector<8x1x40xf32> to vector<8x40xf32>
    %c0_490 = arith.constant 0 : index
    %c2_491 = arith.constant 2 : index
    %c22_492 = arith.constant 22 : index
    %397 = vector.load %arg8[%c0_490, %c2_491, %c22_492] : memref<8x5x70xf32, #tpu.memory_space<vmem>>, vector<8x1x40xf32>
    %398 = vector.shape_cast %397 : vector<8x1x40xf32> to vector<8x40xf32>
    %c0_493 = arith.constant 0 : index
    %c3_494 = arith.constant 3 : index
    %c0_495 = arith.constant 0 : index
    %399 = vector.load %arg8[%c0_493, %c3_494, %c0_495] : memref<8x5x70xf32, #tpu.memory_space<vmem>>, vector<8x1x40xf32>
    %400 = vector.shape_cast %399 : vector<8x1x40xf32> to vector<8x40xf32>
    %c0_496 = arith.constant 0 : index
    %c3_497 = arith.constant 3 : index
    %c1_498 = arith.constant 1 : index
    %401 = vector.load %arg8[%c0_496, %c3_497, %c1_498] : memref<8x5x70xf32, #tpu.memory_space<vmem>>, vector<8x1x40xf32>
    %402 = vector.shape_cast %401 : vector<8x1x40xf32> to vector<8x40xf32>
    %c0_499 = arith.constant 0 : index
    %c3_500 = arith.constant 3 : index
    %c2_501 = arith.constant 2 : index
    %403 = vector.load %arg8[%c0_499, %c3_500, %c2_501] : memref<8x5x70xf32, #tpu.memory_space<vmem>>, vector<8x1x40xf32>
    %404 = vector.shape_cast %403 : vector<8x1x40xf32> to vector<8x40xf32>
    %c0_502 = arith.constant 0 : index
    %c3_503 = arith.constant 3 : index
    %c10_504 = arith.constant 10 : index
    %405 = vector.load %arg8[%c0_502, %c3_503, %c10_504] : memref<8x5x70xf32, #tpu.memory_space<vmem>>, vector<8x1x40xf32>
    %406 = vector.shape_cast %405 : vector<8x1x40xf32> to vector<8x40xf32>
    %c0_505 = arith.constant 0 : index
    %c3_506 = arith.constant 3 : index
    %c11_507 = arith.constant 11 : index
    %407 = vector.load %arg8[%c0_505, %c3_506, %c11_507] : memref<8x5x70xf32, #tpu.memory_space<vmem>>, vector<8x1x40xf32>
    %408 = vector.shape_cast %407 : vector<8x1x40xf32> to vector<8x40xf32>
    %c0_508 = arith.constant 0 : index
    %c3_509 = arith.constant 3 : index
    %c12_510 = arith.constant 12 : index
    %409 = vector.load %arg8[%c0_508, %c3_509, %c12_510] : memref<8x5x70xf32, #tpu.memory_space<vmem>>, vector<8x1x40xf32>
    %410 = vector.shape_cast %409 : vector<8x1x40xf32> to vector<8x40xf32>
    %c0_511 = arith.constant 0 : index
    %c3_512 = arith.constant 3 : index
    %c20_513 = arith.constant 20 : index
    %411 = vector.load %arg8[%c0_511, %c3_512, %c20_513] : memref<8x5x70xf32, #tpu.memory_space<vmem>>, vector<8x1x40xf32>
    %412 = vector.shape_cast %411 : vector<8x1x40xf32> to vector<8x40xf32>
    %c0_514 = arith.constant 0 : index
    %c3_515 = arith.constant 3 : index
    %c21_516 = arith.constant 21 : index
    %413 = vector.load %arg8[%c0_514, %c3_515, %c21_516] : memref<8x5x70xf32, #tpu.memory_space<vmem>>, vector<8x1x40xf32>
    %414 = vector.shape_cast %413 : vector<8x1x40xf32> to vector<8x40xf32>
    %c0_517 = arith.constant 0 : index
    %c3_518 = arith.constant 3 : index
    %c22_519 = arith.constant 22 : index
    %415 = vector.load %arg8[%c0_517, %c3_518, %c22_519] : memref<8x5x70xf32, #tpu.memory_space<vmem>>, vector<8x1x40xf32>
    %416 = vector.shape_cast %415 : vector<8x1x40xf32> to vector<8x40xf32>
    %c0_520 = arith.constant 0 : index
    %c4_521 = arith.constant 4 : index
    %c0_522 = arith.constant 0 : index
    %417 = vector.load %arg8[%c0_520, %c4_521, %c0_522] : memref<8x5x70xf32, #tpu.memory_space<vmem>>, vector<8x1x40xf32>
    %418 = vector.shape_cast %417 : vector<8x1x40xf32> to vector<8x40xf32>
    %c0_523 = arith.constant 0 : index
    %c4_524 = arith.constant 4 : index
    %c1_525 = arith.constant 1 : index
    %419 = vector.load %arg8[%c0_523, %c4_524, %c1_525] : memref<8x5x70xf32, #tpu.memory_space<vmem>>, vector<8x1x40xf32>
    %420 = vector.shape_cast %419 : vector<8x1x40xf32> to vector<8x40xf32>
    %c0_526 = arith.constant 0 : index
    %c4_527 = arith.constant 4 : index
    %c2_528 = arith.constant 2 : index
    %421 = vector.load %arg8[%c0_526, %c4_527, %c2_528] : memref<8x5x70xf32, #tpu.memory_space<vmem>>, vector<8x1x40xf32>
    %422 = vector.shape_cast %421 : vector<8x1x40xf32> to vector<8x40xf32>
    %c0_529 = arith.constant 0 : index
    %c4_530 = arith.constant 4 : index
    %c10_531 = arith.constant 10 : index
    %423 = vector.load %arg8[%c0_529, %c4_530, %c10_531] : memref<8x5x70xf32, #tpu.memory_space<vmem>>, vector<8x1x40xf32>
    %424 = vector.shape_cast %423 : vector<8x1x40xf32> to vector<8x40xf32>
    %c0_532 = arith.constant 0 : index
    %c4_533 = arith.constant 4 : index
    %c11_534 = arith.constant 11 : index
    %425 = vector.load %arg8[%c0_532, %c4_533, %c11_534] : memref<8x5x70xf32, #tpu.memory_space<vmem>>, vector<8x1x40xf32>
    %426 = vector.shape_cast %425 : vector<8x1x40xf32> to vector<8x40xf32>
    %c0_535 = arith.constant 0 : index
    %c4_536 = arith.constant 4 : index
    %c12_537 = arith.constant 12 : index
    %427 = vector.load %arg8[%c0_535, %c4_536, %c12_537] : memref<8x5x70xf32, #tpu.memory_space<vmem>>, vector<8x1x40xf32>
    %428 = vector.shape_cast %427 : vector<8x1x40xf32> to vector<8x40xf32>
    %c0_538 = arith.constant 0 : index
    %c4_539 = arith.constant 4 : index
    %c20_540 = arith.constant 20 : index
    %429 = vector.load %arg8[%c0_538, %c4_539, %c20_540] : memref<8x5x70xf32, #tpu.memory_space<vmem>>, vector<8x1x40xf32>
    %430 = vector.shape_cast %429 : vector<8x1x40xf32> to vector<8x40xf32>
    %c0_541 = arith.constant 0 : index
    %c4_542 = arith.constant 4 : index
    %c21_543 = arith.constant 21 : index
    %431 = vector.load %arg8[%c0_541, %c4_542, %c21_543] : memref<8x5x70xf32, #tpu.memory_space<vmem>>, vector<8x1x40xf32>
    %432 = vector.shape_cast %431 : vector<8x1x40xf32> to vector<8x40xf32>
    %c0_544 = arith.constant 0 : index
    %c4_545 = arith.constant 4 : index
    %c22_546 = arith.constant 22 : index
    %433 = vector.load %arg8[%c0_544, %c4_545, %c22_546] : memref<8x5x70xf32, #tpu.memory_space<vmem>>, vector<8x1x40xf32>
    %434 = vector.shape_cast %433 : vector<8x1x40xf32> to vector<8x40xf32>
    %435 = tpu.concatenate %382, %384, %386, %388, %390, %392, %394, %396, %398, %400, %402, %404, %406, %408, %410, %412 in 0 : vector<8x40xf32>, vector<8x40xf32>, vector<8x40xf32>, vector<8x40xf32>, vector<8x40xf32>, vector<8x40xf32>, vector<8x40xf32>, vector<8x40xf32>, vector<8x40xf32>, vector<8x40xf32>, vector<8x40xf32>, vector<8x40xf32>, vector<8x40xf32>, vector<8x40xf32>, vector<8x40xf32>, vector<8x40xf32> -> vector<128x40xf32>
    %436 = tpu.concatenate %414, %416, %418, %420, %422, %424, %426, %428, %430, %432, %434 in 0 : vector<8x40xf32>, vector<8x40xf32>, vector<8x40xf32>, vector<8x40xf32>, vector<8x40xf32>, vector<8x40xf32>, vector<8x40xf32>, vector<8x40xf32>, vector<8x40xf32>, vector<8x40xf32>, vector<8x40xf32> -> vector<88x40xf32>
    %437 = tpu.concatenate %435, %436 in 0 : vector<128x40xf32>, vector<88x40xf32> -> vector<216x40xf32>
    %cst_547 = arith.constant dense<0.000000e+00> : vector<8x40xf32>
    %438 = tpu.matmul %380, %437, %cst_547 {dimension_numbers = #tpu.dot_dimension_numbers<[1], [0], [0], [1], [0, 0, 1, 1], [], []>} : vector<8x216xf32>, vector<216x40xf32>, vector<8x40xf32> -> vector<8x40xf32>
    %439 = vector.broadcast %52 : f32 to vector<8x40xf32>
    %440 = arith.mulf %439, %379 : vector<8x40xf32>
    %cst_548 = arith.constant 0.000000e+00 : f32
    %441 = vector.broadcast %cst_548 : f32 to vector<8x40xf32>
    %442 = arith.cmpf oge, %440, %441 : vector<8x40xf32>
    %cst_549 = arith.constant 0.00999999977 : f32
    %443 = vector.broadcast %cst_549 : f32 to vector<8x40xf32>
    %444 = arith.mulf %443, %440 : vector<8x40xf32>
    %445 = arith.select %442, %440, %444 : vector<8x40xi1>, vector<8x40xf32>
    %cst_550 = arith.constant 0.000000e+00 : f32
    %446 = vector.broadcast %cst_550 : f32 to vector<8x40xf32>
    %447 = arith.cmpf oge, %438, %446 : vector<8x40xf32>
    %cst_551 = arith.constant 0.00999999977 : f32
    %448 = vector.broadcast %cst_551 : f32 to vector<8x40xf32>
    %449 = arith.mulf %448, %438 : vector<8x40xf32>
    %450 = arith.select %447, %438, %449 : vector<8x40xi1>, vector<8x40xf32>
    %451 = arith.addf %445, %450 : vector<8x40xf32>
    %c0_552 = arith.constant 0 : index
    %c0_553 = arith.constant 0 : index
    %c2_554 = arith.constant 2 : index
    %c0_555 = arith.constant 0 : index
    %c0_556 = arith.constant 0 : index
    %452 = vector.load %arg6[%c0_552, %c0_553, %c2_554, %c0_555, %c0_556] : memref<1x1x3x8x40xf32, #tpu.memory_space<vmem>>, vector<1x1x1x8x40xf32>
    %453 = vector.shape_cast %452 : vector<1x1x1x8x40xf32> to vector<8x40xf32>
    %454 = vector.shape_cast %451 : vector<8x40xf32> to vector<1x1x1x8x40xf32>
    tpu.vector_store %arg6[%c0_552, %c0_553, %c2_554, %c0_555, %c0_556], %454 {strides = array<i32>} : memref<1x1x3x8x40xf32, #tpu.memory_space<vmem>>, vector<1x1x1x8x40xf32>,
    return
  }
  func.func @transform_0(%arg0: i32, %arg1: i32) -> i32 {
    %c0_i32 = arith.constant 0 : i32
    %c0_i32_0 = arith.constant 0 : i32
    return %c0_i32 : i32
  }
  func.func @transform_1(%arg0: i32, %arg1: i32) -> (i32, i32, i32, i32, i32) {
    %c0_i32 = arith.constant 0 : i32
    %c0_i32_0 = arith.constant 0 : i32
    %c0_i32_1 = arith.constant 0 : i32
    %c0_i32_2 = arith.constant 0 : i32
    %c0_i32_3 = arith.constant 0 : i32
    return %arg0, %c0_i32, %c0_i32_0, %c0_i32_1, %c0_i32_2 : i32, i32, i32, i32, i32
  }
  func.func @transform_2(%arg0: i32, %arg1: i32) -> (i32, i32) {
    %c0_i32 = arith.constant 0 : i32
    %c0_i32_0 = arith.constant 0 : i32
    %c0_i32_1 = arith.constant 0 : i32
    return %c0_i32, %c0_i32_0 : i32, i32
  }
  func.func @transform_3(%arg0: i32, %arg1: i32) -> (i32, i32) {
    %c0_i32 = arith.constant 0 : i32
    %c0_i32_0 = arith.constant 0 : i32
    %c0_i32_1 = arith.constant 0 : i32
    return %c0_i32, %c0_i32_0 : i32, i32
  }
  func.func @transform_4(%arg0: i32, %arg1: i32) -> (i32, i32, i32, i32, i32) {
    %c0_i32 = arith.constant 0 : i32
    %c0_i32_0 = arith.constant 0 : i32
    %c0_i32_1 = arith.constant 0 : i32
    %c0_i32_2 = arith.constant 0 : i32
    return %arg0, %arg1, %c0_i32, %c0_i32_0, %c0_i32_1 : i32, i32, i32, i32, i32
  }
}

</mosaic_0001>

<bundles_post_ra>
// kernel: affb_forward.1
= control target key start
LH: loop header
LB: loop body
LE: loop exit
PB: predicated region body
PF: predicated region fallthrough
CT: control target
= control target key end

     0   :  { %s3274_s17 = smov 0   ;;  %s3276_s18 = smov 0   ;;  %s4077_s0 = inlined_call_operand.<no memory space> [shape: f32[1], index: 0, kind: input, shape index: {}]   ;;  %s4078_s1 = inlined_call_operand.vmem [shape: f32[2,4,3,8,8], index: 1, kind: input, shape index: {}]   ;;  %s4079_s2 = inlined_call_operand.vmem [shape: f32[8,216], index: 2, kind: input, shape index: {}]   ;;  %s4080_s3 = inlined_call_operand.vmem [shape: f32[8,216], index: 3, kind: input, shape index: {}]   ;;  %s4081_s4 = inlined_call_operand.vmem [shape: f32[2,2,3,8,40], index: 4, kind: output, shape index: {}]  }
   0x1   :  { %9 = sst [smem:[#allocation4]] %s4077_s0  ;;  %s3278_s19 = smov 0  }
   0x2   :  { %s3280_s20 = smov 0   ;;  %s3282_s21 = smov 0  }
   0x3 LB: > { %s24_s0 = sadd.s32 1, %s3213_s19  ;;  %s27_s22 = sadd.s32 1, %s3217_s20  ;;  %s3221_s21 = sphi %s3282_s21, %s15_s21   ;;  %s3217_s20 = sphi %s3280_s20, %s4085_s20   ;;  %s3213_s19 = sphi %s3278_s19, %s4084_s19   ;;  %s3209_s18 = sphi %s3276_s18, %s4083_s18   ;;  %s3205_s17 = sphi %s3274_s17, %s4082_s17  }
   0x4   : > { %p25_p0 = scmp.ge.s32.totalorder %s24_s0, 2  ;;  %p2349_p1 = scmp.ge.s32.totalorder %s3221_s21, 1 }
   0x5   : > { %p177_p2 = scmp.lt.s32.totalorder %s3221_s21, 5 }
   0x6   : > { %s4087_s0 = smov (%p25_p0, %s24_s0), 0  ;;  %s4089_s22 = smov (!%p25_p0, %s27_s22), %s3217_s20 }
   0x7   : > { %p178_p3 = pnand %p2349_p1, %p177_p2  ;;  %p29_p4 = scmp.ge.s32.totalorder %s4089_s22, 2 }
   0x8   : > { %p207_p5 = scmp.lt.s32.totalorder (!%p178_p3), %s3209_s18, 1  ;;  %p214_p6 = scmp.lt.s32.totalorder (!%p178_p3), %s3205_s17, 1  ;;  %vm221_vm0 = vcmask (!%p178_p3), 569344   ;;  %v3223_v0 = vmov (!%p178_p3), 0.0  }
   0x9   : > { %s4091_s22 = smov (%p29_p4, %s4089_s22), 0  ;;  %181 = sbr.rel (%p178_p3) target bundleno = 1474 (0x5c2), region = 36 }
   0xa   : > { %222 = vst.msk [vmem:[#allocation2] sm:$0x1f] (!%p178_p3), %vm221_vm0, %v3223_v0  ;;  %223 = vst.msk [vmem:[#allocation2 + $0x8] sm:$0x1f] (!%p178_p3), %vm221_vm0, %v3223_v0  ;;  %s3343_s23 = sshll.u32 (!%p178_p3), %s3205_s17, 2 }
   0xb   : > { %224 = vst.msk [vmem:[#allocation2 + $0x10] sm:$0x1f] (!%p178_p3), %vm221_vm0, %v3223_v0  ;;  %225 = vst.msk [vmem:[#allocation2 + $0x18] sm:$0x1f] (!%p178_p3), %vm221_vm0, %v3223_v0  ;;  %s2353_s25 = sadd.s32 (!%p178_p3), 4294967295, %s3343_s23 }
   0xc   : > { %226 = vst.msk [vmem:[#allocation2 + $0x20] sm:$0x1f] (!%p178_p3), %vm221_vm0, %v3223_v0  ;;  %227 = vst.msk [vmem:[#allocation2 + $0x28] sm:$0x1f] (!%p178_p3), %vm221_vm0, %v3223_v0  ;;  %p240_p7 = scmp.ge.s32.totalorder (!%p178_p3), %s2353_s25, 0  ;;  %p241_p8 = scmp.lt.s32.totalorder (!%p178_p3), %s2353_s25, 8 }
   0xd   : > { %228 = vst.msk [vmem:[#allocation2 + $0x30] sm:$0x1f] (!%p178_p3), %vm221_vm0, %v3223_v0  ;;  %229 = vst.msk [vmem:[#allocation2 + $0x38] sm:$0x1f] (!%p178_p3), %vm221_vm0, %v3223_v0 }
   0xe   : > { %230 = vst.msk [vmem:[#allocation3] sm:$0x1f] (!%p178_p3), %vm221_vm0, %v3223_v0  ;;  %231 = vst.msk [vmem:[#allocation3 + $0x8] sm:$0x1f] (!%p178_p3), %vm221_vm0, %v3223_v0  ;;  %p242_p9 = pnand (!%p178_p3), %p241_p8, %p240_p7 }
   0xf   : > { %232 = vst.msk [vmem:[#allocation3 + $0x10] sm:$0x1f] (!%p178_p3), %vm221_vm0, %v3223_v0  ;;  %233 = vst.msk [vmem:[#allocation3 + $0x18] sm:$0x1f] (!%p178_p3), %vm221_vm0, %v3223_v0 }
  0x10   : > { %234 = vst.msk [vmem:[#allocation3 + $0x20] sm:$0x1f] %vm221_vm0, %v3223_v0  ;;  %235 = vst.msk [vmem:[#allocation3 + $0x28] sm:$0x1f] %vm221_vm0, %v3223_v0  ;;  %s4093_s18 = smov (!%p207_p5, %s3209_s18), 1  ;;  %s4095_s17 = smov (!%p214_p6, %s3205_s17), 1 }
  0x11   : > { %236 = vst.msk [vmem:[#allocation3 + $0x30] sm:$0x1f] %vm221_vm0, %v3223_v0  ;;  %237 = vst.msk [vmem:[#allocation3 + $0x38] sm:$0x1f] %vm221_vm0, %v3223_v0  ;;  %s2650_s24 = smul.u32 96, %s4093_s18  ;;  %vm272_vm1 = vcmask (!%p242_p9), 1041409  }
  0x12   : > { %s2651_s26 = smul.u32 3, %s4095_s17  ;;  %vm275_vm2 = vcmask (!%p242_p9), 1042434   ;;  %s3224_s11 = smov (!%p242_p9), 1   ;;  %vm301_vm3 = vcmask (!%p242_p9), 67592  }
  0x13   : > { %s3355_s29 = scalar_lea.vmem %s4078_s1, %s2650_s24  ;;  %s2652_s30 = smul.u32 6, %s4093_s18 }
  0x14   : > { %245 = sbr.rel (%p242_p9) target bundleno = 148 (0x94), region = 40  ;;  %s246_s10 = scalar_lea.vmem (!%p242_p9), %s3355_s29, %s2353_s25 }
  0x15   : > { %s218_s5 = sadd.s32 %s2652_s30, %s2651_s26  ;;  %v253_v1 = vld [vmem:[%s246_s10 + $0x30] sm:$0x1] (!%p242_p9)  ;;  %v254_v2 = vld [vmem:[%s246_s10 + $0x38] sm:$0x1] (!%p242_p9)  ;;  %v255_v3 = vld [vmem:[%s246_s10 + $0x40] sm:$0x1] (!%p242_p9) }
  0x16   : > { %s2351_s6 = sshll.u32 %s218_s5, 3  ;;  %v281_v4 = vrot.slane (!%p242_p9), %v254_v2, 7  ;;  %v283_v5 = vrot.slane (!%p242_p9), %v255_v3, 6  ;;  %v247_v6 = vld [vmem:[%s246_s10] sm:$0x1] (!%p242_p9) }
  0x17   : > { %s3360_s9 = scalar_lea.vmem %s4081_s4, %s2351_s6  ;;  %v248_v7 = vld [vmem:[%s246_s10 + $0x8] sm:$0x1] (!%p242_p9)  ;;  %v249_v8 = vld [vmem:[%s246_s10 + $0x10] sm:$0x1] (!%p242_p9)  ;;  %v258_v14 = vld [vmem:[%s246_s10 + $0x58] sm:$0x1] (!%p242_p9) }
  0x18   : > { %v271_v9 = vrot.slane (!%p242_p9), %v248_v7, 7  ;;  %v256_v10 = vld [vmem:[%s246_s10 + $0x48] sm:$0x1] (!%p242_p9)  ;;  %v282_v11 = vsel (!%p242_p9), %vm272_vm1, %v281_v4, %v253_v1  ;;  %v274_v12 = vrot.slane (!%p242_p9), %v249_v8, 6  ;;  %v257_v13 = vld [vmem:[%s246_s10 + $0x50] sm:$0x1] (!%p242_p9) }
  0x19   : > { %v284_v15 = vsel (!%p242_p9), %vm275_vm2, %v283_v5, %v282_v11  ;;  %v285_v17 = vrot.slane (!%p242_p9), %v257_v13, 7  ;;  %v287_v18 = vrot.slane (!%p242_p9), %v258_v14, 6  ;;  %v250_v19 = vld [vmem:[%s246_s10 + $0x18] sm:$0x1] (!%p242_p9)  ;;  %v251_v20 = vld [vmem:[%s246_s10 + $0x20] sm:$0x1] (!%p242_p9) }
  0x1a   : > { %v273_v16 = vsel (!%p242_p9), %vm272_vm1, %v271_v9, %v247_v6  ;;  %293 = vrot.lane.b32.xlu1 (!%p242_p9), %v284_v15, %s3224_s11  ;;  %v252_v22 = vld [vmem:[%s246_s10 + $0x28] sm:$0x1] (!%p242_p9)  ;;  %v277_v23 = vrot.slane (!%p242_p9), %v251_v20, 7 }
  0x1b   : > { %v276_v21 = vsel %vm275_vm2, %v274_v12, %v273_v16  ;;  %v286_v24 = vsel %vm272_vm1, %v285_v17, %v256_v10  ;;  %v279_v25 = vrot.slane %v252_v22, 6 }
  0x1c   : > { %289 = vrot.lane.b32.xlu0 %v276_v21, %s3224_s11  ;;  %v288_v26 = vsel %vm275_vm2, %v287_v18, %v286_v24  ;;  %v278_v27 = vsel %vm272_vm1, %v277_v23, %v250_v19 }
  0x1d   : > { %v280_v28 = vsel %vm275_vm2, %v279_v25, %v278_v27 }
  0x1e   : > { %295 = vrot.lane.b32.xlu1 %v288_v26, %s3224_s11 }
  0x20   : > { %291 = vrot.lane.b32.xlu0 %v280_v28, %s3224_s11 }
  0x8c   : > { %v294_v29 = vpop.permute.xlu1 %293 }
  0x8d   : > { %304 = vst.msk [vmem:[#allocation2 + $0x11] sm:$0x7] %vm301_vm3, %v294_v29 }
  0x8e   : > { %v290_v30 = vpop.permute.xlu0 %289 }
  0x8f   : > { %302 = vst.msk [vmem:[#allocation2 + $0x1] sm:$0x7] %vm301_vm3, %v290_v30 }
  0x90   : > { %v296_v31 = vpop.permute.xlu1 %295 }
  0x91   : > { %305 = vst.msk [vmem:[#allocation2 + $0x19] sm:$0x7] %vm301_vm3, %v296_v31 }
  0x92   : > { %v292_v32 = vpop.permute.xlu0 %291 }
  0x93   : > { %303 = vst.msk [vmem:[#allocation2 + $0x9] sm:$0x7] %vm301_vm3, %v292_v32 }
  0x94 PF: > { %p306_p10 = scmp.ge.s32.totalorder %s3343_s23, 0  ;;  %p307_p11 = scmp.lt.s32.totalorder %s3343_s23, 8 }
  0x96   : > { %p308_p12 = pnand %p307_p11, %p306_p10 }
  0x97   : > { %s312_s12 = scalar_lea.vmem (!%p308_p12), %s3355_s29, %s3343_s23  ;;  %vm338_vm4 = vcmask (!%p308_p12), 1041409   ;;  %vm341_vm5 = vcmask (!%p308_p12), 1042434   ;;  %s3225_s13 = smov (!%p308_p12), 11   ;;  %vm367_vm6 = vcmask (!%p308_p12), 149592  }
  0x98   : > { %311 = sbr.rel (%p308_p12) target bundleno = 278 (0x116), region = 44  ;;  %v319_v33 = vld [vmem:[%s312_s12 + $0x30] sm:$0x1] (!%p308_p12)  ;;  %v320_v34 = vld [vmem:[%s312_s12 + $0x38] sm:$0x1] (!%p308_p12) }
  0x99   : > { %v321_v35 = vld [vmem:[%s312_s12 + $0x40] sm:$0x1] (!%p308_p12)  ;;  %v347_v36 = vrot.slane (!%p308_p12), %v320_v34, 7  ;;  %v314_v39 = vld [vmem:[%s312_s12 + $0x8] sm:$0x1] (!%p308_p12) }
  0x9a   : > { %v349_v37 = vrot.slane (!%p308_p12), %v321_v35, 6  ;;  %v313_v38 = vld [vmem:[%s312_s12] sm:$0x1] (!%p308_p12)  ;;  %v315_v40 = vld [vmem:[%s312_s12 + $0x10] sm:$0x1] (!%p308_p12)  ;;  %v337_v41 = vrot.slane (!%p308_p12), %v314_v39, 7 }
  0x9b   : > { %v322_v42 = vld [vmem:[%s312_s12 + $0x48] sm:$0x1] (!%p308_p12)  ;;  %v348_v43 = vsel (!%p308_p12), %vm338_vm4, %v347_v36, %v319_v33  ;;  %v340_v44 = vrot.slane (!%p308_p12), %v315_v40, 6  ;;  %v323_v45 = vld [vmem:[%s312_s12 + $0x50] sm:$0x1] (!%p308_p12) }
  0x9c   : > { %v324_v46 = vld [vmem:[%s312_s12 + $0x58] sm:$0x1] (!%p308_p12)  ;;  %v350_v47 = vsel (!%p308_p12), %vm341_vm5, %v349_v37, %v348_v43  ;;  %v339_v48 = vsel (!%p308_p12), %vm338_vm4, %v337_v41, %v313_v38  ;;  %v351_v49 = vrot.slane (!%p308_p12), %v323_v45, 7  ;;  %v317_v52 = vld [vmem:[%s312_s12 + $0x20] sm:$0x1] (!%p308_p12) }
  0x9d   : > { %v353_v50 = vrot.slane (!%p308_p12), %v324_v46, 6  ;;  %v316_v51 = vld [vmem:[%s312_s12 + $0x18] sm:$0x1] (!%p308_p12)  ;;  %359 = vrot.lane.b32.xlu1 (!%p308_p12), %v350_v47, %s3225_s13  ;;  %v342_v53 = vsel (!%p308_p12), %vm341_vm5, %v340_v44, %v339_v48  ;;  %v318_v54 = vld [vmem:[%s312_s12 + $0x28] sm:$0x1] (!%p308_p12)  ;;  %v343_v55 = vrot.slane (!%p308_p12), %v317_v52, 7 }
  0x9e   : > { %355 = vrot.lane.b32.xlu0 (!%p308_p12), %v342_v53, %s3225_s13  ;;  %v352_v56 = vsel (!%p308_p12), %vm338_vm4, %v351_v49, %v322_v42  ;;  %v345_v57 = vrot.slane (!%p308_p12), %v318_v54, 6 }
  0x9f   : > { %v354_v58 = vsel %vm341_vm5, %v353_v50, %v352_v56  ;;  %v344_v59 = vsel %vm338_vm4, %v343_v55, %v316_v51 }
  0xa0   : > { %v346_v60 = vsel %vm341_vm5, %v345_v57, %v344_v59 }
  0xa1   : > { %361 = vrot.lane.b32.xlu1 %v354_v58, %s3225_s13 }
  0xa2   : > { %357 = vrot.lane.b32.xlu0 %v346_v60, %s3225_s13 }
 0x10f   : > { %v360_v61 = vpop.permute.xlu1 %359 }
 0x110   : > { %370 = vst.msk [vmem:[#allocation2 + $0x11] sm:$0x7] %vm367_vm6, %v360_v61  ;;  %374 = vst.msk [vmem:[#allocation3 + $0x11] sm:$0x7] %vm367_vm6, %v360_v61  ;;  %v356_v62 = vpop.permute.xlu0 %355 }
 0x111   : > { %368 = vst.msk [vmem:[#allocation2 + $0x1] sm:$0x7] %vm367_vm6, %v356_v62  ;;  %372 = vst.msk [vmem:[#allocation3 + $0x1] sm:$0x7] %vm367_vm6, %v356_v62 }
 0x113   : > { %v362_v63 = vpop.permute.xlu1 %361 }
 0x114   : > { %371 = vst.msk [vmem:[#allocation2 + $0x19] sm:$0x7] %vm367_vm6, %v362_v63  ;;  %375 = vst.msk [vmem:[#allocation3 + $0x19] sm:$0x7] %vm367_vm6, %v362_v63  ;;  %v358_v1 = vpop.permute.xlu0 %357 }
 0x115   : > { %369 = vst.msk [vmem:[#allocation2 + $0x9] sm:$0x7] %vm367_vm6, %v358_v1  ;;  %373 = vst.msk [vmem:[#allocation3 + $0x9] sm:$0x7] %vm367_vm6, %v358_v1 }
 0x116 PF: > { %s376_s14 = sadd.s32 1, %s3343_s23 }
 0x117   : > { %p377_p13 = scmp.ge.s32.totalorder %s376_s14, 0  ;;  %p378_p0 = scmp.lt.s32.totalorder %s376_s14, 8 }
 0x119   : > { %p379_p1 = pnand %p378_p0, %p377_p13 }
 0x11a   : > { %s2293_s15 = scalar_lea.vmem (!%p379_p1), %s3355_s29, %s3343_s23  ;;  %vm409_vm7 = vcmask (!%p379_p1), 1041409   ;;  %vm412_vm8 = vcmask (!%p379_p1), 1042434   ;;  %s3226_s16 = smov (!%p379_p1), 21   ;;  %vm438_vm9 = vcmask (!%p379_p1), 231592  }
 0x11b   : > { %382 = sbr.rel (%p379_p1) target bundleno = 409 (0x199), region = 48  ;;  %v2361_v2 = vld [vmem:[%s2293_s15 + $0x31] sm:$0x1] (!%p379_p1)  ;;  %v2362_v3 = vld [vmem:[%s2293_s15 + $0x39] sm:$0x1] (!%p379_p1) }
 0x11c   : > { %v2363_v4 = vld [vmem:[%s2293_s15 + $0x41] sm:$0x1] (!%p379_p1)  ;;  %v418_v5 = vrot.slane (!%p379_p1), %v2362_v3, 7  ;;  %v2356_v8 = vld [vmem:[%s2293_s15 + $0x9] sm:$0x1] (!%p379_p1) }
 0x11d   : > { %v420_v6 = vrot.slane (!%p379_p1), %v2363_v4, 6  ;;  %v2355_v7 = vld [vmem:[%s2293_s15 + $0x1] sm:$0x1] (!%p379_p1)  ;;  %v2357_v9 = vld [vmem:[%s2293_s15 + $0x11] sm:$0x1] (!%p379_p1)  ;;  %v408_v10 = vrot.slane (!%p379_p1), %v2356_v8, 7 }
 0x11e   : > { %v2364_v11 = vld [vmem:[%s2293_s15 + $0x49] sm:$0x1] (!%p379_p1)  ;;  %v419_v12 = vsel (!%p379_p1), %vm409_vm7, %v418_v5, %v2361_v2  ;;  %v411_v13 = vrot.slane (!%p379_p1), %v2357_v9, 6  ;;  %v2365_v14 = vld [vmem:[%s2293_s15 + $0x51] sm:$0x1] (!%p379_p1) }
 0x11f   : > { %v2366_v15 = vld [vmem:[%s2293_s15 + $0x59] sm:$0x1] (!%p379_p1)  ;;  %v421_v16 = vsel (!%p379_p1), %vm412_vm8, %v420_v6, %v419_v12  ;;  %v410_v17 = vsel (!%p379_p1), %vm409_vm7, %v408_v10, %v2355_v7  ;;  %v422_v18 = vrot.slane (!%p379_p1), %v2365_v14, 7  ;;  %v2359_v21 = vld [vmem:[%s2293_s15 + $0x21] sm:$0x1] (!%p379_p1) }
 0x120   : > { %v424_v19 = vrot.slane (!%p379_p1), %v2366_v15, 6  ;;  %v2358_v20 = vld [vmem:[%s2293_s15 + $0x19] sm:$0x1] (!%p379_p1)  ;;  %430 = vrot.lane.b32.xlu1 (!%p379_p1), %v421_v16, %s3226_s16  ;;  %v413_v22 = vsel (!%p379_p1), %vm412_vm8, %v411_v13, %v410_v17  ;;  %v2360_v23 = vld [vmem:[%s2293_s15 + $0x29] sm:$0x1] (!%p379_p1)  ;;  %v414_v24 = vrot.slane (!%p379_p1), %v2359_v21, 7 }
 0x121   : > { %426 = vrot.lane.b32.xlu0 (!%p379_p1), %v413_v22, %s3226_s16  ;;  %v423_v25 = vsel (!%p379_p1), %vm409_vm7, %v422_v18, %v2364_v11  ;;  %v416_v26 = vrot.slane (!%p379_p1), %v2360_v23, 6 }
 0x122   : > { %v425_v27 = vsel %vm412_vm8, %v424_v19, %v423_v25  ;;  %v415_v28 = vsel %vm409_vm7, %v414_v24, %v2358_v20 }
 0x123   : > { %v417_v29 = vsel %vm412_vm8, %v416_v26, %v415_v28 }
 0x124   : > { %432 = vrot.lane.b32.xlu1 %v425_v27, %s3226_s16 }
 0x125   : > { %428 = vrot.lane.b32.xlu0 %v417_v29, %s3226_s16 }
 0x192   : > { %v431_v30 = vpop.permute.xlu1 %430 }
 0x193   : > { %441 = vst.msk [vmem:[#allocation2 + $0x11] sm:$0x7] %vm438_vm9, %v431_v30  ;;  %445 = vst.msk [vmem:[#allocation3 + $0x11] sm:$0x7] %vm438_vm9, %v431_v30  ;;  %v427_v31 = vpop.permute.xlu0 %426 }
 0x194   : > { %439 = vst.msk [vmem:[#allocation2 + $0x1] sm:$0x7] %vm438_vm9, %v427_v31  ;;  %443 = vst.msk [vmem:[#allocation3 + $0x1] sm:$0x7] %vm438_vm9, %v427_v31 }
 0x196   : > { %v433_v32 = vpop.permute.xlu1 %432 }
 0x197   : > { %442 = vst.msk [vmem:[#allocation2 + $0x19] sm:$0x7] %vm438_vm9, %v433_v32  ;;  %446 = vst.msk [vmem:[#allocation3 + $0x19] sm:$0x7] %vm438_vm9, %v433_v32  ;;  %v429_v33 = vpop.permute.xlu0 %428 }
 0x198   : > { %440 = vst.msk [vmem:[#allocation2 + $0x9] sm:$0x7] %vm438_vm9, %v429_v33  ;;  %444 = vst.msk [vmem:[#allocation3 + $0x9] sm:$0x7] %vm438_vm9, %v429_v33 }
 0x199 PF: > { %s447_s17 = sadd.s32 2, %s3343_s23 }
 0x19a   : > { %p448_p2 = scmp.ge.s32.totalorder %s447_s17, 0  ;;  %p449_p3 = scmp.lt.s32.totalorder %s447_s17, 8 }
 0x19c   : > { %p450_p4 = pnand %p449_p3, %p448_p2 }
 0x19d   : > { %s2296_s18 = scalar_lea.vmem (!%p450_p4), %s3355_s29, %s3343_s23  ;;  %vm480_vm10 = vcmask (!%p450_p4), 1041409   ;;  %vm483_vm11 = vcmask (!%p450_p4), 1042434   ;;  %s3227_s24 = smov (!%p450_p4), 31   ;;  %vm509_vm12 = vcmask (!%p450_p4), 313592  }
 0x19e   : > { %453 = sbr.rel (%p450_p4) target bundleno = 540 (0x21c), region = 52  ;;  %v2374_v34 = vld [vmem:[%s2296_s18 + $0x32] sm:$0x1] (!%p450_p4)  ;;  %v2375_v35 = vld [vmem:[%s2296_s18 + $0x3a] sm:$0x1] (!%p450_p4) }
 0x19f   : > { %v2376_v36 = vld [vmem:[%s2296_s18 + $0x42] sm:$0x1] (!%p450_p4)  ;;  %v489_v37 = vrot.slane (!%p450_p4), %v2375_v35, 7  ;;  %v2369_v40 = vld [vmem:[%s2296_s18 + $0xa] sm:$0x1] (!%p450_p4) }
 0x1a0   : > { %v491_v38 = vrot.slane (!%p450_p4), %v2376_v36, 6  ;;  %v2368_v39 = vld [vmem:[%s2296_s18 + $0x2] sm:$0x1] (!%p450_p4)  ;;  %v2370_v41 = vld [vmem:[%s2296_s18 + $0x12] sm:$0x1] (!%p450_p4)  ;;  %v479_v42 = vrot.slane (!%p450_p4), %v2369_v40, 7 }
 0x1a1   : > { %v2377_v43 = vld [vmem:[%s2296_s18 + $0x4a] sm:$0x1] (!%p450_p4)  ;;  %v490_v44 = vsel (!%p450_p4), %vm480_vm10, %v489_v37, %v2374_v34  ;;  %v482_v45 = vrot.slane (!%p450_p4), %v2370_v41, 6  ;;  %v2378_v46 = vld [vmem:[%s2296_s18 + $0x52] sm:$0x1] (!%p450_p4) }
 0x1a2   : > { %v2379_v47 = vld [vmem:[%s2296_s18 + $0x5a] sm:$0x1] (!%p450_p4)  ;;  %v492_v48 = vsel (!%p450_p4), %vm483_vm11, %v491_v38, %v490_v44  ;;  %v481_v49 = vsel (!%p450_p4), %vm480_vm10, %v479_v42, %v2368_v39  ;;  %v493_v50 = vrot.slane (!%p450_p4), %v2378_v46, 7  ;;  %v2372_v53 = vld [vmem:[%s2296_s18 + $0x22] sm:$0x1] (!%p450_p4) }
 0x1a3   : > { %v495_v51 = vrot.slane (!%p450_p4), %v2379_v47, 6  ;;  %v2371_v52 = vld [vmem:[%s2296_s18 + $0x1a] sm:$0x1] (!%p450_p4)  ;;  %501 = vrot.lane.b32.xlu1 (!%p450_p4), %v492_v48, %s3227_s24  ;;  %v484_v54 = vsel (!%p450_p4), %vm483_vm11, %v482_v45, %v481_v49  ;;  %v2373_v55 = vld [vmem:[%s2296_s18 + $0x2a] sm:$0x1] (!%p450_p4)  ;;  %v485_v56 = vrot.slane (!%p450_p4), %v2372_v53, 7 }
 0x1a4   : > { %497 = vrot.lane.b32.xlu0 (!%p450_p4), %v484_v54, %s3227_s24  ;;  %v494_v57 = vsel (!%p450_p4), %vm480_vm10, %v493_v50, %v2377_v43  ;;  %v487_v58 = vrot.slane (!%p450_p4), %v2373_v55, 6 }
 0x1a5   : > { %v496_v59 = vsel %vm483_vm11, %v495_v51, %v494_v57  ;;  %v486_v60 = vsel %vm480_vm10, %v485_v56, %v2371_v52 }
 0x1a6   : > { %v488_v61 = vsel %vm483_vm11, %v487_v58, %v486_v60 }
 0x1a7   : > { %503 = vrot.lane.b32.xlu1 %v496_v59, %s3227_s24 }
 0x1a8   : > { %499 = vrot.lane.b32.xlu0 %v488_v61, %s3227_s24 }
 0x215   : > { %v502_v62 = vpop.permute.xlu1 %501 }
 0x216   : > { %512 = vst.msk [vmem:[#allocation2 + $0x11] sm:$0x7] %vm509_vm12, %v502_v62  ;;  %516 = vst.msk [vmem:[#allocation3 + $0x11] sm:$0x7] %vm509_vm12, %v502_v62  ;;  %v498_v63 = vpop.permute.xlu0 %497 }
 0x217   : > { %510 = vst.msk [vmem:[#allocation2 + $0x1] sm:$0x7] %vm509_vm12, %v498_v63  ;;  %514 = vst.msk [vmem:[#allocation3 + $0x1] sm:$0x7] %vm509_vm12, %v498_v63 }
 0x219   : > { %v504_v1 = vpop.permute.xlu1 %503 }
 0x21a   : > { %513 = vst.msk [vmem:[#allocation2 + $0x19] sm:$0x7] %vm509_vm12, %v504_v1  ;;  %517 = vst.msk [vmem:[#allocation3 + $0x19] sm:$0x7] %vm509_vm12, %v504_v1  ;;  %v500_v2 = vpop.permute.xlu0 %499 }
 0x21b   : > { %511 = vst.msk [vmem:[#allocation2 + $0x9] sm:$0x7] %vm509_vm12, %v500_v2  ;;  %515 = vst.msk [vmem:[#allocation3 + $0x9] sm:$0x7] %vm509_vm12, %v500_v2 }
 0x21c PF: > { %s518_s25 = sadd.s32 3, %s3343_s23 }
 0x21d   : > { %p519_p5 = scmp.ge.s32.totalorder %s518_s25, 0  ;;  %p520_p6 = scmp.lt.s32.totalorder %s518_s25, 8 }
 0x21f   : > { %p521_p7 = pnand %p520_p6, %p519_p5 }
 0x220   : > { %s2299_s26 = scalar_lea.vmem (!%p521_p7), %s3355_s29, %s3343_s23  ;;  %vm551_vm13 = vcmask (!%p521_p7), 1041409   ;;  %vm554_vm14 = vcmask (!%p521_p7), 1042434   ;;  %s3228_s27 = smov (!%p521_p7), 41   ;;  %vm580_vm15 = vcmask (!%p521_p7), 395592  }
 0x221   : > { %524 = sbr.rel (%p521_p7) target bundleno = 671 (0x29f), region = 56  ;;  %v2387_v3 = vld [vmem:[%s2299_s26 + $0x33] sm:$0x1] (!%p521_p7)  ;;  %v2388_v4 = vld [vmem:[%s2299_s26 + $0x3b] sm:$0x1] (!%p521_p7) }
 0x222   : > { %v2389_v5 = vld [vmem:[%s2299_s26 + $0x43] sm:$0x1] (!%p521_p7)  ;;  %v560_v6 = vrot.slane (!%p521_p7), %v2388_v4, 7  ;;  %v2382_v9 = vld [vmem:[%s2299_s26 + $0xb] sm:$0x1] (!%p521_p7) }
 0x223   : > { %v562_v7 = vrot.slane (!%p521_p7), %v2389_v5, 6  ;;  %v2381_v8 = vld [vmem:[%s2299_s26 + $0x3] sm:$0x1] (!%p521_p7)  ;;  %v2383_v10 = vld [vmem:[%s2299_s26 + $0x13] sm:$0x1] (!%p521_p7)  ;;  %v550_v11 = vrot.slane (!%p521_p7), %v2382_v9, 7 }
 0x224   : > { %v2390_v12 = vld [vmem:[%s2299_s26 + $0x4b] sm:$0x1] (!%p521_p7)  ;;  %v561_v13 = vsel (!%p521_p7), %vm551_vm13, %v560_v6, %v2387_v3  ;;  %v553_v14 = vrot.slane (!%p521_p7), %v2383_v10, 6  ;;  %v2391_v15 = vld [vmem:[%s2299_s26 + $0x53] sm:$0x1] (!%p521_p7) }
 0x225   : > { %v2392_v16 = vld [vmem:[%s2299_s26 + $0x5b] sm:$0x1] (!%p521_p7)  ;;  %v563_v17 = vsel (!%p521_p7), %vm554_vm14, %v562_v7, %v561_v13  ;;  %v552_v18 = vsel (!%p521_p7), %vm551_vm13, %v550_v11, %v2381_v8  ;;  %v564_v19 = vrot.slane (!%p521_p7), %v2391_v15, 7  ;;  %v2385_v22 = vld [vmem:[%s2299_s26 + $0x23] sm:$0x1] (!%p521_p7) }
 0x226   : > { %v566_v20 = vrot.slane (!%p521_p7), %v2392_v16, 6  ;;  %v2384_v21 = vld [vmem:[%s2299_s26 + $0x1b] sm:$0x1] (!%p521_p7)  ;;  %572 = vrot.lane.b32.xlu1 (!%p521_p7), %v563_v17, %s3228_s27  ;;  %v555_v23 = vsel (!%p521_p7), %vm554_vm14, %v553_v14, %v552_v18  ;;  %v2386_v24 = vld [vmem:[%s2299_s26 + $0x2b] sm:$0x1] (!%p521_p7)  ;;  %v556_v25 = vrot.slane (!%p521_p7), %v2385_v22, 7 }
 0x227   : > { %568 = vrot.lane.b32.xlu0 (!%p521_p7), %v555_v23, %s3228_s27  ;;  %v565_v26 = vsel (!%p521_p7), %vm551_vm13, %v564_v19, %v2390_v12  ;;  %v558_v27 = vrot.slane (!%p521_p7), %v2386_v24, 6 }
 0x228   : > { %v567_v28 = vsel %vm554_vm14, %v566_v20, %v565_v26  ;;  %v557_v29 = vsel %vm551_vm13, %v556_v25, %v2384_v21 }
 0x229   : > { %v559_v30 = vsel %vm554_vm14, %v558_v27, %v557_v29 }
 0x22a   : > { %574 = vrot.lane.b32.xlu1 %v567_v28, %s3228_s27 }
 0x22b   : > { %570 = vrot.lane.b32.xlu0 %v559_v30, %s3228_s27 }
 0x298   : > { %v573_v31 = vpop.permute.xlu1 %572 }
 0x299   : > { %583 = vst.msk [vmem:[#allocation2 + $0x11] sm:$0x7] %vm580_vm15, %v573_v31  ;;  %587 = vst.msk [vmem:[#allocation3 + $0x11] sm:$0x7] %vm580_vm15, %v573_v31  ;;  %v569_v32 = vpop.permute.xlu0 %568 }
 0x29a   : > { %581 = vst.msk [vmem:[#allocation2 + $0x1] sm:$0x7] %vm580_vm15, %v569_v32  ;;  %585 = vst.msk [vmem:[#allocation3 + $0x1] sm:$0x7] %vm580_vm15, %v569_v32 }
 0x29c   : > { %v575_v33 = vpop.permute.xlu1 %574 }
 0x29d   : > { %584 = vst.msk [vmem:[#allocation2 + $0x19] sm:$0x7] %vm580_vm15, %v575_v33  ;;  %588 = vst.msk [vmem:[#allocation3 + $0x19] sm:$0x7] %vm580_vm15, %v575_v33  ;;  %v571_v34 = vpop.permute.xlu0 %570 }
 0x29e   : > { %582 = vst.msk [vmem:[#allocation2 + $0x9] sm:$0x7] %vm580_vm15, %v571_v34  ;;  %586 = vst.msk [vmem:[#allocation3 + $0x9] sm:$0x7] %vm580_vm15, %v571_v34 }
 0x29f PF: > { %s589_s28 = sadd.s32 4, %s3343_s23 }
 0x2a0   : > { %p590_p8 = scmp.ge.s32.totalorder %s589_s28, 0  ;;  %p591_p9 = scmp.lt.s32.totalorder %s589_s28, 8 }
 0x2a2   : > { %p592_p10 = pnand %p591_p9, %p590_p8 }
 0x2a3   : > { %s2302_s30 = scalar_lea.vmem (!%p592_p10), %s3355_s29, %s3343_s23  ;;  %vm622_vm0 = vcmask (!%p592_p10), 1041409   ;;  %vm625_vm1 = vcmask (!%p592_p10), 1042434   ;;  %s3229_s23 = smov (!%p592_p10), 51   ;;  %vm651_vm2 = vcmask (!%p592_p10), 477592  }
 0x2a4   : > { %595 = sbr.rel (%p592_p10) target bundleno = 802 (0x322), region = 60  ;;  %v2400_v35 = vld [vmem:[%s2302_s30 + $0x34] sm:$0x1] (!%p592_p10)  ;;  %v2401_v36 = vld [vmem:[%s2302_s30 + $0x3c] sm:$0x1] (!%p592_p10) }
 0x2a5   : > { %v2402_v37 = vld [vmem:[%s2302_s30 + $0x44] sm:$0x1] (!%p592_p10)  ;;  %v631_v38 = vrot.slane (!%p592_p10), %v2401_v36, 7  ;;  %v2395_v41 = vld [vmem:[%s2302_s30 + $0xc] sm:$0x1] (!%p592_p10) }
 0x2a6   : > { %v633_v39 = vrot.slane (!%p592_p10), %v2402_v37, 6  ;;  %v2394_v40 = vld [vmem:[%s2302_s30 + $0x4] sm:$0x1] (!%p592_p10)  ;;  %v2396_v42 = vld [vmem:[%s2302_s30 + $0x14] sm:$0x1] (!%p592_p10)  ;;  %v621_v43 = vrot.slane (!%p592_p10), %v2395_v41, 7 }
 0x2a7   : > { %v2403_v44 = vld [vmem:[%s2302_s30 + $0x4c] sm:$0x1] (!%p592_p10)  ;;  %v632_v45 = vsel (!%p592_p10), %vm622_vm0, %v631_v38, %v2400_v35  ;;  %v624_v46 = vrot.slane (!%p592_p10), %v2396_v42, 6  ;;  %v2404_v47 = vld [vmem:[%s2302_s30 + $0x54] sm:$0x1] (!%p592_p10) }
 0x2a8   : > { %v2405_v48 = vld [vmem:[%s2302_s30 + $0x5c] sm:$0x1] (!%p592_p10)  ;;  %v634_v49 = vsel (!%p592_p10), %vm625_vm1, %v633_v39, %v632_v45  ;;  %v623_v50 = vsel (!%p592_p10), %vm622_vm0, %v621_v43, %v2394_v40  ;;  %v635_v51 = vrot.slane (!%p592_p10), %v2404_v47, 7  ;;  %v2398_v54 = vld [vmem:[%s2302_s30 + $0x24] sm:$0x1] (!%p592_p10) }
 0x2a9   : > { %v637_v52 = vrot.slane (!%p592_p10), %v2405_v48, 6  ;;  %v2397_v53 = vld [vmem:[%s2302_s30 + $0x1c] sm:$0x1] (!%p592_p10)  ;;  %643 = vrot.lane.b32.xlu1 (!%p592_p10), %v634_v49, %s3229_s23  ;;  %v626_v55 = vsel (!%p592_p10), %vm625_vm1, %v624_v46, %v623_v50  ;;  %v2399_v56 = vld [vmem:[%s2302_s30 + $0x2c] sm:$0x1] (!%p592_p10)  ;;  %v627_v57 = vrot.slane (!%p592_p10), %v2398_v54, 7 }
 0x2aa   : > { %639 = vrot.lane.b32.xlu0 (!%p592_p10), %v626_v55, %s3229_s23  ;;  %v636_v58 = vsel (!%p592_p10), %vm622_vm0, %v635_v51, %v2403_v44  ;;  %v629_v59 = vrot.slane (!%p592_p10), %v2399_v56, 6 }
 0x2ab   : > { %v638_v60 = vsel %vm625_vm1, %v637_v52, %v636_v58  ;;  %v628_v61 = vsel %vm622_vm0, %v627_v57, %v2397_v53 }
 0x2ac   : > { %v630_v62 = vsel %vm625_vm1, %v629_v59, %v628_v61 }
 0x2ad   : > { %645 = vrot.lane.b32.xlu1 %v638_v60, %s3229_s23 }
 0x2ae   : > { %641 = vrot.lane.b32.xlu0 %v630_v62, %s3229_s23 }
 0x31b   : > { %v644_v63 = vpop.permute.xlu1 %643 }
 0x31c   : > { %654 = vst.msk [vmem:[#allocation2 + $0x11] sm:$0x7] %vm651_vm2, %v644_v63  ;;  %v640_v1 = vpop.permute.xlu0 %639 }
 0x31d   : > { %652 = vst.msk [vmem:[#allocation2 + $0x1] sm:$0x7] %vm651_vm2, %v640_v1 }
 0x31f   : > { %v646_v2 = vpop.permute.xlu1 %645 }
 0x320   : > { %655 = vst.msk [vmem:[#allocation2 + $0x19] sm:$0x7] %vm651_vm2, %v646_v2  ;;  %v642_v3 = vpop.permute.xlu0 %641 }
 0x321   : > { %653 = vst.msk [vmem:[#allocation2 + $0x9] sm:$0x7] %vm651_vm2, %v642_v3 }
 0x322 PF: > { %v679_v7 = vld [vmem:[#allocation2 + $0x22] sm:$0x1]  ;;  %v680_v8 = vld [vmem:[#allocation2 + $0x2a] sm:$0x1]  ;;  %v681_v9 = vld [vmem:[#allocation2 + $0x32] sm:$0x1] }
 0x323   : > { %v677_v5 = vld [vmem:[#allocation2 + $0x12] sm:$0x1]  ;;  %v682_v10 = vld [vmem:[#allocation2 + $0x3a] sm:$0x1]  ;;  %vm692_vm3 = vcmask 1041409   ;;  %vm695_vm4 = vcmask 1042434  }
 0x324   : > { %v675_v11 = vld [vmem:[#allocation2 + $0x2] sm:$0x1]  ;;  %vm698_vm5 = vcmask 1043459   ;;  %vm701_vm6 = vcmask 1044484   ;;  %vm704_vm7 = vcmask 1045509   ;;  %vm707_vm8 = vcmask 1046534  }
 0x325   : > { %vm710_vm9 = vcmask 1047559   ;;  %v788_v13 = vrot.slane %v677_v5, 6  ;;  %v792_v15 = vrot.slane %v679_v7, 4  ;;  %v794_v16 = vrot.slane %v680_v8, 3  ;;  %v941_v19 = vld [vmem:[#allocation3 + $0x2] sm:$0x1] }
 0x326   : > { %v796_v17 = vrot.slane %v681_v9, 2  ;;  %v798_v18 = vrot.slane %v682_v10, 1  ;;  %v942_v20 = vld [vmem:[#allocation3 + $0xa] sm:$0x1]  ;;  %v943_v22 = vld [vmem:[#allocation3 + $0x12] sm:$0x1] }
 0x327   : > { %v678_v6 = vld [vmem:[#allocation2 + $0x1a] sm:$0x1]  ;;  %v945_v24 = vld [vmem:[#allocation3 + $0x22] sm:$0x1]  ;;  %v946_v26 = vld [vmem:[#allocation3 + $0x2a] sm:$0x1] }
 0x328   : > { %v676_v4 = vld [vmem:[#allocation2 + $0xa] sm:$0x1]  ;;  %v790_v14 = vrot.slane %v678_v6, 5  ;;  %v944_v23 = vld [vmem:[#allocation3 + $0x1a] sm:$0x1]  ;;  %v1045_v30 = vrot.slane %v942_v20, 7 }
 0x329   : > { %v786_v12 = vrot.slane %v676_v4, 7  ;;  %v947_v27 = vld [vmem:[#allocation3 + $0x32] sm:$0x1]  ;;  %v948_v28 = vld [vmem:[#allocation3 + $0x3a] sm:$0x1]  ;;  %v1047_v31 = vrot.slane %v943_v22, 6 }
 0x32a   : > { %v1049_v32 = vrot.slane %v944_v23, 5  ;;  %v667_v33 = vld [vmem:[#allocation2 + $0x1] sm:$0x1]  ;;  %v1051_v35 = vrot.slane %v945_v24, 4  ;;  %v1053_v36 = vrot.slane %v946_v26, 3  ;;  %v1055_v37 = vrot.slane %v947_v27, 2 }
 0x32b   : > { %v787_v21 = vsel %vm692_vm3, %v786_v12, %v675_v11  ;;  %v668_v38 = vld [vmem:[#allocation2 + $0x9] sm:$0x1]  ;;  %v1046_v40 = vsel %vm692_vm3, %v1045_v30, %v941_v19  ;;  %v1057_v41 = vrot.slane %v948_v28, 1  ;;  %v669_v42 = vld [vmem:[#allocation2 + $0x11] sm:$0x1]  ;;  %s3230_s29 = smov 20  }
 0x32c   : > { %v789_v25 = vsel %vm695_vm4, %v788_v13, %v787_v21  ;;  %v670_v43 = vld [vmem:[#allocation2 + $0x19] sm:$0x1]  ;;  %v745_v44 = vrot.slane %v668_v38, 7  ;;  %v1048_v46 = vsel %vm695_vm4, %v1047_v31, %v1046_v40  ;;  %v671_v47 = vld [vmem:[#allocation2 + $0x21] sm:$0x1]  ;;  %v747_v54 = vrot.slane %v669_v42, 6 }
 0x32d   : > { %v791_v29 = vsel %vm698_vm5, %v790_v14, %v789_v25  ;;  %v672_v48 = vld [vmem:[#allocation2 + $0x29] sm:$0x1]  ;;  %v673_v49 = vld [vmem:[#allocation2 + $0x31] sm:$0x1]  ;;  %v1050_v51 = vsel %vm698_vm5, %v1049_v32, %v1048_v46  ;;  %v674_v52 = vld [vmem:[#allocation2 + $0x39] sm:$0x1] }
 0x32e   : > { %v793_v34 = vsel %vm701_vm6, %v792_v15, %v791_v29  ;;  %v746_v53 = vsel %vm692_vm3, %v745_v44, %v667_v33  ;;  %v1052_v55 = vsel %vm701_vm6, %v1051_v35, %v1050_v51  ;;  %v749_v56 = vrot.slane %v670_v43, 5  ;;  %v933_v59 = vld [vmem:[#allocation3 + $0x1] sm:$0x1]  ;;  %v934_v60 = vld [vmem:[#allocation3 + $0x9] sm:$0x1]  ;;  %s3231_s5 = smov 19  }
 0x32f   : > { %v795_v39 = vsel %vm704_vm7, %v794_v16, %v793_v34  ;;  %v751_v57 = vrot.slane %v671_v47, 4  ;;  %v753_v58 = vrot.slane %v672_v48, 3  ;;  %v1054_v61 = vsel %vm704_vm7, %v1053_v36, %v1052_v55  ;;  %v935_v2 = vld [vmem:[#allocation3 + $0x11] sm:$0x1]  ;;  %v936_v3 = vld [vmem:[#allocation3 + $0x19] sm:$0x1] }
 0x330   : > { %v797_v45 = vsel %vm707_vm8, %v796_v17, %v795_v39  ;;  %v748_v62 = vsel %vm695_vm4, %v747_v54, %v746_v53  ;;  %v755_v63 = vrot.slane %v673_v49, 2  ;;  %v757_v1 = vrot.slane %v674_v52, 1  ;;  %v937_v6 = vld [vmem:[#allocation3 + $0x21] sm:$0x1]  ;;  %v938_v7 = vld [vmem:[#allocation3 + $0x29] sm:$0x1] }
 0x331   : > { %v3436_v50 = vsel %vm710_vm9, %v798_v18, %v797_v45  ;;  %v1056_v4 = vsel %vm707_vm8, %v1055_v37, %v1054_v61  ;;  %v750_v5 = vsel %vm698_vm5, %v749_v56, %v748_v62  ;;  %v939_v8 = vld [vmem:[#allocation3 + $0x31] sm:$0x1]  ;;  %v1004_v11 = vrot.slane %v934_v60, 7  ;;  %v940_v15 = vld [vmem:[#allocation3 + $0x39] sm:$0x1]  ;;  %s3232_s6 = smov 127  }
 0x332   : > { %v3446_v9 = vsel %vm710_vm9, %v1057_v41, %v1056_v4  ;;  %v752_v10 = vsel %vm701_vm6, %v751_v57, %v750_v5  ;;  %v1006_v12 = vrot.slane %v935_v2, 6  ;;  %v1008_v16 = vrot.slane %v936_v3, 5  ;;  %v659_v22 = vld [vmem:[#allocation2] sm:$0x1]  ;;  %v660_v23 = vld [vmem:[#allocation2 + $0x8] sm:$0x1] }
 0x333   : > { %v3451_v13 = vpack.i.bf16 %v3446_v9, %v3436_v50  ;;  %v754_v14 = vsel %vm704_vm7, %v753_v58, %v752_v10  ;;  %v1010_v17 = vrot.slane %v937_v6, 4  ;;  %v1005_v19 = vsel %vm692_vm3, %v1004_v11, %v933_v59  ;;  %v661_v25 = vld [vmem:[#allocation2 + $0x10] sm:$0x1]  ;;  %v662_v26 = vld [vmem:[#allocation2 + $0x18] sm:$0x1]  ;;  %s3233_s7 = smov 10  }
 0x334   : > { %v756_v18 = vsel %vm707_vm8, %v755_v63, %v754_v14  ;;  %v1012_v20 = vrot.slane %v938_v7, 3  ;;  %v1014_v21 = vrot.slane %v939_v8, 2  ;;  %v1007_v24 = vsel %vm695_vm4, %v1006_v12, %v1005_v19  ;;  %v663_v27 = vld [vmem:[#allocation2 + $0x20] sm:$0x1]  ;;  %v664_v30 = vld [vmem:[#allocation2 + $0x28] sm:$0x1] }
 0x335   : > { %2727 = vrot.lane.b32.xlu1 %v3451_v13, %s3230_s29  ;;  %v1009_v28 = vsel %vm698_vm5, %v1008_v16, %v1007_v24  ;;  %v1016_v29 = vrot.slane %v940_v15, 1  ;;  %v665_v31 = vld [vmem:[#allocation2 + $0x30] sm:$0x1]  ;;  %v3461_v32 = vsel %vm710_vm9, %v757_v1, %v756_v18  ;;  %v691_v34 = vrot.slane %v660_v23, 7  ;;  %v925_v35 = vld [vmem:[#allocation3] sm:$0x1] }
 0x336   : > { %v1011_v33 = vsel %vm701_vm6, %v1010_v17, %v1009_v28  ;;  %v926_v36 = vld [vmem:[#allocation3 + $0x8] sm:$0x1]  ;;  %v927_v37 = vld [vmem:[#allocation3 + $0x10] sm:$0x1]  ;;  %v694_v39 = vrot.slane %v661_v25, 6  ;;  %v697_v40 = vrot.slane %v662_v26, 5 }
 0x337   : > { %v1013_v38 = vsel %vm704_vm7, %v1012_v20, %v1011_v33  ;;  %v700_v41 = vrot.slane %v663_v27, 4  ;;  %v928_v42 = vld [vmem:[#allocation3 + $0x18] sm:$0x1]  ;;  %v693_v44 = vsel %vm692_vm3, %v691_v34, %v659_v22  ;;  %v703_v45 = vrot.slane %v664_v30, 3  ;;  %v929_v46 = vld [vmem:[#allocation3 + $0x20] sm:$0x1] }
 0x338   : > { %v1015_v43 = vsel %vm707_vm8, %v1014_v21, %v1013_v38  ;;  %v930_v47 = vld [vmem:[#allocation3 + $0x28] sm:$0x1]  ;;  %v696_v49 = vsel %vm695_vm4, %v694_v39, %v693_v44  ;;  %v706_v51 = vrot.slane %v665_v31, 2  ;;  %v931_v52 = vld [vmem:[#allocation3 + $0x30] sm:$0x1]  ;;  %v957_v53 = vrot.slane %v926_v36, 7 }
 0x339   : > { %2732 = vrot.lane.b32.xlu1 %v3451_v13, %s3231_s5  ;;  %v3470_v48 = vsel %vm710_vm9, %v1016_v29, %v1015_v43  ;;  %v666_v55 = vld [vmem:[#allocation2 + $0x38] sm:$0x1]  ;;  %v699_v56 = vsel %vm698_vm5, %v697_v40, %v696_v49  ;;  %v959_v58 = vrot.slane %v927_v37, 6  ;;  %v961_v59 = vrot.slane %v928_v42, 5  ;;  %v1203_v11 = vld [vmem:[#allocation2 + $0xa] sm:$0x1] }
 0x33a   : > { %v3475_v54 = vpack.i.bf16 %v3470_v48, %v3461_v32  ;;  %v932_v57 = vld [vmem:[#allocation3 + $0x38] sm:$0x1]  ;;  %v702_v60 = vsel %vm701_vm6, %v700_v41, %v699_v56  ;;  %v958_v61 = vsel %vm692_vm3, %v957_v53, %v925_v35  ;;  %v963_v62 = vrot.slane %v929_v46, 4  ;;  %s3234_s8 = smov 21   ;;  %s3235_s10 = smov 1  }
 0x33b   : > { %v965_v63 = vrot.slane %v930_v47, 3  ;;  %v705_v1 = vsel %vm704_vm7, %v703_v45, %v702_v60  ;;  %v960_v2 = vsel %vm695_vm4, %v959_v58, %v958_v61  ;;  %v967_v3 = vrot.slane %v931_v52, 2  ;;  %v1461_v14 = vld [vmem:[#allocation3 + $0xa] sm:$0x1]  ;;  %v1204_v17 = vld [vmem:[#allocation2 + $0x12] sm:$0x1] }
 0x33c   : > { %2717 = vrot.lane.b32.xlu0 %v3475_v54, %s3232_s6  ;;  %v709_v4 = vrot.slane %v666_v55, 1  ;;  %v962_v5 = vsel %vm698_vm5, %v961_v59, %v960_v2  ;;  %v969_v6 = vrot.slane %v932_v57, 1  ;;  %v708_v7 = vsel %vm707_vm8, %v706_v51, %v705_v1  ;;  %v1202_v19 = vld [vmem:[#allocation2 + $0x2] sm:$0x1]  ;;  %v1462_v20 = vld [vmem:[#allocation3 + $0x12] sm:$0x1] }
 0x33d   : > { %2742 = vrot.lane.b32.xlu1 %v3451_v13, %s3233_s7  ;;  %v964_v8 = vsel %vm701_vm6, %v963_v62, %v962_v5  ;;  %v1273_v18 = vrot.slane %v1203_v11, 7  ;;  %v1531_v21 = vrot.slane %v1461_v14, 7  ;;  %s3236_s11 = smov 11   ;;  %v1205_v23 = vld [vmem:[#allocation2 + $0x1a] sm:$0x1]  ;;  %v1275_v26 = vrot.slane %v1204_v17, 6 }
 0x33e   : > { %v966_v10 = vsel %vm704_vm7, %v965_v63, %v964_v8  ;;  %v3496_v15 = vsel %vm710_vm9, %v709_v4, %v708_v7  ;;  %v1460_v24 = vld [vmem:[#allocation3 + $0x2] sm:$0x1]  ;;  %v1211_v25 = vld [vmem:[#allocation2 + $0xb] sm:$0x1]  ;;  %v1463_v28 = vld [vmem:[#allocation3 + $0x1a] sm:$0x1] }
 0x33f   : > { %v968_v12 = vsel %vm707_vm8, %v967_v3, %v966_v10  ;;  %v1274_v27 = vsel %vm692_vm3, %v1273_v18, %v1202_v19  ;;  %v1533_v29 = vrot.slane %v1462_v20, 6  ;;  %v1206_v30 = vld [vmem:[#allocation2 + $0x22] sm:$0x1]  ;;  %v1277_v31 = vrot.slane %v1205_v23, 5  ;;  %v1212_v34 = vld [vmem:[#allocation2 + $0x13] sm:$0x1] }
 0x340   : > { %2722 = vrot.lane.b32.xlu0 %v3451_v13, %s3234_s8  ;;  %v3499_v16 = vsel %vm710_vm9, %v969_v6, %v968_v12  ;;  %v1532_v33 = vsel %vm692_vm3, %v1531_v21, %v1460_v24  ;;  %v1314_v35 = vrot.slane %v1211_v25, 7  ;;  %s3237_s12 = smov 9   ;;  %s3238_s13 = smov 126   ;;  %v1210_v36 = vld [vmem:[#allocation2 + $0x3] sm:$0x1]  ;;  %v1276_v39 = vsel %vm695_vm4, %v1275_v26, %v1274_v27 }
 0x341   : > { %2752 = vrot.lane.b32.xlu1 %v3451_v13, %s3235_s10  ;;  %v3507_v22 = vpack.i.bf16 %v3499_v16, %v3496_v15  ;;  %v1469_v37 = vld [vmem:[#allocation3 + $0xb] sm:$0x1]  ;;  %v1470_v38 = vld [vmem:[#allocation3 + $0x13] sm:$0x1]  ;;  %v1464_v40 = vld [vmem:[#allocation3 + $0x22] sm:$0x1]  ;;  %v1534_v43 = vsel %vm695_vm4, %v1533_v29, %v1532_v33  ;;  %v1278_v53 = vsel %vm698_vm5, %v1277_v31, %v1276_v39 }
 0x342   : > { %v1535_v41 = vrot.slane %v1463_v28, 5  ;;  %v1213_v42 = vld [vmem:[#allocation2 + $0x1b] sm:$0x1]  ;;  %v1316_v44 = vrot.slane %v1212_v34, 6  ;;  %v1468_v45 = vld [vmem:[#allocation3 + $0x3] sm:$0x1] }
 0x343   : > { %v1471_v46 = vld [vmem:[#allocation3 + $0x1b] sm:$0x1]  ;;  %v1279_v47 = vrot.slane %v1206_v30, 4  ;;  %v1572_v49 = vrot.slane %v1469_v37, 7  ;;  %v1574_v51 = vrot.slane %v1470_v38, 6  ;;  %s3239_s14 = smov 117  }
 0x344   : > { %2737 = vrot.lane.b32.xlu0 %v3451_v13, %s3236_s11  ;;  %v1207_v52 = vld [vmem:[#allocation2 + $0x2a] sm:$0x1]  ;;  %v1537_v56 = vrot.slane %v1464_v40, 4  ;;  %v1536_v57 = vsel %vm698_vm5, %v1535_v41, %v1534_v43  ;;  %v1214_v58 = vld [vmem:[#allocation2 + $0x23] sm:$0x1]  ;;  %v1318_v59 = vrot.slane %v1213_v42, 5 }
 0x345   : > { %1073 = vrot.lane.b32.xlu1 %v3446_v9, %s3232_s6  ;;  %v1465_v55 = vld [vmem:[#allocation3 + $0x2a] sm:$0x1]  ;;  %v1472_v60 = vld [vmem:[#allocation3 + $0x23] sm:$0x1]  ;;  %v1573_v61 = vsel %vm692_vm3, %v1572_v49, %v1468_v45  ;;  %v1576_v62 = vrot.slane %v1471_v46, 5  ;;  %v1281_v3 = vrot.slane %v1207_v52, 3  ;;  %v1280_v6 = vsel %vm701_vm6, %v1279_v47, %v1278_v53 }
 0x346   : > { %v1575_v1 = vsel %vm695_vm4, %v1574_v51, %v1573_v61  ;;  %v1208_v2 = vld [vmem:[#allocation2 + $0x32] sm:$0x1]  ;;  %v1539_v5 = vrot.slane %v1465_v55, 3  ;;  %s3240_s15 = smov 108   ;;  %v1538_v7 = vsel %vm701_vm6, %v1537_v56, %v1536_v57  ;;  %v1215_v8 = vld [vmem:[#allocation2 + $0x2b] sm:$0x1] }
 0x347   : > { %v1466_v4 = vld [vmem:[#allocation3 + $0x32] sm:$0x1]  ;;  %v1320_v10 = vrot.slane %v1214_v58, 4  ;;  %v1473_v11 = vld [vmem:[#allocation3 + $0x2b] sm:$0x1]  ;;  %v1578_v12 = vrot.slane %v1472_v60, 4  ;;  %v1577_v17 = vsel %vm698_vm5, %v1576_v62, %v1575_v1  ;;  %v1282_v23 = vsel %vm704_vm7, %v1281_v3, %v1280_v6 }
 0x348   : > { %2747 = vrot.lane.b32.xlu0 %v3451_v13, %s3237_s12  ;;  %v1315_v13 = vsel %vm692_vm3, %v1314_v35, %v1210_v36  ;;  %v1209_v18 = vld [vmem:[#allocation2 + $0x3a] sm:$0x1]  ;;  %v1283_v19 = vrot.slane %v1208_v2, 2  ;;  %v1541_v21 = vrot.slane %v1466_v4, 2  ;;  %v1540_v24 = vsel %vm704_vm7, %v1539_v5, %v1538_v7  ;;  %v1216_v25 = vld [vmem:[#allocation2 + $0x33] sm:$0x1] }
 0x349   : > { %2762 = vrot.lane.b32.xlu1 %v3507_v22, %s3238_s13  ;;  %v1317_v63 = vsel %vm695_vm4, %v1316_v44, %v1315_v13  ;;  %v1467_v20 = vld [vmem:[#allocation3 + $0x3a] sm:$0x1]  ;;  %v1322_v26 = vrot.slane %v1215_v8, 3  ;;  %v1474_v27 = vld [vmem:[#allocation3 + $0x33] sm:$0x1]  ;;  %v1580_v28 = vrot.slane %v1473_v11, 3  ;;  %v1579_v30 = vsel %vm701_vm6, %v1578_v12, %v1577_v17 }
 0x34a   : > { %v1319_v14 = vsel %vm698_vm5, %v1318_v59, %v1317_v63  ;;  %s3241_s16 = smov 118   ;;  %s3242_s17 = smov 106   ;;  %v1285_v31 = vrot.slane %v1209_v18, 1  ;;  %v1543_v33 = vrot.slane %v1467_v20, 1  ;;  %v1284_v34 = vsel %vm707_vm8, %v1283_v19, %v1282_v23  ;;  %v1217_v36 = vld [vmem:[#allocation2 + $0x3b] sm:$0x1] }
 0x34b   : > { %v1321_v29 = vsel %vm701_vm6, %v1320_v10, %v1319_v14  ;;  %v1542_v35 = vsel %vm707_vm8, %v1541_v21, %v1540_v24  ;;  %v1324_v37 = vrot.slane %v1216_v25, 2  ;;  %v1475_v38 = vld [vmem:[#allocation3 + $0x3b] sm:$0x1]  ;;  %v1582_v39 = vrot.slane %v1474_v27, 2  ;;  %s3243_s18 = smov 116   ;;  %s3245_s24 = smov 107  }
 0x34c   : > { %814 = vrot.lane.b32.xlu0 %v3436_v50, %s3232_s6  ;;  %v1323_v40 = vsel %vm704_vm7, %v1322_v26, %v1321_v29  ;;  %v1581_v41 = vsel %vm704_vm7, %v1580_v28, %v1579_v30  ;;  %v3552_v42 = vsel %vm710_vm9, %v1285_v31, %v1284_v34  ;;  %v3555_v43 = vsel %vm710_vm9, %v1543_v33, %v1542_v35  ;;  %v1195_v49 = vld [vmem:[#allocation2 + $0x9] sm:$0x1]  ;;  %v1196_v56 = vld [vmem:[#allocation2 + $0x11] sm:$0x1]  ;;  %v1194_v60 = vld [vmem:[#allocation2 + $0x1] sm:$0x1] }
 0x34d   : > { %2772 = vrot.lane.b32.xlu1 %v3507_v22, %s3239_s14  ;;  %v1326_v44 = vrot.slane %v1217_v36, 1  ;;  %v1584_v45 = vrot.slane %v1475_v38, 1  ;;  %v3244_v46 = vmov 0.0|0.0   ;;  %v1325_v47 = vsel %vm707_vm8, %v1324_v37, %v1323_v40  ;;  %v1453_v51 = vld [vmem:[#allocation3 + $0x9] sm:$0x1] }
 0x34e   : > { %2416 = vmatprep.subr.bf16.mxu0 %v3244_v46  ;;  %2455 = vmatprep.subr.bf16.mxu1 %v3244_v46  ;;  %v1583_v13 = vsel %vm707_vm8, %v1582_v39, %v1581_v41  ;;  %v3567_v52 = vpack.i.bf16 %v3555_v43, %v3552_v42  ;;  %v1226_v57 = vrot.slane %v1195_v49, 7  ;;  %v1454_v58 = vld [vmem:[#allocation3 + $0x11] sm:$0x1]  ;;  %v1484_v59 = vrot.slane %v1453_v51, 7  ;;  %v1452_v61 = vld [vmem:[#allocation3 + $0x1] sm:$0x1] }
 0x34f   : > { %v3570_v53 = vsel %vm710_vm9, %v1326_v44, %v1325_v47  ;;  %v3573_v55 = vsel %vm710_vm9, %v1584_v45, %v1583_v13  ;;  %v1197_v62 = vld [vmem:[#allocation2 + $0x19] sm:$0x1]  ;;  %v1228_v63 = vrot.slane %v1196_v56, 6  ;;  %v1486_v2 = vrot.slane %v1454_v58, 6  ;;  %v1198_v5 = vld [vmem:[#allocation2 + $0x21] sm:$0x1] }
 0x350   : > { %2757 = vrot.lane.b32.xlu0 %v3507_v22, %s3232_s6  ;;  %v1455_v1 = vld [vmem:[#allocation3 + $0x19] sm:$0x1]  ;;  %v1227_v3 = vsel %vm692_vm3, %v1226_v57, %v1194_v60  ;;  %v1485_v4 = vsel %vm692_vm3, %v1484_v59, %v1452_v61  ;;  %v1230_v6 = vrot.slane %v1197_v62, 5  ;;  %v1456_v7 = vld [vmem:[#allocation3 + $0x21] sm:$0x1]  ;;  %v1232_v14 = vrot.slane %v1198_v5, 4 }
 0x351   : > { %2782 = vrot.lane.b32.xlu1 %v3507_v22, %s3240_s15  ;;  %v1488_v8 = vrot.slane %v1455_v1, 5  ;;  %v1229_v10 = vsel %vm695_vm4, %v1228_v63, %v1227_v3  ;;  %v1487_v11 = vsel %vm695_vm4, %v1486_v2, %v1485_v4  ;;  %v1199_v12 = vld [vmem:[#allocation2 + $0x29] sm:$0x1]  ;;  %v1490_v18 = vrot.slane %v1456_v7, 4  ;;  %v1200_v21 = vld [vmem:[#allocation2 + $0x31] sm:$0x1] }
 0x352   : > { %v1457_v17 = vld [vmem:[#allocation3 + $0x29] sm:$0x1]  ;;  %v1231_v19 = vsel %vm698_vm5, %v1230_v6, %v1229_v10  ;;  %v1234_v23 = vrot.slane %v1199_v12, 3  ;;  %v1458_v24 = vld [vmem:[#allocation3 + $0x31] sm:$0x1]  ;;  %v1236_v29 = vrot.slane %v1200_v21, 2 }
 0x353   : > { %v1489_v20 = vsel %vm698_vm5, %v1488_v8, %v1487_v11  ;;  %v1492_v25 = vrot.slane %v1457_v17, 3  ;;  %v1233_v26 = vsel %vm701_vm6, %v1232_v14, %v1231_v19  ;;  %v1201_v28 = vld [vmem:[#allocation2 + $0x39] sm:$0x1]  ;;  %v1494_v31 = vrot.slane %v1458_v24, 2  ;;  %v1729_v51 = vld [vmem:[#allocation2 + $0xb] sm:$0x1] }
 0x354   : > { %2767 = vrot.lane.b32.xlu0 %v3507_v22, %s3241_s16  ;;  %v1491_v27 = vsel %vm701_vm6, %v1490_v18, %v1489_v20  ;;  %v1459_v30 = vld [vmem:[#allocation3 + $0x39] sm:$0x1]  ;;  %v1238_v34 = vrot.slane %v1201_v28, 1  ;;  %v1799_v60 = vrot.slane %v1729_v51, 7  ;;  %v1728_v1 = vld [vmem:[#allocation2 + $0x3] sm:$0x1] }
 0x355   : > { %2792 = vrot.lane.b32.xlu1 %v3507_v22, %s3242_s17  ;;  %v1493_v33 = vsel %vm704_vm7, %v1492_v25, %v1491_v27  ;;  %v1496_v35 = vrot.slane %v1459_v30, 1  ;;  %v1730_v2 = vld [vmem:[#allocation2 + $0x13] sm:$0x1]  ;;  %v1987_v3 = vld [vmem:[#allocation3 + $0xb] sm:$0x1]  ;;  %vm849_vm10 = vcmask 719872  }
 0x356   : > { %v1495_v37 = vsel %vm707_vm8, %v1494_v31, %v1493_v33  ;;  %v1800_v10 = vsel %vm692_vm3, %v1799_v60, %v1728_v1  ;;  %v1801_v11 = vrot.slane %v1730_v2, 6  ;;  %v2057_v12 = vrot.slane %v1987_v3, 7  ;;  %v1737_v14 = vld [vmem:[#allocation2 + $0xc] sm:$0x1]  ;;  %v1988_v24 = vld [vmem:[#allocation3 + $0x13] sm:$0x1] }
 0x357   : > { %v3607_v39 = vsel %vm710_vm9, %v1496_v35, %v1495_v37  ;;  %v1995_v17 = vld [vmem:[#allocation3 + $0xc] sm:$0x1]  ;;  %v1986_v25 = vld [vmem:[#allocation3 + $0x3] sm:$0x1]  ;;  %v1738_v28 = vld [vmem:[#allocation2 + $0x14] sm:$0x1] }
 0x358   : > { %2777 = vrot.lane.b32.xlu0 %v3507_v22, %s3243_s18  ;;  %v1996_v30 = vld [vmem:[#allocation3 + $0x14] sm:$0x1]  ;;  %v2098_v31 = vrot.slane %v1995_v17, 7  ;;  %v1736_v37 = vld [vmem:[#allocation2 + $0x4] sm:$0x1]  ;;  %v2058_v60 = vsel %vm692_vm3, %v2057_v12, %v1986_v25  ;;  %vm1190_vm13 = vcmask 326656  }
 0x359   : > { %2802 = vrot.lane.b32.xlu1 %v3475_v54, %s3241_s16  ;;  %v1733_v3 = vld [vmem:[#allocation2 + $0x2b] sm:$0x1]  ;;  %v1740_v17 = vld [vmem:[#allocation2 + $0x24] sm:$0x1] }
 0x35c   : > { %2787 = vrot.lane.b32.xlu0 %v3507_v22, %s3245_s24  ;;  %v2826_v22 = vpack.i.bf16 %v3573_v55, %v3570_v53 }
 0x35d   : > { %2812 = vrot.lane.b32.xlu1 %v3475_v54, %s3243_s18 }
 0x360   : > { %2797 = vrot.lane.b32.xlu0 %v3475_v54, %s3238_s13 }
 0x361   : > { %2822 = vrot.lane.b32.xlu1 %v3567_v52, %s3232_s6 }
 0x364   : > { %2807 = vrot.lane.b32.xlu0 %v3475_v54, %s3239_s14 }
 0x365   : > { %2827 = vrot.lane.b32.xlu1 %v2826_v22, %s3234_s8 }
 0x368   : > { %2817 = vrot.lane.b32.xlu0 %v3475_v54, %s3240_s15  ;;  %v1235_v54 = vsel %vm704_vm7, %v1234_v23, %v1233_v26  ;;  %v1731_v23 = vld [vmem:[#allocation2 + $0x1b] sm:$0x1] }
 0x369   : > { %2837 = vrot.lane.b32.xlu1 %v2826_v22, %s3231_s5  ;;  %v1237_v36 = vsel %vm707_vm8, %v1236_v29, %v1235_v54  ;;  %v1840_v29 = vrot.slane %v1737_v14, 7  ;;  %v1803_v35 = vrot.slane %v1731_v23, 5  ;;  %v3674_v23 = vld [vmem:[%s4079_s2 + $0x8] sm:$0xff] }
 0x36a   : > { %v3604_v38 = vsel %vm710_vm9, %v1238_v34, %v1237_v36  ;;  %v1802_v34 = vsel %vm695_vm4, %v1801_v11, %v1800_v10  ;;  %v2059_v36 = vrot.slane %v1988_v24, 6  ;;  %v1990_v11 = vld [vmem:[#allocation3 + $0x23] sm:$0x1]  ;;  %v3676_v24 = vld [vmem:[#allocation2 + $0x33] sm:$0x1]  ;;  %2406 = vmatprep.mubr.msk.f32.mxu0 %vm849_vm10, %v3674_v23 }
 0x36b   : > { %v3614_v40 = vpack.i.bf16 %v3607_v39, %v3604_v38 }
 0x36c   : > { %2832 = vrot.lane.b32.xlu0 %v2826_v22, %s3230_s29  ;;  %v2060_v12 = vsel %vm695_vm4, %v2059_v36, %v2058_v60  ;;  %v1809_v60 = vrot.slane %v3676_v24, 2 }
 0x36d   : > { %2847 = vrot.lane.b32.xlu1 %v2826_v22, %s3233_s7 }
 0x370   : > { %2842 = vrot.lane.b32.xlu0 %v2826_v22, %s3236_s11 }
 0x371   : > { %2857 = vrot.lane.b32.xlu1 %v2826_v22, %s3235_s10 }
 0x374   : > { %2852 = vrot.lane.b32.xlu0 %v2826_v22, %s3237_s12 }
 0x375   : > { %1342 = vrot.lane.b32.xlu1 %v3570_v53, %s3232_s6 }
 0x378   : > { %1600 = vrot.lane.b32.xlu0 %v3573_v55, %s3232_s6 }
 0x379   : > { %2872 = vrot.lane.b32.xlu1 %v3614_v40, %s3241_s16 }
 0x37c   : > { %2862 = vrot.lane.b32.xlu0 %v3614_v40, %s3232_s6 }
 0x37d   : > { %2882 = vrot.lane.b32.xlu1 %v3614_v40, %s3243_s18 }
 0x380   : > { %2867 = vrot.lane.b32.xlu0 %v3614_v40, %s3238_s13 }
 0x381   : > { %2892 = vrot.lane.b32.xlu1 %v3614_v40, %s3245_s24 }
 0x384   : > { %2877 = vrot.lane.b32.xlu0 %v3614_v40, %s3239_s14 }
 0x388   : > { %2887 = vrot.lane.b32.xlu0 %v3614_v40, %s3240_s15 }
 0x3a7   : > { %v2728_v41 = vpop.permute.xlu1 %2727 }
 0x3a8   : > { %v2730_v61 = vunpack.i.h.bf16 %v2728_v41  ;;  %v2729_v22 = vunpack.i.l.bf16 %v2728_v41  ;;  %v1994_v41 = vld [vmem:[#allocation3 + $0x4] sm:$0x1] }
 0x3ab   : > { %v2733_v44 = vpop.permute.xlu1 %2732 }
 0x3ac   : > { %v2735_v6 = vunpack.i.h.bf16 %v2733_v44  ;;  %v2734_v18 = vunpack.i.l.bf16 %v2733_v44 }
 0x3ae   : > { %v3632_v45 = vpop.permute.xlu0 %2717 }
 0x3af   : > { %v3634_v47 = vpop.permute.xlu1 %2742  ;;  %v2720_v13 = vunpack.i.h.bf16 %v3632_v45  ;;  %v2719_v49 = vunpack.i.l.bf16 %v3632_v45 }
 0x3b0   : > { %v2744_v44 = vunpack.i.l.bf16 %v3634_v47 }
 0x3b1   : > { %v2901_v56 = vpack.i.bf16 %v2720_v13, %v3470_v48  ;;  %v2896_v57 = vpack.i.bf16 %v2719_v49, %v3461_v32 }
 0x3b2   : > { %v2723_v58 = vpop.permute.xlu0 %2722 }
 0x3b3   : > { %v3644_v59 = vpop.permute.xlu1 %2752  ;;  %v2725_v62 = vunpack.i.h.bf16 %v2723_v58  ;;  %v2724_v63 = vunpack.i.l.bf16 %v2723_v58  ;;  %2902 = vrot.lane.b32.xlu1 %v2901_v56, %s3245_s24  ;;  %2897 = vrot.lane.b32.xlu0 %v2896_v57, %s3245_s24  ;;  %v1732_v57 = vld [vmem:[#allocation2 + $0x23] sm:$0x1]  ;;  %v1989_v58 = vld [vmem:[#allocation3 + $0x1b] sm:$0x1] }
 0x3b4   : > { %v2754_v21 = vunpack.i.l.bf16 %v3644_v59  ;;  %v1805_v10 = vrot.slane %v1732_v57, 4  ;;  %v2061_v14 = vrot.slane %v1989_v58, 5  ;;  %v3695_v58 = vld [vmem:[%s4080_s3 + $0x8] sm:$0xff] }
 0x3b5   : > { %v2911_v4 = vpack.i.bf16 %v2730_v61, %v2725_v62  ;;  %v2906_v5 = vpack.i.bf16 %v2729_v22, %v2724_v63  ;;  %v1739_v61 = vld [vmem:[#allocation2 + $0x1c] sm:$0x1]  ;;  %v1842_v22 = vrot.slane %v1738_v28, 6  ;;  %v2100_v63 = vrot.slane %v1996_v30, 6  ;;  %2407 = vmatprep.mubr.msk.f32.mxu1 %vm849_vm10, %v3695_v58 }
 0x3b6   : > { %v2738_v7 = vpop.permute.xlu0 %2737  ;;  %v2936_v51 = vpack.i.bf16 %v3436_v50, %v2754_v21  ;;  %v1997_v62 = vld [vmem:[#allocation3 + $0x1c] sm:$0x1]  ;;  %v2099_v50 = vsel %vm692_vm3, %v2098_v31, %v1994_v41  ;;  %v1807_v28 = vrot.slane %v1733_v3, 3  ;;  %v2063_v30 = vrot.slane %v1990_v11, 4  ;;  %v1741_v31 = vld [vmem:[#allocation2 + $0x2c] sm:$0x1] }
 0x3b7   : > { %v3648_v8 = vpop.permute.xlu1 %1073  ;;  %v2740_v19 = vunpack.i.h.bf16 %v2738_v7  ;;  %v2739_v20 = vunpack.i.l.bf16 %v2738_v7  ;;  %2912 = vrot.lane.b32.xlu1 %v2911_v4, %s3245_s24  ;;  %2907 = vrot.lane.b32.xlu0 %v2906_v5, %s3245_s24  ;;  %v1841_v4 = vsel %vm692_vm3, %v1840_v29, %v1736_v37  ;;  %v1804_v7 = vsel %vm698_vm5, %v1803_v35, %v1802_v34  ;;  %v1991_v29 = vld [vmem:[#allocation3 + $0x2b] sm:$0x1] }
 0x3b8   : > { %v2102_v21 = vrot.slane %v1997_v62, 5  ;;  %v1843_v25 = vsel %vm695_vm4, %v1842_v22, %v1841_v4  ;;  %v1806_v35 = vsel %vm701_vm6, %v1805_v10, %v1804_v7  ;;  %v2062_v36 = vsel %vm698_vm5, %v2061_v14, %v2060_v12  ;;  %v1742_v4 = vld [vmem:[#allocation2 + $0x34] sm:$0x1] }
 0x3b9   : > { %v2921_v26 = vpack.i.bf16 %v2740_v19, %v2735_v6  ;;  %v2916_v27 = vpack.i.bf16 %v2739_v20, %v2734_v18  ;;  %v2745_v18 = vunpack.i.h.bf16 %v3634_v47  ;;  %v1844_v19 = vrot.slane %v1739_v61, 5  ;;  %v1998_v20 = vld [vmem:[#allocation3 + $0x24] sm:$0x1]  ;;  %v2000_v12 = vld [vmem:[#allocation3 + $0x34] sm:$0x1] }
 0x3ba   : > { %v2748_v54 = vpop.permute.xlu0 %2747  ;;  %v2755_v47 = vunpack.i.h.bf16 %v3644_v59  ;;  %v1846_v37 = vrot.slane %v1740_v17, 4  ;;  %v2104_v41 = vrot.slane %v1998_v20, 4  ;;  %v2065_v61 = vrot.slane %v1991_v29, 3  ;;  %v1993_v20 = vld [vmem:[#allocation3 + $0x3b] sm:$0x1] }
 0x3bb   : > { %v3654_v33 = vpop.permute.xlu1 %2762  ;;  %v2749_v56 = vunpack.i.l.bf16 %v2748_v54  ;;  %2922 = vrot.lane.b32.xlu1 %v2921_v26, %s3245_s24  ;;  %2917 = vrot.lane.b32.xlu0 %v2916_v27, %s3245_s24  ;;  %v2750_v1 = vunpack.i.h.bf16 %v2748_v54  ;;  %v2101_v26 = vsel %vm695_vm4, %v2100_v63, %v2099_v50  ;;  %v1845_v59 = vsel %vm698_vm5, %v1844_v19, %v1843_v25  ;;  %v1735_v19 = vld [vmem:[#allocation2 + $0x3b] sm:$0x1] }
 0x3bc   : > { %v2103_v57 = vsel %vm698_vm5, %v2102_v21, %v2101_v26  ;;  %v1848_v22 = vrot.slane %v1741_v31, 3  ;;  %v2941_v62 = vpack.i.bf16 %v3446_v9, %v2755_v47  ;;  %v2064_v3 = vsel %vm701_vm6, %v2063_v30, %v2062_v36 }
 0x3bd   : > { %v2926_v2 = vpack.i.bf16 %v2749_v56, %v2744_v44  ;;  %v2931_v27 = vpack.i.bf16 %v2750_v1, %v2745_v18  ;;  %v1999_v56 = vld [vmem:[#allocation3 + $0x2c] sm:$0x1]  ;;  %v1808_v10 = vsel %vm704_vm7, %v1807_v28, %v1806_v35  ;;  %v1847_v11 = vsel %vm701_vm6, %v1846_v37, %v1845_v59 }
 0x3be   : > { %v815_v5 = vpop.permute.xlu0 %814  ;;  %v2105_v14 = vsel %vm701_vm6, %v2104_v41, %v2103_v57  ;;  %v2106_v17 = vrot.slane %v1999_v56, 3  ;;  %v2765_v9 = vunpack.i.h.bf16 %v3654_v33  ;;  %v2066_v21 = vsel %vm704_vm7, %v2065_v61, %v2064_v3 }
 0x3bf   : > { %v3664_v6 = vpop.permute.xlu1 %2772  ;;  %2937 = vrot.lane.b32.xlu1 %v2936_v51, %s3245_s24  ;;  %2927 = vrot.lane.b32.xlu0 %v2926_v2, %s3245_s24  ;;  %v1992_v2 = vld [vmem:[#allocation3 + $0x33] sm:$0x1]  ;;  %v1850_v25 = vrot.slane %v1742_v4, 2  ;;  %v2108_v28 = vrot.slane %v2000_v12, 2  ;;  %v1810_v31 = vsel %vm707_vm8, %v1809_v60, %v1808_v10  ;;  %v2069_v35 = vrot.slane %v1993_v20, 1 }
 0x3c0   : > { %v2067_v24 = vrot.slane %v1992_v2, 2  ;;  %v2107_v36 = vsel %vm704_vm7, %v2106_v17, %v2105_v14  ;;  %v2775_v37 = vunpack.i.h.bf16 %v3664_v6  ;;  %v2774_v41 = vunpack.i.l.bf16 %v3664_v6 }
 0x3c1   : > { %v2109_v6 = vsel %vm707_vm8, %v2108_v28, %v2107_v36 }
 0x3c2   : > { %v2758_v54 = vpop.permute.xlu0 %2757  ;;  %v2068_v59 = vsel %vm707_vm8, %v2067_v24, %v2066_v21 }
 0x3c3   : > { %v3683_v34 = vpop.permute.xlu1 %2782  ;;  %v2760_v44 = vunpack.i.h.bf16 %v2758_v54  ;;  %v2759_v51 = vunpack.i.l.bf16 %v2758_v54  ;;  %2952 = vrot.lane.b32.xlu1 %v3567_v52, %s3238_s13  ;;  %2932 = vrot.lane.b32.xlu0 %v2931_v27, %s3245_s24  ;;  %v1849_v27 = vsel %vm704_vm7, %v1848_v22, %v1847_v11  ;;  %v1811_v54 = vrot.slane %v1735_v19, 1 }
 0x3c4   : > { %v1851_v56 = vsel %vm707_vm8, %v1850_v25, %v1849_v27  ;;  %v3744_v4 = vsel %vm710_vm9, %v2069_v35, %v2068_v59 }
 0x3c5   : > { %v2417_v63 = vpack.c.bf16 %v2759_v51, %v3496_v15  ;;  %v2456_v1 = vpack.c.bf16 %v2760_v44, %v3499_v16  ;;  %v2764_v15 = vunpack.i.l.bf16 %v3654_v33  ;;  %v1743_v33 = vld [vmem:[#allocation2 + $0x3c] sm:$0x1] }
 0x3c6   : > { %v2768_v50 = vpop.permute.xlu0 %2767  ;;  %v1852_v57 = vrot.slane %v1743_v33, 1 }
 0x3c7   : > { %v3704_v7 = vpop.permute.xlu1 %2792  ;;  %v2770_v16 = vunpack.i.h.bf16 %v2768_v50  ;;  %v2769_v18 = vunpack.i.l.bf16 %v2768_v50  ;;  %836 = vrot.lane.b32.xlu1 %v815_v5, %s3245_s24  ;;  %2942 = vrot.lane.b32.xlu0 %v2941_v62, %s3245_s24  ;;  %v2001_v5 = vld [vmem:[#allocation3 + $0x3c] sm:$0x1] }
 0x3c8   : > { %2418 = vmatpush1.bf16.msra.mxu0 %v2417_v63  ;;  %2457 = vmatpush1.bf16.msra.mxu1 %v2456_v1  ;;  %v2110_v60 = vrot.slane %v2001_v5, 1  ;;  %v2785_v63 = vunpack.i.h.bf16 %v3683_v34  ;;  %v2784_v1 = vunpack.i.l.bf16 %v3683_v34  ;;  %v3747_v50 = vsel %vm710_vm9, %v1852_v57, %v1851_v56 }
 0x3c9   : > { %v2459_v26 = vpack.c.bf16 %v2770_v16, %v2765_v9  ;;  %v2420_v47 = vpack.c.bf16 %v2769_v18, %v2764_v15  ;;  %2419 = vmatprep.subr.bf16.mxu0 %v3244_v46  ;;  %2458 = vmatprep.subr.bf16.mxu1 %v3244_v46  ;;  %v2795_v12 = vunpack.i.h.bf16 %v3704_v7  ;;  %v2794_v14 = vunpack.i.l.bf16 %v3704_v7 }
 0x3ca   : > { %v2778_v29 = vpop.permute.xlu0 %2777  ;;  %v3750_v10 = vsel %vm710_vm9, %v2110_v60, %v2109_v6  ;;  %v1721_v6 = vld [vmem:[#allocation2 + $0xa] sm:$0x1] }
 0x3cb   : > { %v3717_v30 = vpop.permute.xlu1 %2802  ;;  %v2780_v44 = vunpack.i.h.bf16 %v2778_v29  ;;  %v2779_v51 = vunpack.i.l.bf16 %v2778_v29  ;;  %1095 = vrot.lane.b32.xlu1 %v3648_v8, %s3245_s24  ;;  %2947 = vrot.lane.b32.xlu0 %v3614_v40, %s3242_s17  ;;  %v3735_v40 = vsel %vm710_vm9, %v1811_v54, %v1810_v31  ;;  %v3769_v18 = vpack.i.bf16 %v3750_v10, %v3747_v50 }
 0x3cc   : > { %2421 = vmatpush1.bf16.msra.mxu0 %v2420_v47  ;;  %2460 = vmatpush1.bf16.msra.mxu1 %v2459_v26  ;;  %v3764_v15 = vpack.i.bf16 %v3744_v4, %v3735_v40  ;;  %v2468_v7 = vpack.c.bf16 %v3470_v48, %v2795_v12  ;;  %v2805_v28 = vunpack.i.h.bf16 %v3717_v30  ;;  %v1720_v12 = vld [vmem:[#allocation2 + $0x2] sm:$0x1] }
 0x3cd   : > { %v2462_v61 = vpack.c.bf16 %v2780_v44, %v2775_v37  ;;  %v2423_v22 = vpack.c.bf16 %v2779_v51, %v2774_v41  ;;  %2422 = vmatprep.subr.bf16.mxu0 %v3244_v46  ;;  %2461 = vmatprep.subr.bf16.mxu1 %v3244_v46 }
 0x3ce   : > { %v2788_v8 = vpop.permute.xlu0 %2787 }
 0x3cf   : > { %v3732_v62 = vpop.permute.xlu1 %2812  ;;  %v2790_v2 = vunpack.i.h.bf16 %v2788_v8  ;;  %v2789_v3 = vunpack.i.l.bf16 %v2788_v8  ;;  %2962 = vrot.lane.b32.xlu1 %v3567_v52, %s3239_s14  ;;  %2957 = vrot.lane.b32.xlu0 %v3567_v52, %s3241_s16  ;;  %v1979_v8 = vld [vmem:[#allocation3 + $0xa] sm:$0x1] }
 0x3d0   : > { %2424 = vmatpush1.bf16.msra.mxu0 %v2423_v22  ;;  %2463 = vmatpush1.bf16.msra.mxu1 %v2462_v61  ;;  %v2815_v37 = vunpack.i.h.bf16 %v3732_v62  ;;  %v2814_v41 = vunpack.i.l.bf16 %v3732_v62 }
 0x3d1   : > { %v2465_v34 = vpack.c.bf16 %v2790_v2, %v2785_v63  ;;  %v2426_v11 = vpack.c.bf16 %v2789_v3, %v2784_v1  ;;  %2425 = vmatprep.subr.bf16.mxu0 %v3244_v46  ;;  %2464 = vmatprep.subr.bf16.mxu1 %v3244_v46  ;;  %v1722_v1 = vld [vmem:[#allocation2 + $0x12] sm:$0x1]  ;;  %v1752_v2 = vrot.slane %v1721_v6, 7 }
 0x3d2   : > { %v2798_v17 = vpop.permute.xlu0 %2797  ;;  %v1980_v3 = vld [vmem:[#allocation3 + $0x12] sm:$0x1] }
 0x3d3   : > { %v3756_v9 = vpop.permute.xlu1 %2822  ;;  %2972 = vrot.lane.b32.xlu1 %v3567_v52, %s3240_s15  ;;  %2967 = vrot.lane.b32.xlu0 %v3567_v52, %s3243_s18  ;;  %v2429_v52 = vpack.c.bf16 %v3461_v32, %v2794_v14  ;;  %v2800_v19 = vunpack.i.h.bf16 %v2798_v17  ;;  %v2799_v20 = vunpack.i.l.bf16 %v2798_v17  ;;  %v1978_v14 = vld [vmem:[#allocation3 + $0x2] sm:$0x1] }
 0x3d4   : > { %v2824_v16 = vunpack.i.l.bf16 %v3756_v9  ;;  %2427 = vmatpush1.bf16.msra.mxu0 %v2426_v11  ;;  %2466 = vmatpush1.bf16.msra.mxu1 %v2465_v34  ;;  %v2825_v24 = vunpack.i.h.bf16 %v3756_v9  ;;  %v2010_v34 = vrot.slane %v1979_v8, 7 }
 0x3d5   : > { %2428 = vmatprep.subr.bf16.mxu0 %v3244_v46  ;;  %2467 = vmatprep.subr.bf16.mxu1 %v3244_v46  ;;  %v2471_v32 = vpack.c.bf16 %v2800_v19, %v2720_v13  ;;  %v2432_v48 = vpack.c.bf16 %v2799_v20, %v2719_v49  ;;  %v2804_v13 = vunpack.i.l.bf16 %v3717_v30  ;;  %v1723_v19 = vld [vmem:[#allocation2 + $0x1a] sm:$0x1]  ;;  %v1754_v20 = vrot.slane %v1722_v1, 6 }
 0x3d6   : > { %v2808_v21 = vpop.permute.xlu0 %2807  ;;  %v2991_v25 = vpack.i.bf16 %v2824_v16, %v3552_v42  ;;  %v2996_v5 = vpack.i.bf16 %v2825_v24, %v3555_v43 }
 0x3d7   : > { %2977 = vrot.lane.b32.xlu0 %v3764_v15, %s3232_s6  ;;  %2987 = vrot.lane.b32.xlu1 %v3769_v18, %s3230_s29  ;;  %v2810_v26 = vunpack.i.h.bf16 %v2808_v21  ;;  %v2809_v47 = vunpack.i.l.bf16 %v2808_v21  ;;  %v2828_v27 = vpop.permute.xlu1 %2827  ;;  %v1981_v21 = vld [vmem:[#allocation3 + $0x1a] sm:$0x1] }
 0x3d8   : > { %2430 = vmatpush1.bf16.msra.mxu0 %v2429_v52  ;;  %2469 = vmatpush1.bf16.msra.mxu1 %v2468_v7  ;;  %v2829_v45 = vunpack.i.l.bf16 %v2828_v27  ;;  %v2830_v44 = vunpack.i.h.bf16 %v2828_v27  ;;  %v1724_v27 = vld [vmem:[#allocation2 + $0x22] sm:$0x1] }
 0x3d9   : > { %2431 = vmatprep.subr.bf16.mxu0 %v3244_v46  ;;  %2470 = vmatprep.subr.bf16.mxu1 %v3244_v46  ;;  %v2474_v49 = vpack.c.bf16 %v2810_v26, %v2805_v28  ;;  %v2435_v29 = vpack.c.bf16 %v2809_v47, %v2804_v13  ;;  %v1982_v28 = vld [vmem:[#allocation3 + $0x22] sm:$0x1]  ;;  %v2014_v13 = vrot.slane %v1981_v21, 5 }
 0x3da   : > { %v2818_v33 = vpop.permute.xlu0 %2817 }
 0x3db   : > { %2982 = vrot.lane.b32.xlu0 %v3769_v18, %s3234_s8  ;;  %2992 = vrot.lane.b32.xlu1 %v2991_v25, %s3245_s24  ;;  %v2820_v31 = vunpack.i.h.bf16 %v2818_v33  ;;  %v2819_v54 = vunpack.i.l.bf16 %v2818_v33  ;;  %v2838_v30 = vpop.permute.xlu1 %2837  ;;  %v2012_v25 = vrot.slane %v1980_v3, 6  ;;  %v1985_v3 = vld [vmem:[#allocation3 + $0x3a] sm:$0x1] }
 0x3dc   : > { %2433 = vmatpush1.bf16.msra.mxu0 %v2432_v48  ;;  %2472 = vmatpush1.bf16.msra.mxu1 %v2471_v32  ;;  %v2839_v61 = vunpack.i.l.bf16 %v2838_v30  ;;  %v2840_v7 = vunpack.i.h.bf16 %v2838_v30  ;;  %v1753_v32 = vsel %vm692_vm3, %v1752_v2, %v1720_v12  ;;  %v2011_v48 = vsel %vm692_vm3, %v2010_v34, %v1978_v14  ;;  %v1727_v2 = vld [vmem:[#allocation2 + $0x3a] sm:$0x1] }
 0x3dd   : > { %2434 = vmatprep.subr.bf16.mxu0 %v3244_v46  ;;  %2473 = vmatprep.subr.bf16.mxu1 %v3244_v46  ;;  %v2477_v56 = vpack.c.bf16 %v2820_v31, %v2815_v37  ;;  %v2438_v57 = vpack.c.bf16 %v2819_v54, %v2814_v41  ;;  %v1983_v37 = vld [vmem:[#allocation3 + $0x2a] sm:$0x1]  ;;  %v2016_v41 = vrot.slane %v1982_v28, 4  ;;  %v2022_v14 = vrot.slane %v1985_v3, 1 }
 0x3de   : > { %v2833_v35 = vpop.permute.xlu0 %2832 }
 0x3df   : > { %v2834_v36 = vunpack.i.l.bf16 %v2833_v35  ;;  %2997 = vrot.lane.b32.xlu0 %v2996_v5, %s3245_s24  ;;  %v2835_v51 = vunpack.i.h.bf16 %v2833_v35  ;;  %v2848_v63 = vpop.permute.xlu1 %2847  ;;  %v1756_v5 = vrot.slane %v1723_v19, 5  ;;  %v1725_v35 = vld [vmem:[#allocation2 + $0x2a] sm:$0x1] }
 0x3e0   : > { %2436 = vmatpush1.bf16.msra.mxu0 %v2435_v29  ;;  %2475 = vmatpush1.bf16.msra.mxu1 %v2474_v49  ;;  %v2849_v26 = vunpack.i.l.bf16 %v2848_v63  ;;  %v1755_v49 = vsel %vm695_vm4, %v1754_v20, %v1753_v32  ;;  %v2013_v29 = vsel %vm695_vm4, %v2012_v25, %v2011_v48 }
 0x3e1   : > { %v3006_v59 = vpack.i.bf16 %v2834_v36, %v2829_v45  ;;  %2437 = vmatprep.subr.bf16.mxu0 %v3244_v46  ;;  %2476 = vmatprep.subr.bf16.mxu1 %v3244_v46  ;;  %v3016_v62 = vpack.i.bf16 %v2835_v51, %v2830_v44  ;;  %v1758_v36 = vrot.slane %v1724_v27, 4  ;;  %v1757_v30 = vsel %vm698_vm5, %v1756_v5, %v1755_v49 }
 0x3e2   : > { %v2843_v60 = vpop.permute.xlu0 %2842  ;;  %v2015_v44 = vsel %vm698_vm5, %v2014_v13, %v2013_v29  ;;  %v2850_v51 = vunpack.i.h.bf16 %v2848_v63 }
 0x3e3   : > { %3002 = vrot.lane.b32.xlu0 %v3769_v18, %s3231_s5  ;;  %3007 = vrot.lane.b32.xlu1 %v3006_v59, %s3245_s24  ;;  %v2844_v22 = vunpack.i.l.bf16 %v2843_v60  ;;  %v2845_v52 = vunpack.i.h.bf16 %v2843_v60  ;;  %v2858_v33 = vpop.permute.xlu1 %2857  ;;  %v1984_v60 = vld [vmem:[#allocation3 + $0x32] sm:$0x1]  ;;  %v1759_v8 = vsel %vm701_vm6, %v1758_v36, %v1757_v30 }
 0x3e4   : > { %2439 = vmatpush1.bf16.msra.mxu0 %v2438_v57  ;;  %2478 = vmatpush1.bf16.msra.mxu1 %v2477_v56  ;;  %v2859_v54 = vunpack.i.l.bf16 %v2858_v33  ;;  %v1726_v56 = vld [vmem:[#allocation2 + $0x32] sm:$0x1]  ;;  %v1760_v57 = vrot.slane %v1725_v35, 3  ;;  %v2020_v34 = vrot.slane %v1984_v60, 2 }
 0x3e5   : > { %2440 = vmatprep.subr.bf16.mxu0 %v3244_v46  ;;  %2479 = vmatprep.subr.bf16.mxu1 %v3244_v46  ;;  %v3021_v11 = vpack.i.bf16 %v2844_v22, %v2839_v61  ;;  %v3036_v45 = vpack.i.bf16 %v2845_v52, %v2840_v7  ;;  %v2018_v61 = vrot.slane %v1983_v37, 3  ;;  %v2860_v22 = vunpack.i.h.bf16 %v2858_v33 }
 0x3e6   : > { %v2853_v17 = vpop.permute.xlu0 %2852  ;;  %v3056_v6 = vpack.i.bf16 %v3570_v53, %v2859_v54  ;;  %v1762_v63 = vrot.slane %v1726_v56, 2 }
 0x3e7   : > { %3017 = vrot.lane.b32.xlu0 %v3016_v62, %s3245_s24  ;;  %3012 = vrot.lane.b32.xlu1 %v3769_v18, %s3236_s11  ;;  %v2854_v47 = vunpack.i.l.bf16 %v2853_v17  ;;  %v2855_v59 = vunpack.i.h.bf16 %v2853_v17  ;;  %v2017_v62 = vsel %vm701_vm6, %v2016_v41, %v2015_v44  ;;  %v3061_v53 = vpack.i.bf16 %v3573_v55, %v2860_v22  ;;  %v1343_v52 = vpop.permute.xlu1 %1342  ;;  %s656_s11 = sld [smem:[#allocation4]] }
 0x3e8   : > { %v2019_v12 = vsel %vm704_vm7, %v2018_v61, %v2017_v62 }
 0x3e9   : > { %v3041_v31 = vpack.i.bf16 %v2854_v47, %v2849_v26  ;;  %v3051_v1 = vpack.i.bf16 %v2855_v59, %v2850_v51  ;;  %v2021_v7 = vsel %vm707_vm8, %v2020_v34, %v2019_v12 }
 0x3ea   : > { %v3844_v55 = vsel %vm710_vm9, %v2022_v14, %v2021_v7  ;;  %v1601_v21 = vpop.permute.xlu0 %1600 }
 0x3eb   : > { %3027 = vrot.lane.b32.xlu0 %v3769_v18, %s3233_s7  ;;  %3022 = vrot.lane.b32.xlu1 %v3021_v11, %s3245_s24  ;;  %v1761_v11 = vsel %vm704_vm7, %v1760_v57, %v1759_v8  ;;  %v3864_v32 = vpop.permute.xlu1 %2872 }
 0x3ec   : > { %v1763_v17 = vsel %vm707_vm8, %v1762_v63, %v1761_v11 }
 0x3ee   : > { %v3857_v25 = vpop.permute.xlu0 %2862 }
 0x3ef   : > { %3037 = vrot.lane.b32.xlu0 %v3036_v45, %s3245_s24  ;;  %3032 = vrot.lane.b32.xlu1 %v3769_v18, %s3237_s12  ;;  %v3872_v26 = vpop.permute.xlu1 %2882 }
 0x3f2   : > { %v3866_v48 = vpop.permute.xlu0 %2867 }
 0x3f3   : > { %3047 = vrot.lane.b32.xlu0 %v3769_v18, %s3235_s10  ;;  %3042 = vrot.lane.b32.xlu1 %v3041_v31, %s3245_s24  ;;  %v1764_v18 = vrot.slane %v1727_v2, 1  ;;  %v3880_v33 = vpop.permute.xlu1 %2892 }
 0x3f5   : > { %v3841_v19 = vsel %vm710_vm9, %v1764_v18, %v1763_v17 }
 0x3f6   : > { %v3066_v20 = vpack.i.bf16 %v3844_v55, %v3841_v19  ;;  %v3874_v47 = vpop.permute.xlu0 %2877 }
 0x3f7   : > { %3057 = vrot.lane.b32.xlu0 %v3056_v6, %s3245_s24  ;;  %3052 = vrot.lane.b32.xlu1 %v3051_v1, %s3245_s24 }
 0x3fa   : > { %v3882_v27 = vpop.permute.xlu0 %2887 }
 0x3fb   : > { %1868 = vrot.lane.b32.xlu0 %v3747_v50, %s3232_s6  ;;  %3062 = vrot.lane.b32.xlu1 %v3061_v53, %s3245_s24 }
 0x3ff   : > { %1364 = vrot.lane.b32.xlu0 %v1343_v52, %s3245_s24  ;;  %2126 = vrot.lane.b32.xlu1 %v3750_v10, %s3232_s6 }
 0x403   : > { %1622 = vrot.lane.b32.xlu0 %v1601_v21, %s3245_s24  ;;  %3067 = vrot.lane.b32.xlu1 %v3066_v20, %s3232_s6  ;;  %v2864_v21 = vunpack.i.l.bf16 %v3857_v25 }
 0x407   : > { %3077 = vrot.lane.b32.xlu0 %v3066_v20, %s3241_s16  ;;  %3072 = vrot.lane.b32.xlu1 %v3066_v20, %s3238_s13 }
 0x40b   : > { %3087 = vrot.lane.b32.xlu0 %v3066_v20, %s3243_s18  ;;  %3082 = vrot.lane.b32.xlu1 %v3066_v20, %s3239_s14 }
 0x40f   : > { %3097 = vrot.lane.b32.xlu0 %v3066_v20, %s3245_s24  ;;  %3092 = vrot.lane.b32.xlu1 %v3066_v20, %s3240_s15 }
 0x413   : > { %3107 = vrot.lane.b32.xlu0 %v3764_v15, %s3238_s13  ;;  %3102 = vrot.lane.b32.xlu1 %v3066_v20, %s3242_s17 }
 0x417   : > { %3117 = vrot.lane.b32.xlu0 %v3764_v15, %s3239_s14  ;;  %3112 = vrot.lane.b32.xlu1 %v3764_v15, %s3241_s16 }
 0x41b   : > { %3127 = vrot.lane.b32.xlu0 %v3764_v15, %s3240_s15  ;;  %3122 = vrot.lane.b32.xlu1 %v3764_v15, %s3243_s18 }
 0x425   : > { %v2903_v5 = vpop.permute.xlu1 %2902  ;;  %v2898_v28 = vpop.permute.xlu0 %2897 }
 0x426   : > { %v2905_v13 = vunpack.i.h.bf16 %v2903_v5  ;;  %v2904_v45 = vunpack.i.l.bf16 %v2903_v5  ;;  %v2900_v49 = vunpack.i.h.bf16 %v2898_v28  ;;  %v2899_v29 = vunpack.i.l.bf16 %v2898_v28 }
 0x428   : > { %v2480_v31 = vpack.c.bf16 %v2905_v13, %v2904_v45  ;;  %v2441_v54 = vpack.c.bf16 %v2900_v49, %v2899_v29  ;;  %v3899_v45 = vld [vmem:[%s4079_s2] sm:$0xff] }
 0x429   : > { %v2913_v35 = vpop.permute.xlu1 %2912  ;;  %v2908_v36 = vpop.permute.xlu0 %2907 }
 0x42a   : > { %v2915_v37 = vunpack.i.h.bf16 %v2913_v35  ;;  %v2914_v41 = vunpack.i.l.bf16 %v2913_v35  ;;  %v2910_v30 = vunpack.i.h.bf16 %v2908_v36  ;;  %v2909_v44 = vunpack.i.l.bf16 %v2908_v36  ;;  %2442 = vmatpush1.bf16.msra.mxu0 %v2441_v54  ;;  %2481 = vmatpush1.bf16.msra.mxu1 %v2480_v31 }
 0x42b   : > { %2443 = vmatprep.subr.bf16.mxu0 %v3244_v46  ;;  %2482 = vmatprep.subr.bf16.mxu1 %v3244_v46  ;;  %v2865_v31 = vunpack.i.h.bf16 %v3857_v25  ;;  %v2495_v54 = vpack.c.bf16 %v2864_v21, %v3604_v38  ;;  %v2874_v35 = vunpack.i.l.bf16 %v3864_v32  ;;  %v2869_v36 = vunpack.i.l.bf16 %v3866_v48 }
 0x42c   : > { %v2483_v15 = vpack.c.bf16 %v2915_v37, %v2914_v41  ;;  %v2444_v51 = vpack.c.bf16 %v2910_v30, %v2909_v44  ;;  %v3913_v37 = vld [vmem:[%s4080_s3] sm:$0xff]  ;;  %v2875_v38 = vunpack.i.h.bf16 %v3864_v32  ;;  %v2884_v25 = vunpack.i.l.bf16 %v3872_v26 }
 0x42d   : > { %v2923_v59 = vpop.permute.xlu1 %2922  ;;  %v2918_v56 = vpop.permute.xlu0 %2917  ;;  %v2534_v44 = vpack.c.bf16 %v2865_v31, %v3607_v39  ;;  %v2885_v32 = vunpack.i.h.bf16 %v3872_v26 }
 0x42e   : > { %v2925_v57 = vunpack.i.h.bf16 %v2923_v59  ;;  %v2924_v60 = vunpack.i.l.bf16 %v2923_v59  ;;  %v2920_v61 = vunpack.i.h.bf16 %v2918_v56  ;;  %v2919_v22 = vunpack.i.l.bf16 %v2918_v56  ;;  %2445 = vmatpush1.bf16.msra.mxu0 %v2444_v51  ;;  %2484 = vmatpush1.bf16.msra.mxu1 %v2483_v15 }
 0x42f   : > { %2446 = vmatprep.subr.bf16.mxu0 %v3244_v46  ;;  %2485 = vmatprep.subr.bf16.mxu1 %v3244_v46  ;;  %v2870_v15 = vunpack.i.h.bf16 %v3866_v48  ;;  %v2498_v51 = vpack.c.bf16 %v2874_v35, %v2869_v36  ;;  %v2879_v59 = vunpack.i.l.bf16 %v3874_v47  ;;  %v2880_v56 = vunpack.i.h.bf16 %v3874_v47 }
 0x430   : > { %v2486_v6 = vpack.c.bf16 %v2925_v57, %v2924_v60  ;;  %v2447_v8 = vpack.c.bf16 %v2920_v61, %v2919_v22  ;;  %v2894_v60 = vunpack.i.l.bf16 %v3880_v33  ;;  %v2889_v61 = vunpack.i.l.bf16 %v3882_v27 }
 0x431   : > { %v2938_v62 = vpop.permute.xlu1 %2937  ;;  %v2928_v1 = vpop.permute.xlu0 %2927  ;;  %v2537_v39 = vpack.c.bf16 %v2875_v38, %v2870_v15  ;;  %v2501_v48 = vpack.c.bf16 %v2884_v25, %v2879_v59  ;;  %v2540_v26 = vpack.c.bf16 %v2885_v32, %v2880_v56  ;;  %v2895_v47 = vunpack.i.h.bf16 %v3880_v33 }
 0x432   : > { %v2930_v2 = vunpack.i.h.bf16 %v2928_v1  ;;  %v2929_v63 = vunpack.i.l.bf16 %v2928_v1  ;;  %2448 = vmatpush1.bf16.msra.mxu0 %v2447_v8  ;;  %2487 = vmatpush1.bf16.msra.mxu1 %v2486_v6  ;;  %v2940_v3 = vunpack.i.h.bf16 %v2938_v62  ;;  %v2939_v34 = vunpack.i.l.bf16 %v2938_v62 }
 0x433   : > { %2449 = vmatprep.subr.bf16.mxu0 %v3244_v46  ;;  %2488 = vmatprep.subr.bf16.mxu1 %v3244_v46  ;;  %v2890_v22 = vunpack.i.h.bf16 %v3882_v27  ;;  %v2504_v62 = vpack.c.bf16 %v2894_v60, %v2889_v61 }
 0x434   : > { %v2450_v11 = vpack.c.bf16 %v2930_v2, %v2929_v63  ;;  %v2453_v17 = vpack.c.bf16 %v2940_v3, %v2939_v34 }
 0x435   : > { %v3890_v12 = vpop.permute.xlu1 %2952  ;;  %v2933_v53 = vpop.permute.xlu0 %2932  ;;  %v2543_v34 = vpack.c.bf16 %v2895_v47, %v2890_v22 }
 0x436   : > { %v2935_v18 = vunpack.i.h.bf16 %v2933_v53  ;;  %v2934_v14 = vunpack.i.l.bf16 %v2933_v53  ;;  %2451 = vmatpush1.bf16.msra.mxu0 %v2450_v11  ;;  %v2954_v11 = vunpack.i.l.bf16 %v3890_v12 }
 0x437   : > { %2452 = vmatprep.subr.bf16.mxu0 %v3244_v46 }
 0x438   : > { %v2489_v7 = vpack.c.bf16 %v2935_v18, %v2934_v14 }
 0x439   : > { %v837_v52 = vpop.permute.xlu1 %836  ;;  %v2943_v20 = vpop.permute.xlu0 %2942 }
 0x43a   : > { %v2945_v5 = vunpack.i.h.bf16 %v2943_v20  ;;  %v2944_v28 = vunpack.i.l.bf16 %v2943_v20  ;;  %2454 = vmatpush1.bf16.msra.mxu0 %v2453_v17  ;;  %2490 = vmatpush1.bf16.msra.mxu1 %v2489_v7 }
 0x43b   : > { %905 = vmatprep.subr.mxu0 %v3223_v0  ;;  %2491 = vmatprep.subr.bf16.mxu1 %v3244_v46 }
 0x43c   : > { %v2492_v13 = vpack.c.bf16 %v2945_v5, %v2944_v28  ;;  %v2955_v5 = vunpack.i.h.bf16 %v3890_v12 }
 0x43d   : > { %v1096_v49 = vpop.permute.xlu1 %1095  ;;  %v3901_v29 = vpop.permute.xlu0 %2947 }
 0x43e   : > { %906 = vmatpush1.msra.mxu0 %v837_v52  ;;  %2493 = vmatpush1.bf16.msra.mxu1 %v2492_v13  ;;  %v2949_v1 = vunpack.i.l.bf16 %v3901_v29  ;;  %v2950_v18 = vunpack.i.h.bf16 %v3901_v29  ;;  %v2549_v36 = vpack.c.bf16 %v2955_v5, %v2825_v24 }
 0x43f   : > { %2494 = vmatprep.subr.bf16.mxu0 %v3244_v46  ;;  %918 = vmatmul.mubr.f32.vlgmr.msra.gmra.mrb[0].mxu0 %v3899_v45 }
 0x440   : > { %2496 = vmatpush1.bf16.msra.mxu0 %v2495_v54  ;;  %1163 = vmatprep.subr.mxu1 %v3223_v0  ;;  %v2507_v14 = vpack.c.bf16 %v3552_v42, %v2949_v1  ;;  %v2510_v42 = vpack.c.bf16 %v2954_v11, %v2824_v16  ;;  %v2546_v13 = vpack.c.bf16 %v3555_v43, %v2950_v18 }
 0x441   : > { %v3917_v41 = vpop.permute.xlu1 %2962  ;;  %v3919_v30 = vpop.permute.xlu0 %2957  ;;  %2497 = vmatprep.subr.bf16.mxu0 %v3244_v46  ;;  %2408 = vmatprep.mubr.msk.f32.mxu0 %vm849_vm10, %v3674_v23 }
 0x442   : > { %1164 = vmatpush1.msra.mxu1 %v1096_v49  ;;  %v2964_v49 = vunpack.i.l.bf16 %v3917_v41  ;;  %v2959_v29 = vunpack.i.l.bf16 %v3919_v30  ;;  %v2965_v12 = vunpack.i.h.bf16 %v3917_v41  ;;  %v2960_v31 = vunpack.i.h.bf16 %v3919_v30 }
 0x443   : > { %2533 = vmatprep.subr.bf16.mxu1 %v3244_v46  ;;  %1176 = vmatmul.mubr.f32.vlgmr.msra.gmra.mrb[0].mxu1 %v3913_v37 }
 0x444   : > { %2499 = vmatpush1.bf16.msra.mxu0 %v2498_v51  ;;  %2535 = vmatpush1.bf16.msra.mxu1 %v2534_v44  ;;  %v2513_v38 = vpack.c.bf16 %v2964_v49, %v2959_v29  ;;  %v2552_v25 = vpack.c.bf16 %v2965_v12, %v2960_v31 }
 0x445   : > { %v3931_v57 = vpop.permute.xlu1 %2972  ;;  %v3933_v23 = vpop.permute.xlu0 %2967  ;;  %2500 = vmatprep.subr.bf16.mxu0 %v3244_v46  ;;  %2536 = vmatprep.subr.bf16.mxu1 %v3244_v46 }
 0x446   : > { %2409 = vmatprep.mubr.msk.f32.mxu1 %vm849_vm10, %v3695_v58  ;;  %v2974_v54 = vunpack.i.l.bf16 %v3931_v57  ;;  %v2969_v16 = vunpack.i.l.bf16 %v3933_v23  ;;  %v2975_v41 = vunpack.i.h.bf16 %v3931_v57  ;;  %v2970_v30 = vunpack.i.h.bf16 %v3933_v23 }
 0x448   : > { %2502 = vmatpush1.bf16.msra.mxu0 %v2501_v48  ;;  %2538 = vmatpush1.bf16.msra.mxu1 %v2537_v39  ;;  %v2516_v44 = vpack.c.bf16 %v2974_v54, %v2969_v16 }
 0x449   : > { %v3943_v6 = vpop.permute.xlu0 %2977  ;;  %2503 = vmatprep.subr.bf16.mxu0 %v3244_v46  ;;  %2539 = vmatprep.subr.bf16.mxu1 %v3244_v46  ;;  %v2988_v8 = vpop.permute.xlu1 %2987 }
 0x44a   : > { %v2980_v2 = vunpack.i.h.bf16 %v3943_v6  ;;  %v2979_v58 = vunpack.i.l.bf16 %v3943_v6  ;;  %v2990_v63 = vunpack.i.h.bf16 %v2988_v8  ;;  %v2989_v3 = vunpack.i.l.bf16 %v2988_v8 }
 0x44b   : > { %v2555_v8 = vpack.c.bf16 %v2975_v41, %v2970_v30 }
 0x44c   : > { %v3136_v33 = vpack.i.bf16 %v2980_v2, %v3744_v4  ;;  %v3131_v27 = vpack.i.bf16 %v2979_v58, %v3735_v40  ;;  %2505 = vmatpush1.bf16.msra.mxu0 %v2504_v62  ;;  %2541 = vmatpush1.bf16.msra.mxu1 %v2540_v26 }
 0x44d   : > { %v2983_v53 = vpop.permute.xlu0 %2982  ;;  %2506 = vmatprep.subr.bf16.mxu0 %v3244_v46  ;;  %2542 = vmatprep.subr.bf16.mxu1 %v3244_v46  ;;  %v2993_v52 = vpop.permute.xlu1 %2992 }
 0x44e   : > { %v2985_v17 = vunpack.i.h.bf16 %v2983_v53  ;;  %v2984_v7 = vunpack.i.l.bf16 %v2983_v53  ;;  %3137 = vrot.lane.b32.xlu0 %v3136_v33, %s3245_s24  ;;  %3132 = vrot.lane.b32.xlu1 %v3131_v27, %s3245_s24  ;;  %v2995_v15 = vunpack.i.h.bf16 %v2993_v52  ;;  %v2994_v51 = vunpack.i.l.bf16 %v2993_v52 }
 0x450   : > { %v3146_v20 = vpack.i.bf16 %v2990_v63, %v2985_v17  ;;  %v3141_v21 = vpack.i.bf16 %v2989_v3, %v2984_v7  ;;  %2508 = vmatpush1.bf16.msra.mxu0 %v2507_v14  ;;  %2544 = vmatpush1.bf16.msra.mxu1 %v2543_v34  ;;  %v2519_v62 = vpack.c.bf16 %v2995_v15, %v2994_v51 }
 0x451   : > { %v2998_v28 = vpop.permute.xlu0 %2997  ;;  %2509 = vmatprep.subr.bf16.mxu0 %v3244_v46  ;;  %2545 = vmatprep.subr.bf16.mxu1 %v3244_v46 }
 0x452   : > { %3147 = vrot.lane.b32.xlu0 %v3146_v20, %s3245_s24  ;;  %3142 = vrot.lane.b32.xlu1 %v3141_v21, %s3245_s24  ;;  %v3000_v48 = vunpack.i.h.bf16 %v2998_v28  ;;  %v2999_v60 = vunpack.i.l.bf16 %v2998_v28 }
 0x454   : > { %2511 = vmatpush1.bf16.msra.mxu0 %v2510_v42  ;;  %2547 = vmatpush1.bf16.msra.mxu1 %v2546_v13  ;;  %v2558_v1 = vpack.c.bf16 %v3000_v48, %v2999_v60 }
 0x455   : > { %v3003_v35 = vpop.permute.xlu0 %3002  ;;  %v3008_v43 = vpop.permute.xlu1 %3007  ;;  %2512 = vmatprep.subr.bf16.mxu0 %v3244_v46  ;;  %2548 = vmatprep.subr.bf16.mxu1 %v3244_v46 }
 0x456   : > { %v3005_v56 = vunpack.i.h.bf16 %v3003_v35  ;;  %v3004_v9 = vunpack.i.l.bf16 %v3003_v35  ;;  %v3010_v57 = vunpack.i.h.bf16 %v3008_v43  ;;  %v3009_v61 = vunpack.i.l.bf16 %v3008_v43 }
 0x458   : > { %2514 = vmatpush1.bf16.msra.mxu0 %v2513_v38  ;;  %2550 = vmatpush1.bf16.msra.mxu1 %v2549_v36  ;;  %v2522_v33 = vpack.c.bf16 %v3010_v57, %v3009_v61 }
 0x459   : > { %v3018_v59 = vpop.permute.xlu0 %3017  ;;  %v3013_v32 = vpop.permute.xlu1 %3012  ;;  %2515 = vmatprep.subr.bf16.mxu0 %v3244_v46  ;;  %2551 = vmatprep.subr.bf16.mxu1 %v3244_v46 }
 0x45a   : > { %v3015_v24 = vunpack.i.h.bf16 %v3013_v32  ;;  %v3014_v39 = vunpack.i.l.bf16 %v3013_v32  ;;  %v3020_v27 = vunpack.i.h.bf16 %v3018_v59  ;;  %v3019_v63 = vunpack.i.l.bf16 %v3018_v59 }
 0x45c   : > { %v3156_v26 = vpack.i.bf16 %v3015_v24, %v3005_v56  ;;  %v3151_v47 = vpack.i.bf16 %v3014_v39, %v3004_v9  ;;  %2517 = vmatpush1.bf16.msra.mxu0 %v2516_v44  ;;  %2553 = vmatpush1.bf16.msra.mxu1 %v2552_v25  ;;  %v2561_v21 = vpack.c.bf16 %v3020_v27, %v3019_v63 }
 0x45d   : > { %v3028_v23 = vpop.permute.xlu0 %3027  ;;  %v3023_v22 = vpop.permute.xlu1 %3022  ;;  %2518 = vmatprep.subr.bf16.mxu0 %v3244_v46  ;;  %2554 = vmatprep.subr.bf16.mxu1 %v3244_v46 }
 0x45e   : > { %3157 = vrot.lane.b32.xlu0 %v3156_v26, %s3245_s24  ;;  %3152 = vrot.lane.b32.xlu1 %v3151_v47, %s3245_s24  ;;  %v3025_v3 = vunpack.i.h.bf16 %v3023_v22  ;;  %v3024_v34 = vunpack.i.l.bf16 %v3023_v22  ;;  %v3030_v18 = vunpack.i.h.bf16 %v3028_v23  ;;  %v3029_v14 = vunpack.i.l.bf16 %v3028_v23  ;;  %v3181_v26 = vld [vmem:[%s4079_s2 + $0x8] sm:$0xff] }
 0x460   : > { %2520 = vmatpush1.bf16.msra.mxu0 %v2519_v62  ;;  %2556 = vmatpush1.bf16.msra.mxu1 %v2555_v8  ;;  %v2525_v5 = vpack.c.bf16 %v3025_v3, %v3024_v34 }
 0x461   : > { %v3038_v11 = vpop.permute.xlu0 %3037  ;;  %v3033_v53 = vpop.permute.xlu1 %3032  ;;  %2521 = vmatprep.subr.bf16.mxu0 %v3244_v46  ;;  %2557 = vmatprep.subr.bf16.mxu1 %v3244_v46 }
 0x462   : > { %v3035_v17 = vunpack.i.h.bf16 %v3033_v53  ;;  %v3034_v7 = vunpack.i.l.bf16 %v3033_v53  ;;  %v3040_v28 = vunpack.i.h.bf16 %v3038_v11  ;;  %v3039_v42 = vunpack.i.l.bf16 %v3038_v11 }
 0x464   : > { %v3166_v52 = vpack.i.bf16 %v3035_v17, %v3030_v18  ;;  %v3161_v20 = vpack.i.bf16 %v3034_v7, %v3029_v14  ;;  %2523 = vmatpush1.bf16.msra.mxu0 %v2522_v33  ;;  %2559 = vmatpush1.bf16.msra.mxu1 %v2558_v1  ;;  %v2564_v36 = vpack.c.bf16 %v3040_v28, %v3039_v42 }
 0x465   : > { %v3048_v13 = vpop.permute.xlu0 %3047  ;;  %v3043_v49 = vpop.permute.xlu1 %3042  ;;  %2524 = vmatprep.subr.bf16.mxu0 %v3244_v46  ;;  %2560 = vmatprep.subr.bf16.mxu1 %v3244_v46 }
 0x466   : > { %v3050_v29 = vunpack.i.h.bf16 %v3048_v13  ;;  %v3049_v12 = vunpack.i.l.bf16 %v3048_v13  ;;  %v3045_v31 = vunpack.i.h.bf16 %v3043_v49  ;;  %v3044_v54 = vunpack.i.l.bf16 %v3043_v49  ;;  %3167 = vrot.lane.b32.xlu0 %v3166_v52, %s3245_s24  ;;  %3162 = vrot.lane.b32.xlu1 %v3161_v20, %s3245_s24 }
 0x468   : > { %v3176_v16 = vpack.i.bf16 %v3750_v10, %v3050_v29  ;;  %v3171_v35 = vpack.i.bf16 %v3747_v50, %v3049_v12  ;;  %v2528_v43 = vpack.c.bf16 %v3045_v31, %v3044_v54  ;;  %2526 = vmatpush1.bf16.msra.mxu0 %v2525_v5  ;;  %2562 = vmatpush1.bf16.msra.mxu1 %v2561_v21 }
 0x469   : > { %v3058_v38 = vpop.permute.xlu0 %3057  ;;  %v3053_v25 = vpop.permute.xlu1 %3052  ;;  %2527 = vmatprep.subr.bf16.mxu0 %v3244_v46  ;;  %2563 = vmatprep.subr.bf16.mxu1 %v3244_v46 }
 0x46a   : > { %v3060_v41 = vunpack.i.h.bf16 %v3058_v38  ;;  %v3059_v30 = vunpack.i.l.bf16 %v3058_v38  ;;  %v3055_v44 = vunpack.i.h.bf16 %v3053_v25  ;;  %v3054_v15 = vunpack.i.l.bf16 %v3053_v25  ;;  %3177 = vrot.lane.b32.xlu0 %v3176_v16, %s3245_s24  ;;  %3172 = vrot.lane.b32.xlu1 %v3171_v35, %s3245_s24 }
 0x46c   : > { %v2531_v10 = vpack.c.bf16 %v3060_v41, %v3059_v30  ;;  %2529 = vmatpush1.bf16.msra.mxu0 %v2528_v43  ;;  %2565 = vmatpush1.bf16.msra.mxu1 %v2564_v36  ;;  %v2567_v59 = vpack.c.bf16 %v3055_v44, %v3054_v15 }
 0x46d   : > { %v1869_v50 = vpop.permute.xlu0 %1868  ;;  %v3063_v51 = vpop.permute.xlu1 %3062  ;;  %2566 = vmatprep.subr.bf16.mxu1 %v3244_v46  ;;  %2530 = vmatprep.subr.bf16.mxu0 %v3244_v46 }
 0x46e   : > { %v3065_v32 = vunpack.i.h.bf16 %v3063_v51  ;;  %v3064_v56 = vunpack.i.l.bf16 %v3063_v51  ;;  %1890 = vrot.lane.b32.xlu1 %v1869_v50, %s3245_s24 }
 0x470   : > { %2568 = vmatpush1.bf16.msra.mxu1 %v2567_v59  ;;  %2532 = vmatpush1.bf16.msra.mxu0 %v2531_v10  ;;  %v2570_v39 = vpack.c.bf16 %v3065_v32, %v3064_v56 }
 0x471   : > { %v1365_v9 = vpop.permute.xlu0 %1364  ;;  %v2127_v24 = vpop.permute.xlu1 %2126  ;;  %2569 = vmatprep.subr.bf16.mxu1 %v3244_v46  ;;  %1432 = vmatprep.subr.mxu0 %v3223_v0 }
 0x472   : > { %2148 = vrot.lane.b32.xlu0 %v2127_v24, %s3245_s24 }
 0x474   : > { %2571 = vmatpush1.bf16.msra.mxu1 %v2570_v39  ;;  %1433 = vmatpush1.msra.mxu0 %v1365_v9 }
 0x475   : > { %v1623_v48 = vpop.permute.xlu0 %1622  ;;  %v3068_v60 = vpop.permute.xlu1 %3067  ;;  %1690 = vmatprep.subr.mxu1 %v3223_v0  ;;  %2572 = vmatprep.subr.bf16.mxu0 %v3244_v46 }
 0x476   : > { %v3070_v57 = vunpack.i.h.bf16 %v3068_v60  ;;  %v3069_v61 = vunpack.i.l.bf16 %v3068_v60  ;;  %1445 = vmatmul.mubr.f32.vlgmr.msra.gmra.mrb[2].mxu0 %v3899_v45 }
 0x477   : > { %2411 = vmatprep.mubr.msk.f32.mxu0 %vm849_vm10, %v3181_v26 }
 0x478   : > { %v2612_v47 = vpack.c.bf16 %v3070_v57, %v3844_v55  ;;  %v2573_v23 = vpack.c.bf16 %v3069_v61, %v3841_v19  ;;  %1691 = vmatpush1.msra.mxu1 %v1623_v48  ;;  %v3182_v19 = vld [vmem:[%s4080_s3 + $0x8] sm:$0xff] }
 0x479   : > { %v3078_v22 = vpop.permute.xlu0 %3077  ;;  %v3073_v8 = vpop.permute.xlu1 %3072  ;;  %2611 = vmatprep.subr.bf16.mxu1 %v3244_v46  ;;  %1703 = vmatmul.mubr.f32.vlgmr.msra.gmra.mrb[2].mxu1 %v3913_v37 }
 0x47a   : > { %v3080_v62 = vunpack.i.h.bf16 %v3078_v22  ;;  %v3079_v1 = vunpack.i.l.bf16 %v3078_v22  ;;  %v3075_v33 = vunpack.i.h.bf16 %v3073_v8  ;;  %v3074_v27 = vunpack.i.l.bf16 %v3073_v8  ;;  %2574 = vmatpush1.bf16.msra.mxu0 %v2573_v23  ;;  %2613 = vmatpush1.bf16.msra.mxu1 %v2612_v47 }
 0x47b   : > { %2575 = vmatprep.subr.bf16.mxu0 %v3244_v46  ;;  %2614 = vmatprep.subr.bf16.mxu1 %v3244_v46 }
 0x47c   : > { %v2615_v55 = vpack.c.bf16 %v3080_v62, %v3075_v33  ;;  %v2576_v63 = vpack.c.bf16 %v3079_v1, %v3074_v27  ;;  %2412 = vmatprep.mubr.msk.f32.mxu1 %vm849_vm10, %v3182_v19 }
 0x47d   : > { %v3088_v3 = vpop.permute.xlu0 %3087  ;;  %v3083_v34 = vpop.permute.xlu1 %3082 }
 0x47e   : > { %v3090_v11 = vunpack.i.h.bf16 %v3088_v3  ;;  %v3089_v53 = vunpack.i.l.bf16 %v3088_v3  ;;  %v3085_v18 = vunpack.i.h.bf16 %v3083_v34  ;;  %v3084_v14 = vunpack.i.l.bf16 %v3083_v34  ;;  %2577 = vmatpush1.bf16.msra.mxu0 %v2576_v63  ;;  %2616 = vmatpush1.bf16.msra.mxu1 %v2615_v55 }
 0x47f   : > { %2578 = vmatprep.subr.bf16.mxu0 %v3244_v46  ;;  %2617 = vmatprep.subr.bf16.mxu1 %v3244_v46 }
 0x480   : > { %v2618_v17 = vpack.c.bf16 %v3090_v11, %v3085_v18  ;;  %v2579_v7 = vpack.c.bf16 %v3089_v53, %v3084_v14 }
 0x481   : > { %v3098_v52 = vpop.permute.xlu0 %3097  ;;  %v3093_v20 = vpop.permute.xlu1 %3092 }
 0x482   : > { %v3100_v21 = vunpack.i.h.bf16 %v3098_v52  ;;  %v3099_v5 = vunpack.i.l.bf16 %v3098_v52  ;;  %v3095_v28 = vunpack.i.h.bf16 %v3093_v20  ;;  %v3094_v42 = vunpack.i.l.bf16 %v3093_v20  ;;  %2580 = vmatpush1.bf16.msra.mxu0 %v2579_v7  ;;  %2619 = vmatpush1.bf16.msra.mxu1 %v2618_v17 }
 0x483   : > { %2581 = vmatprep.subr.bf16.mxu0 %v3244_v46  ;;  %2620 = vmatprep.subr.bf16.mxu1 %v3244_v46 }
 0x484   : > { %v2621_v13 = vpack.c.bf16 %v3100_v21, %v3095_v28  ;;  %v2582_v49 = vpack.c.bf16 %v3099_v5, %v3094_v42 }
 0x485   : > { %v3108_v29 = vpop.permute.xlu0 %3107  ;;  %v3103_v12 = vpop.permute.xlu1 %3102 }
 0x486   : > { %v3105_v31 = vunpack.i.h.bf16 %v3103_v12  ;;  %v3104_v54 = vunpack.i.l.bf16 %v3103_v12  ;;  %2583 = vmatpush1.bf16.msra.mxu0 %v2582_v49  ;;  %2622 = vmatpush1.bf16.msra.mxu1 %v2621_v13  ;;  %v3110_v16 = vunpack.i.h.bf16 %v3108_v29  ;;  %v3109_v35 = vunpack.i.l.bf16 %v3108_v29 }
 0x487   : > { %2584 = vmatprep.subr.bf16.mxu0 %v3244_v46  ;;  %2623 = vmatprep.subr.bf16.mxu1 %v3244_v46 }
 0x488   : > { %v2624_v43 = vpack.c.bf16 %v3744_v4, %v3105_v31  ;;  %v2585_v36 = vpack.c.bf16 %v3735_v40, %v3104_v54  ;;  %v2627_v10 = vpack.c.bf16 %v3110_v16, %v2980_v2  ;;  %v2588_v4 = vpack.c.bf16 %v3109_v35, %v2979_v58 }
 0x489   : > { %v3118_v38 = vpop.permute.xlu0 %3117  ;;  %v3113_v25 = vpop.permute.xlu1 %3112 }
 0x48a   : > { %2586 = vmatpush1.bf16.msra.mxu0 %v2585_v36  ;;  %2625 = vmatpush1.bf16.msra.mxu1 %v2624_v43  ;;  %v3120_v41 = vunpack.i.h.bf16 %v3118_v38  ;;  %v3119_v30 = vunpack.i.l.bf16 %v3118_v38  ;;  %v3115_v44 = vunpack.i.h.bf16 %v3113_v25  ;;  %v3114_v15 = vunpack.i.l.bf16 %v3113_v25 }
 0x48b   : > { %2587 = vmatprep.subr.bf16.mxu0 %v3244_v46  ;;  %2626 = vmatprep.subr.bf16.mxu1 %v3244_v46  ;;  %v1181_v38 = vstv %s656_s11 }
 0x48c   : > { %v2630_v50 = vpack.c.bf16 %v3120_v41, %v3115_v44  ;;  %v2591_v40 = vpack.c.bf16 %v3119_v30, %v3114_v15 }
 0x48d   : > { %v3128_v51 = vpop.permute.xlu0 %3127  ;;  %v3123_v59 = vpop.permute.xlu1 %3122 }
 0x48e   : > { %2589 = vmatpush1.bf16.msra.mxu0 %v2588_v4  ;;  %2628 = vmatpush1.bf16.msra.mxu1 %v2627_v10  ;;  %v3130_v32 = vunpack.i.h.bf16 %v3128_v51  ;;  %v3129_v56 = vunpack.i.l.bf16 %v3128_v51  ;;  %v3125_v9 = vunpack.i.h.bf16 %v3123_v59  ;;  %v3124_v24 = vunpack.i.l.bf16 %v3123_v59 }
 0x48f   : > { %2590 = vmatprep.subr.bf16.mxu0 %v3244_v46  ;;  %2629 = vmatprep.subr.bf16.mxu1 %v3244_v46 }
 0x490   : > { %v2633_v39 = vpack.c.bf16 %v3130_v32, %v3125_v9  ;;  %v2594_v48 = vpack.c.bf16 %v3129_v56, %v3124_v24 }
 0x492   : > { %2592 = vmatpush1.bf16.msra.mxu0 %v2591_v40  ;;  %2631 = vmatpush1.bf16.msra.mxu1 %v2630_v50 }
 0x493   : > { %2593 = vmatprep.subr.bf16.mxu0 %v3244_v46  ;;  %2632 = vmatprep.subr.bf16.mxu1 %v3244_v46 }
 0x496   : > { %2595 = vmatpush1.bf16.msra.mxu0 %v2594_v48  ;;  %2634 = vmatpush1.bf16.msra.mxu1 %v2633_v39 }
 0x497   : > { %2596 = vmatprep.subr.bf16.mxu0 %v3244_v46  ;;  %2635 = vmatprep.subr.bf16.mxu1 %v3244_v46 }
 0x4c0   : > { %v3138_v6 = vpop.permute.xlu0 %3137  ;;  %v3133_v2 = vpop.permute.xlu1 %3132 }
 0x4c1   : > { %v3140_v58 = vunpack.i.h.bf16 %v3138_v6  ;;  %v3139_v60 = vunpack.i.l.bf16 %v3138_v6  ;;  %v3135_v57 = vunpack.i.h.bf16 %v3133_v2  ;;  %v3134_v61 = vunpack.i.l.bf16 %v3133_v2 }
 0x4c3   : > { %v2636_v26 = vpack.c.bf16 %v3140_v58, %v3139_v60  ;;  %v2597_v47 = vpack.c.bf16 %v3135_v57, %v3134_v61 }
 0x4c4   : > { %v3148_v23 = vpop.permute.xlu0 %3147  ;;  %v3143_v22 = vpop.permute.xlu1 %3142 }
 0x4c5   : > { %v3150_v8 = vunpack.i.h.bf16 %v3148_v23  ;;  %v3149_v62 = vunpack.i.l.bf16 %v3148_v23  ;;  %v3145_v1 = vunpack.i.h.bf16 %v3143_v22  ;;  %v3144_v33 = vunpack.i.l.bf16 %v3143_v22  ;;  %2598 = vmatpush1.bf16.msra.mxu0 %v2597_v47  ;;  %2637 = vmatpush1.bf16.msra.mxu1 %v2636_v26 }
 0x4c6   : > { %2599 = vmatprep.subr.bf16.mxu0 %v3244_v46  ;;  %2638 = vmatprep.subr.bf16.mxu1 %v3244_v46 }
 0x4c7   : > { %v2639_v27 = vpack.c.bf16 %v3150_v8, %v3149_v62  ;;  %v2600_v55 = vpack.c.bf16 %v3145_v1, %v3144_v33 }
 0x4c9   : > { %2601 = vmatpush1.bf16.msra.mxu0 %v2600_v55  ;;  %2640 = vmatpush1.bf16.msra.mxu1 %v2639_v27 }
 0x4ca   : > { %2602 = vmatprep.subr.bf16.mxu0 %v3244_v46  ;;  %2641 = vmatprep.subr.bf16.mxu1 %v3244_v46 }
 0x4d0   : > { %v3158_v63 = vpop.permute.xlu0 %3157  ;;  %v3153_v19 = vpop.permute.xlu1 %3152 }
 0x4d1   : > { %v3160_v3 = vunpack.i.h.bf16 %v3158_v63  ;;  %v3159_v34 = vunpack.i.l.bf16 %v3158_v63  ;;  %v3155_v11 = vunpack.i.h.bf16 %v3153_v19  ;;  %v3154_v53 = vunpack.i.l.bf16 %v3153_v19 }
 0x4d3   : > { %v2642_v18 = vpack.c.bf16 %v3160_v3, %v3159_v34  ;;  %v2603_v14 = vpack.c.bf16 %v3155_v11, %v3154_v53 }
 0x4d5   : > { %2604 = vmatpush1.bf16.msra.mxu0 %v2603_v14  ;;  %2643 = vmatpush1.bf16.msra.mxu1 %v2642_v18 }
 0x4d6   : > { %2605 = vmatprep.subr.bf16.mxu0 %v3244_v46  ;;  %2644 = vmatprep.subr.bf16.mxu1 %v3244_v46 }
 0x4d8   : > { %v3168_v17 = vpop.permute.xlu0 %3167  ;;  %v3163_v7 = vpop.permute.xlu1 %3162 }
 0x4d9   : > { %v3170_v52 = vunpack.i.h.bf16 %v3168_v17  ;;  %v3169_v20 = vunpack.i.l.bf16 %v3168_v17  ;;  %v3165_v21 = vunpack.i.h.bf16 %v3163_v7  ;;  %v3164_v5 = vunpack.i.l.bf16 %v3163_v7 }
 0x4db   : > { %v2645_v28 = vpack.c.bf16 %v3170_v52, %v3169_v20  ;;  %v2606_v42 = vpack.c.bf16 %v3165_v21, %v3164_v5 }
 0x4dc   : > { %v3178_v13 = vpop.permute.xlu0 %3177  ;;  %v3173_v49 = vpop.permute.xlu1 %3172 }
 0x4dd   : > { %v3180_v29 = vunpack.i.h.bf16 %v3178_v13  ;;  %v3179_v12 = vunpack.i.l.bf16 %v3178_v13  ;;  %v3175_v31 = vunpack.i.h.bf16 %v3173_v49  ;;  %v3174_v54 = vunpack.i.l.bf16 %v3173_v49  ;;  %2607 = vmatpush1.bf16.msra.mxu0 %v2606_v42  ;;  %2646 = vmatpush1.bf16.msra.mxu1 %v2645_v28 }
 0x4de   : > { %2608 = vmatprep.subr.bf16.mxu0 %v3244_v46  ;;  %2647 = vmatprep.subr.bf16.mxu1 %v3244_v46 }
 0x4df   : > { %v2648_v16 = vpack.c.bf16 %v3180_v29, %v3179_v12  ;;  %v2609_v35 = vpack.c.bf16 %v3175_v31, %v3174_v54 }
 0x4e0   : > { %v1891_v43 = vpop.permute.xlu1 %1890 }
 0x4e1   : > { %2610 = vmatpush1.bf16.msra.mxu0 %v2609_v35  ;;  %2649 = vmatpush1.bf16.msra.mxu1 %v2648_v16 }
 0x4e2   : > { %1958 = vmatprep.subr.mxu0 %v3223_v0  ;;  %2216 = vmatprep.subr.mxu1 %v3223_v0 }
 0x4e4   : > { %v2149_v36 = vpop.permute.xlu0 %2148 }
 0x4e5   : > { %1959 = vmatpush1.msra.mxu0 %v1891_v43  ;;  %2217 = vmatpush1.msra.mxu1 %v2149_v36 }
 0x4e6   : > { %1971 = vmatmul.mubr.f32.vlgmr.msra.gmra.mrb[4].mxu0 %v3899_v45  ;;  %2229 = vmatmul.mubr.f32.vlgmr.msra.gmra.mrb[4].mxu1 %v3913_v37 }
 0x512   : > { %v919_v46 = vpop.f32.mrb[0].mxu0 }
 0x513   : > { %v1182_v25 = vmul.f32 %v1181_v38, %v919_v46  ;;  %v921_v41 = vpop.f32.mrb[1].mxu0 }
 0x515   : > { %vm1183_vm11 = vcmp.ge.f32.partialorder %v1182_v25, 0.0  ;;  %v1184_v30 = vmul.f32 0.01, %v1182_v25 }
 0x516   : > { %v1177_v44 = vpop.f32.mrb[0].mxu1 }
 0x517   : > { %v1185_v15 = vsel %vm1183_vm11, %v1182_v25, %v1184_v30  ;;  %vm1186_vm12 = vcmp.ge.f32.partialorder %v1177_v44, 0.0  ;;  %v1187_v10 = vmul.f32 0.01, %v1177_v44  ;;  %v1179_v0 = vpop.f32.mrb[1].mxu1 }
 0x519   : > { %v1188_v4 = vsel %vm1186_vm12, %v1177_v44, %v1187_v10 }
 0x51a   : > { %v1189_v50 = vadd.f32 %v1188_v4, %v1185_v15 }
 0x51c   : > { %1191 = vst.msk [vmem:[%s3360_s9] sm:$0xff] %vm1190_vm13, %v1189_v50 }
 0x549   : > { %v1446_v45 = vpop.f32.mrb[2].mxu0 }
 0x54a   : > { %v1708_v37 = vmul.f32 %v1446_v45, %v1181_v38  ;;  %v1448_v40 = vpop.f32.mrb[3].mxu0 }
 0x54c   : > { %vm1709_vm14 = vcmp.ge.f32.partialorder %v1708_v37, 0.0  ;;  %v1710_v51 = vmul.f32 0.01, %v1708_v37  ;;  %v1704_v59 = vpop.f32.mrb[2].mxu1 }
 0x54d   : > { %vm1712_vm15 = vcmp.ge.f32.partialorder %v1704_v59, 0.0  ;;  %v1713_v32 = vmul.f32 0.01, %v1704_v59  ;;  %v1706_v56 = vpop.f32.mrb[3].mxu1 }
 0x54e   : > { %v1711_v9 = vsel %vm1709_vm14, %v1708_v37, %v1710_v51 }
 0x54f   : > { %v1714_v24 = vsel %vm1712_vm15, %v1704_v59, %v1713_v32 }
 0x550   : > { %v1715_v39 = vadd.f32 %v1714_v24, %v1711_v9 }
 0x552   : > { %2410 = vst.msk [vmem:[%s3360_s9 + $0x8] sm:$0xff] %vm1190_vm13, %v1715_v39 }
 0x5b9   : > { %v1972_v48 = vpop.f32.mrb[4].mxu0  ;;  %v2230_v6 = vpop.f32.mrb[4].mxu1 }
 0x5ba   : > { %v2234_v2 = vmul.f32 %v1972_v48, %v1181_v38  ;;  %v2239_v58 = vmul.f32 0.01, %v2230_v6  ;;  %v1974_v60 = vpop.f32.mrb[5].mxu0  ;;  %v2232_v57 = vpop.f32.mrb[5].mxu1  ;;  %vm2238_vm0 = vcmp.ge.f32.partialorder %v2230_v6, 0.0 }
 0x5bc   : > { %vm2235_vm1 = vcmp.ge.f32.partialorder %v2234_v2, 0.0  ;;  %v2236_v61 = vmul.f32 0.01, %v2234_v2  ;;  %v2240_v47 = vsel %vm2238_vm0, %v2230_v6, %v2239_v58 }
 0x5be   : > { %v2237_v26 = vsel %vm2235_vm1, %v2234_v2, %v2236_v61 }
 0x5bf   : > { %v2241_v23 = vadd.f32 %v2240_v47, %v2237_v26 }
 0x5c1   : > { %2413 = vst.msk [vmem:[%s3360_s9 + $0x10] sm:$0xff] %vm1190_vm13, %v2241_v23 }
 0x5c2 PF: > { %s15_s21 = sadd.s32 1, %s3221_s21   ;;  %s4082_s17 = smov %s3213_s19 }
 0x5c3   : > { %p12_p11 = scmp.ge.s32.totalorder %s15_s21, 6   ;;  %s4083_s18 = smov %s3217_s20 }
 0x5c4   : > { %s4084_s19 = smov %s4087_s0  ;;  %s4085_s20 = smov %s4091_s22 }
 0x5c5   :  { %14 = sbr.rel (!%p12_p11) target bundleno = 3 (0x3), region = 98 }

</bundles_post_ra>
